<compile_context>
chip_gen: v7x
topology: tpu7x:2x2x1
jax: 0.10.0
libtpu: 0.0.40
codegen_flags: <defaults>
</compile_context>

<pallas_src>
import math
import functools

import jax
import jax.numpy as jnp
from jax.experimental import pallas as pl
from jax.experimental.pallas import tpu as pltpu

PAD_IDX = 0
NUM_TOKENS = 21                      # len(mapping) (PAD + 20 amino acids)
NEG_INF = float("-inf")
LN_EPS = 1e-5


# ----------------------------- in-kernel helpers -----------------------------

def _layer_norm(x, gamma, beta):
    mu = jnp.mean(x, axis=-1, keepdims=True)
    var = jnp.mean((x - mu) ** 2, axis=-1, keepdims=True)
    return (x - mu) * jax.lax.rsqrt(var + LN_EPS) * gamma + beta


def _gelu(x):
    # exact (erf) GELU, matching torch.nn.functional.gelu default
    return 0.5 * x * (1.0 + jax.lax.erf(x * (1.0 / math.sqrt(2.0))))


# ------------------------------- fused kernel --------------------------------

def fused_kernel(num_heads, num_layers,
                 coords_ref, padq_ref, padk_ref, d_ref,
                 cw_ref, cb_ref, eg_ref, eb_ref,
                 means_ref, nhiv_ref, gscale_ref, gw1t_ref, gb1_ref,
                 gw2t_ref, gb2_ref,
                 ln1g_ref, ln1b_ref, wqkv_ref, bqkv_ref, wo_ref, ob_ref,
                 ln2g_ref, ln2b_ref, f1w_ref, f1b_ref, f2w_ref, f2b_ref,
                 fg_ref, fb_ref,
                 out_ref,
                 bias_scr):
    # One batch element per grid step; everything stays resident on-chip.
    N = coords_ref.shape[1]
    D = cw_ref.shape[1]
    H = num_heads
    hd = D // H

    # --- embedding: coords_linear -> emb_layer_norm -> zero padded rows -------
    coords = coords_ref[0]                                             # [N, 3]
    x = jnp.dot(coords, cw_ref[...],
                preferred_element_type=jnp.float32) + cb_ref[...]      # [N, D]
    x = _layer_norm(x, eg_ref[...], eb_ref[...])
    x = x * (1.0 - padq_ref[0])                                        # [N, D]

    # --- GaussianLayer + gbf_proj, feature-major (lane-dense [*, N*N]) --------
    # psi = exp((d - mean)^2 * (-0.5/std^2)) / (sqrt(2*pi)*std); the per-feature
    # constants are pre-folded in the wrapper (no divides in-kernel).
    d = d_ref[0]                                                       # [1, P]
    u = d - means_ref[...]                                             # [K, P]
    psi = jnp.exp(u * u * nhiv_ref[...]) * gscale_ref[...]             # [K, P]
    hfeat = _gelu(jnp.dot(gw1t_ref[...], psi,
                          preferred_element_type=jnp.float32) + gb1_ref[...])
    bias_hp = jnp.dot(gw2t_ref[...], hfeat,
                      preferred_element_type=jnp.float32) + gb2_ref[...]  # [H, P]

    # un-flatten the pair axis [H, N*N] -> [H, N, N] through VMEM scratch
    for i in range(N):
        bias_scr[:, i, :] = bias_hp[:, i * N:(i + 1) * N]
    key_pad = padk_ref[0] > 0.5                                        # [1, N]
    # masked_fill over padded keys (matches torch -inf fill; propagates through
    # the logits that become the next layer's bias, exactly like unicore).
    attn_bias = [jnp.where(key_pad, NEG_INF, bias_scr[h]) for h in range(H)]

    # --- pre-LN transformer encoder layers ------------------------------------
    for li in range(num_layers):
        ln_in = _layer_norm(x, ln1g_ref[li], ln1b_ref[li])             # [N, D]
        # single lane-dense QKV projection (q-scaling folded into the weights)
        qkv = jnp.dot(ln_in, wqkv_ref[li],
                      preferred_element_type=jnp.float32) + bqkv_ref[li]  # [N,3D]
        new_bias = []
        o_heads = []
        for h in range(H):
            qh = qkv[:, h * hd:(h + 1) * hd]                           # [N, hd]
            kh = qkv[:, D + h * hd:D + (h + 1) * hd]
            vh = qkv[:, 2 * D + h * hd:2 * D + (h + 1) * hd]
            logits = jax.lax.dot_general(
                qh, kh, (((1,), (1,)), ((), ())),
                preferred_element_type=jnp.float32) + attn_bias[h]     # [N, N]
            new_bias.append(logits)     # pre-softmax logits = next layer's bias
            m = jnp.max(logits, axis=-1, keepdims=True)
            p = jnp.exp(logits - m)
            denom = jnp.sum(p, axis=-1, keepdims=True)
            p = p * pl.reciprocal(denom, approx=True)
            o_heads.append(jnp.dot(p, vh,
                                   preferred_element_type=jnp.float32))  # [N,hd]
        attn_bias = new_bias
        o_cat = jnp.concatenate(o_heads, axis=-1)                      # [N, D]
        x = x + jnp.dot(o_cat, wo_ref[li],
                        preferred_element_type=jnp.float32) + ob_ref[li]

        h2 = _layer_norm(x, ln2g_ref[li], ln2b_ref[li])
        f = _gelu(jnp.dot(h2, f1w_ref[li],
                          preferred_element_type=jnp.float32) + f1b_ref[li])
        x = x + jnp.dot(f, f2w_ref[li],
                        preferred_element_type=jnp.float32) + f2b_ref[li]

    # --- final layer norm (post_ln=False) --------------------------------------
    out_ref[0] = _layer_norm(x, fg_ref[...], fb_ref[...])


# --------------------------------- wrapper ------------------------------------

def pocket_transformer_forward(params, src_tokens, src_distance, src_edge_type,
                               src_coords):
    B, N = src_tokens.shape
    D = params["coords_w"].shape[1]
    K = params["gbf_means"].shape[1]
    H = params["gbf_proj_w2"].shape[1]
    L = len(params["layers"])
    assert D % H == 0
    hd = D // H
    P = N * N

    padding_mask = (src_tokens == PAD_IDX)                             # [B, N]
    pad_f = padding_mask.astype(jnp.float32)
    pad_q = pad_f[:, :, None]                                          # [B,N,1]
    pad_k = pad_f[:, None, :]                                          # [B,1,N]

    # GaussianLayer per-edge affine (embedding gathers -> fused XLA glue);
    # a single lane-dense [B,1,N*N] input for the kernel.
    mul_e = jnp.take(params["gbf_mul"][:, 0], src_edge_type)           # [B,N,N]
    bias_e = jnp.take(params["gbf_bias"][:, 0], src_edge_type)         # [B,N,N]
    d_row = (mul_e * src_distance.astype(jnp.float32) + bias_e).reshape(B, 1, P)

    # transposed ("feature-major") GBF / gbf_proj parameters, Gaussian constants
    # pre-folded: psi = exp((d - mean)^2 * nhiv) * gscale
    std = jnp.abs(params["gbf_stds"]).reshape(K, 1) + 1e-5             # [K, 1]
    means_c = params["gbf_means"].reshape(K, 1)
    nhiv_c = -0.5 / (std * std)
    gscale_c = (1.0 / math.sqrt(2.0 * math.pi)) / std
    gw1t = params["gbf_proj_w1"].T                                     # [K, K]
    gb1_c = params["gbf_proj_b1"].reshape(K, 1)
    gw2t = params["gbf_proj_w2"].T                                     # [H, K]
    gb2_c = params["gbf_proj_b2"].reshape(H, 1)

    # fused QKV weights, 1/sqrt(hd) folded into the Q columns
    scaling = hd ** -0.5

    def fold_q(a):  # scale the first D output columns (the Q part)
        return jnp.concatenate([a[..., :D] * scaling, a[..., D:]], axis=-1)

    stack = lambda name: jnp.stack([lp[name] for lp in params["layers"]])
    wqkv = fold_q(stack("qkv_w"))                                      # [L,D,3D]
    bqkv = fold_q(stack("qkv_b"))                                      # [L,1,3D]

    weights = [
        params["coords_w"], params["coords_b"],
        params["emb_ln_g"], params["emb_ln_b"],
        means_c, nhiv_c, gscale_c, gw1t, gb1_c, gw2t, gb2_c,
        stack("ln1_g"), stack("ln1_b"), wqkv, bqkv,
        stack("out_w"), stack("out_b"),
        stack("ln2_g"), stack("ln2_b"),
        stack("fc1_w"), stack("fc1_b"), stack("fc2_w"), stack("fc2_b"),
        params["final_ln_g"], params["final_ln_b"],
    ]

    def rep_spec(a):
        r = a.ndim
        return pl.BlockSpec(a.shape, lambda b, _r=r: (0,) * _r)

    encoder_rep = pl.pallas_call(
        functools.partial(fused_kernel, H, L),
        out_shape=jax.ShapeDtypeStruct((B, N, D), jnp.float32),
        grid=(B,),
        in_specs=[
            pl.BlockSpec((1, N, 3), lambda b: (b, 0, 0)),   # coords
            pl.BlockSpec((1, N, 1), lambda b: (b, 0, 0)),   # pad (query rows)
            pl.BlockSpec((1, 1, N), lambda b: (b, 0, 0)),   # pad (key cols)
            pl.BlockSpec((1, 1, P), lambda b: (b, 0, 0)),   # mul*dist + bias
        ] + [rep_spec(a) for a in weights],
        out_specs=pl.BlockSpec((1, N, D), lambda b: (b, 0, 0)),
        scratch_shapes=[pltpu.VMEM((H, N, N), jnp.float32)],
        compiler_params=pltpu.CompilerParams(
            dimension_semantics=("parallel",)),
    )(src_coords.astype(jnp.float32), pad_q, pad_k, d_row, *weights)

    # TODO(synk): encoder_pair_rep / delta_encoder_pair_rep post-processing
    # (== -inf -> 0 fill, final_head_layer_norm) is skipped: those tensors are
    # not part of the module's return value.
    return encoder_rep, padding_mask


# ------------------------------ parameter init --------------------------------

def init_params(key, *, embed_dim=32, ffn_dim=64, heads=4, layers=2, K=128):
    # torch nn.Linear weights are [out, in]; stored pre-transposed as [in, out]
    # so kernels compute x @ W. Deterministic synthetic init (std=0.02, zero
    # biases), GaussianLayer tables as in its constructor.
    n_edge_type = NUM_TOKENS * NUM_TOKENS
    keys = iter(jax.random.split(key, 8 + 4 * layers))

    def nrm(shape, std=0.02):
        return jax.random.normal(next(keys), shape, jnp.float32) * std

    params = dict(
        coords_w=nrm((3, embed_dim)),
        coords_b=jnp.zeros((1, embed_dim), jnp.float32),
        emb_ln_g=jnp.ones((1, embed_dim), jnp.float32),
        emb_ln_b=jnp.zeros((1, embed_dim), jnp.float32),
        final_ln_g=jnp.ones((1, embed_dim), jnp.float32),
        final_ln_b=jnp.zeros((1, embed_dim), jnp.float32),
        gbf_means=jax.random.uniform(next(keys), (1, K), jnp.float32, 0.0, 3.0),
        gbf_stds=jax.random.uniform(next(keys), (1, K), jnp.float32, 0.0, 3.0),
        gbf_mul=jnp.ones((n_edge_type, 1), jnp.float32),
        gbf_bias=jnp.zeros((n_edge_type, 1), jnp.float32),
        gbf_proj_w1=nrm((K, K)),
        gbf_proj_b1=jnp.zeros((1, K), jnp.float32),
        gbf_proj_w2=nrm((K, heads)),
        gbf_proj_b2=jnp.zeros((1, heads), jnp.float32),
    )
    layer_params = []
    for _ in range(layers):
        layer_params.append(dict(
            ln1_g=jnp.ones((1, embed_dim), jnp.float32),
            ln1_b=jnp.zeros((1, embed_dim), jnp.float32),
            qkv_w=nrm((embed_dim, 3 * embed_dim)),
            qkv_b=jnp.zeros((1, 3 * embed_dim), jnp.float32),
            out_w=nrm((embed_dim, embed_dim)),
            out_b=jnp.zeros((1, embed_dim), jnp.float32),
            ln2_g=jnp.ones((1, embed_dim), jnp.float32),
            ln2_b=jnp.zeros((1, embed_dim), jnp.float32),
            fc1_w=nrm((embed_dim, ffn_dim)),
            fc1_b=jnp.zeros((1, ffn_dim), jnp.float32),
            fc2_w=nrm((ffn_dim, embed_dim)),
            fc2_b=jnp.zeros((1, embed_dim), jnp.float32),
        ))
    params["layers"] = layer_params
    return params


# ----------------------------------- main --------------------------------------

if __name__ == "__main__":
    B, N = 2, 16
    D, FFN, HEADS, LAYERS, K = 32, 64, 4, 2, 128

    key = jax.random.PRNGKey(0)
    kp, kt, kc = jax.random.split(key, 3)
    params = init_params(kp, embed_dim=D, ffn_dim=FFN, heads=HEADS,
                         layers=LAYERS, K=K)

    # tokens in 1..20, last two positions padded (PAD=0)
    tokens = jax.random.randint(kt, (B, N), 1, NUM_TOKENS, dtype=jnp.int32)
    tokens = tokens.at[:, N - 2:].set(PAD_IDX)
    coords = jax.random.normal(kc, (B, N, 3), jnp.float32)
    dist = jnp.sqrt(
        jnp.sum((coords[:, :, None, :] - coords[:, None, :, :]) ** 2, axis=-1))
    edge_type = tokens[:, :, None] * NUM_TOKENS + tokens[:, None, :]

    fwd = jax.jit(pocket_transformer_forward)
    encoder_rep, padding_mask = fwd(params, tokens, dist, edge_type, coords)
    jax.block_until_ready((encoder_rep, padding_mask))

    assert encoder_rep.shape == (B, N, D)
    assert padding_mask.shape == (B, N) and padding_mask.dtype == jnp.bool_
    assert bool(jnp.all(jnp.isfinite(encoder_rep)))
    print("KERNEL_OK")
</pallas_src>

<mosaic_0001>
module attributes {stable_mosaic.version = 11 : i64} {
  func.func @fused_kernel(%arg0: i32, %arg1: memref<1x16x3xf32, #tpu.memory_space<vmem>>, %arg2: memref<1x16x1xf32, #tpu.memory_space<vmem>>, %arg3: memref<1x1x16xf32, #tpu.memory_space<vmem>>, %arg4: memref<1x1x256xf32, #tpu.memory_space<vmem>>, %arg5: memref<3x32xf32, #tpu.memory_space<vmem>>, %arg6: memref<1x32xf32, #tpu.memory_space<vmem>>, %arg7: memref<1x32xf32, #tpu.memory_space<vmem>>, %arg8: memref<1x32xf32, #tpu.memory_space<vmem>>, %arg9: memref<128x1xf32, #tpu.memory_space<vmem>>, %arg10: memref<128x1xf32, #tpu.memory_space<vmem>>, %arg11: memref<128x1xf32, #tpu.memory_space<vmem>>, %arg12: memref<128x128xf32, #tpu.memory_space<vmem>>, %arg13: memref<128x1xf32, #tpu.memory_space<vmem>>, %arg14: memref<4x128xf32, #tpu.memory_space<vmem>>, %arg15: memref<4x1xf32, #tpu.memory_space<vmem>>, %arg16: memref<2x1x32xf32, #tpu.memory_space<vmem>>, %arg17: memref<2x1x32xf32, #tpu.memory_space<vmem>>, %arg18: memref<2x32x96xf32, #tpu.memory_space<vmem>>, %arg19: memref<2x1x96xf32, #tpu.memory_space<vmem>>, %arg20: memref<2x32x32xf32, #tpu.memory_space<vmem>>, %arg21: memref<2x1x32xf32, #tpu.memory_space<vmem>>, %arg22: memref<2x1x32xf32, #tpu.memory_space<vmem>>, %arg23: memref<2x1x32xf32, #tpu.memory_space<vmem>>, %arg24: memref<2x32x64xf32, #tpu.memory_space<vmem>>, %arg25: memref<2x1x64xf32, #tpu.memory_space<vmem>>, %arg26: memref<2x64x32xf32, #tpu.memory_space<vmem>>, %arg27: memref<2x1x32xf32, #tpu.memory_space<vmem>>, %arg28: memref<1x32xf32, #tpu.memory_space<vmem>>, %arg29: memref<1x32xf32, #tpu.memory_space<vmem>>, %arg30: memref<1x16x32xf32, #tpu.memory_space<vmem>>, %arg31: memref<4x16x16xf32, #tpu.memory_space<vmem>>) attributes {dimension_semantics = [#tpu.dimension_semantics<parallel>], iteration_bounds = array<i64: 2>, scalar_prefetch = 0 : i64, scratch_operands = 1 : i64, tpu.core_type = #tpu.core_type<tc>, window_params = [{transform_indices = @transform_0, window_bounds = array<i64: 1, 16, 3>}, {transform_indices = @transform_1, window_bounds = array<i64: 1, 16, 1>}, {transform_indices = @transform_2, window_bounds = array<i64: 1, 1, 16>}, {transform_indices = @transform_3, window_bounds = array<i64: 1, 1, 256>}, {pipeline_mode = #tpu.pipeline_mode<synchronous>, transform_indices = @transform_4, window_bounds = array<i64: 3, 32>}, {pipeline_mode = #tpu.pipeline_mode<synchronous>, transform_indices = @transform_5, window_bounds = array<i64: 1, 32>}, {pipeline_mode = #tpu.pipeline_mode<synchronous>, transform_indices = @transform_6, window_bounds = array<i64: 1, 32>}, {pipeline_mode = #tpu.pipeline_mode<synchronous>, transform_indices = @transform_7, window_bounds = array<i64: 1, 32>}, {pipeline_mode = #tpu.pipeline_mode<synchronous>, transform_indices = @transform_8, window_bounds = array<i64: 128, 1>}, {pipeline_mode = #tpu.pipeline_mode<synchronous>, transform_indices = @transform_9, window_bounds = array<i64: 128, 1>}, {pipeline_mode = #tpu.pipeline_mode<synchronous>, transform_indices = @transform_10, window_bounds = array<i64: 128, 1>}, {pipeline_mode = #tpu.pipeline_mode<synchronous>, transform_indices = @transform_11, window_bounds = array<i64: 128, 128>}, {pipeline_mode = #tpu.pipeline_mode<synchronous>, transform_indices = @transform_12, window_bounds = array<i64: 128, 1>}, {pipeline_mode = #tpu.pipeline_mode<synchronous>, transform_indices = @transform_13, window_bounds = array<i64: 4, 128>}, {pipeline_mode = #tpu.pipeline_mode<synchronous>, transform_indices = @transform_14, window_bounds = array<i64: 4, 1>}, {pipeline_mode = #tpu.pipeline_mode<synchronous>, transform_indices = @transform_15, window_bounds = array<i64: 2, 1, 32>}, {pipeline_mode = #tpu.pipeline_mode<synchronous>, transform_indices = @transform_16, window_bounds = array<i64: 2, 1, 32>}, {pipeline_mode = #tpu.pipeline_mode<synchronous>, transform_indices = @transform_17, window_bounds = array<i64: 2, 32, 96>}, {pipeline_mode = #tpu.pipeline_mode<synchronous>, transform_indices = @transform_18, window_bounds = array<i64: 2, 1, 96>}, {pipeline_mode = #tpu.pipeline_mode<synchronous>, transform_indices = @transform_19, window_bounds = array<i64: 2, 32, 32>}, {pipeline_mode = #tpu.pipeline_mode<synchronous>, transform_indices = @transform_20, window_bounds = array<i64: 2, 1, 32>}, {pipeline_mode = #tpu.pipeline_mode<synchronous>, transform_indices = @transform_21, window_bounds = array<i64: 2, 1, 32>}, {pipeline_mode = #tpu.pipeline_mode<synchronous>, transform_indices = @transform_22, window_bounds = array<i64: 2, 1, 32>}, {pipeline_mode = #tpu.pipeline_mode<synchronous>, transform_indices = @transform_23, window_bounds = array<i64: 2, 32, 64>}, {pipeline_mode = #tpu.pipeline_mode<synchronous>, transform_indices = @transform_24, window_bounds = array<i64: 2, 1, 64>}, {pipeline_mode = #tpu.pipeline_mode<synchronous>, transform_indices = @transform_25, window_bounds = array<i64: 2, 64, 32>}, {pipeline_mode = #tpu.pipeline_mode<synchronous>, transform_indices = @transform_26, window_bounds = array<i64: 2, 1, 32>}, {pipeline_mode = #tpu.pipeline_mode<synchronous>, transform_indices = @transform_27, window_bounds = array<i64: 1, 32>}, {pipeline_mode = #tpu.pipeline_mode<synchronous>, transform_indices = @transform_28, window_bounds = array<i64: 1, 32>}, {transform_indices = @transform_29, window_bounds = array<i64: 1, 16, 32>}]} {
    %c0 = arith.constant 0 : index
    %c0_0 = arith.constant 0 : index
    %c0_1 = arith.constant 0 : index
    %0 = vector.load %arg1[%c0, %c0_0, %c0_1] : memref<1x16x3xf32, #tpu.memory_space<vmem>>, vector<1x16x3xf32>
    %1 = vector.shape_cast %0 : vector<1x16x3xf32> to vector<16x3xf32>
    %c0_2 = arith.constant 0 : index
    %c0_3 = arith.constant 0 : index
    %2 = vector.load %arg5[%c0_2, %c0_3] : memref<3x32xf32, #tpu.memory_space<vmem>>, vector<3x32xf32>
    %cst = arith.constant dense<0.000000e+00> : vector<16x32xf32>
    %3 = tpu.matmul %1, %2, %cst {dimension_numbers = #tpu.dot_dimension_numbers<[1], [0], [0], [1], [0, 0, 1, 1], [], []>} : vector<16x3xf32>, vector<3x32xf32>, vector<16x32xf32> -> vector<16x32xf32>
    %c0_4 = arith.constant 0 : index
    %c0_5 = arith.constant 0 : index
    %4 = vector.load %arg6[%c0_4, %c0_5] : memref<1x32xf32, #tpu.memory_space<vmem>>, vector<1x32xf32>
    %5 = vector.broadcast %4 : vector<1x32xf32> to vector<16x32xf32>
    %6 = arith.addf %3, %5 : vector<16x32xf32>
    %c0_6 = arith.constant 0 : index
    %c0_7 = arith.constant 0 : index
    %7 = vector.load %arg7[%c0_6, %c0_7] : memref<1x32xf32, #tpu.memory_space<vmem>>, vector<1x32xf32>
    %c0_8 = arith.constant 0 : index
    %c0_9 = arith.constant 0 : index
    %8 = vector.load %arg8[%c0_8, %c0_9] : memref<1x32xf32, #tpu.memory_space<vmem>>, vector<1x32xf32>
    %cst_10 = arith.constant dense<0.000000e+00> : vector<16xf32>
    %9 = vector.multi_reduction <add>, %6, %cst_10 [1] : vector<16x32xf32> to vector<16xf32>
    %10 = vector.shape_cast %9 : vector<16xf32> to vector<16x1xf32>
    %cst_11 = arith.constant 3.200000e+01 : f32
    %11 = vector.broadcast %cst_11 : f32 to vector<16x1xf32>
    %12 = arith.divf %10, %11 : vector<16x1xf32>
    %13 = vector.broadcast %12 : vector<16x1xf32> to vector<16x32xf32>
    %14 = arith.subf %6, %13 : vector<16x32xf32>
    %15 = arith.mulf %14, %14 : vector<16x32xf32>
    %cst_12 = arith.constant dense<0.000000e+00> : vector<16xf32>
    %16 = vector.multi_reduction <add>, %15, %cst_12 [1] : vector<16x32xf32> to vector<16xf32>
    %17 = vector.shape_cast %16 : vector<16xf32> to vector<16x1xf32>
    %cst_13 = arith.constant 3.200000e+01 : f32
    %18 = vector.broadcast %cst_13 : f32 to vector<16x1xf32>
    %19 = arith.divf %17, %18 : vector<16x1xf32>
    %20 = vector.broadcast %12 : vector<16x1xf32> to vector<16x32xf32>
    %21 = arith.subf %6, %20 : vector<16x32xf32>
    %cst_14 = arith.constant 9.99999974E-6 : f32
    %22 = vector.broadcast %cst_14 : f32 to vector<16x1xf32>
    %23 = arith.addf %19, %22 : vector<16x1xf32>
    %24 = math.rsqrt %23 : vector<16x1xf32>
    %25 = vector.broadcast %24 : vector<16x1xf32> to vector<16x32xf32>
    %26 = arith.mulf %21, %25 : vector<16x32xf32>
    %27 = vector.broadcast %7 : vector<1x32xf32> to vector<16x32xf32>
    %28 = arith.mulf %26, %27 : vector<16x32xf32>
    %29 = vector.broadcast %8 : vector<1x32xf32> to vector<16x32xf32>
    %30 = arith.addf %28, %29 : vector<16x32xf32>
    %c0_15 = arith.constant 0 : index
    %c0_16 = arith.constant 0 : index
    %c0_17 = arith.constant 0 : index
    %31 = vector.load %arg2[%c0_15, %c0_16, %c0_17] : memref<1x16x1xf32, #tpu.memory_space<vmem>>, vector<1x16x1xf32>
    %32 = vector.shape_cast %31 : vector<1x16x1xf32> to vector<16x1xf32>
    %cst_18 = arith.constant 1.000000e+00 : f32
    %33 = vector.broadcast %cst_18 : f32 to vector<16x1xf32>
    %34 = arith.subf %33, %32 : vector<16x1xf32>
    %35 = vector.broadcast %34 : vector<16x1xf32> to vector<16x32xf32>
    %36 = arith.mulf %30, %35 : vector<16x32xf32>
    %c0_19 = arith.constant 0 : index
    %c0_20 = arith.constant 0 : index
    %c0_21 = arith.constant 0 : index
    %37 = vector.load %arg4[%c0_19, %c0_20, %c0_21] : memref<1x1x256xf32, #tpu.memory_space<vmem>>, vector<1x1x256xf32>
    %38 = vector.shape_cast %37 : vector<1x1x256xf32> to vector<1x256xf32>
    %c0_22 = arith.constant 0 : index
    %c0_23 = arith.constant 0 : index
    %39 = vector.load %arg9[%c0_22, %c0_23] : memref<128x1xf32, #tpu.memory_space<vmem>>, vector<128x1xf32>
    %40 = vector.broadcast %38 : vector<1x256xf32> to vector<128x256xf32>
    %41 = vector.broadcast %39 : vector<128x1xf32> to vector<128x256xf32>
    %42 = arith.subf %40, %41 : vector<128x256xf32>
    %43 = arith.mulf %42, %42 : vector<128x256xf32>
    %c0_24 = arith.constant 0 : index
    %c0_25 = arith.constant 0 : index
    %44 = vector.load %arg10[%c0_24, %c0_25] : memref<128x1xf32, #tpu.memory_space<vmem>>, vector<128x1xf32>
    %45 = vector.broadcast %44 : vector<128x1xf32> to vector<128x256xf32>
    %46 = arith.mulf %43, %45 : vector<128x256xf32>
    %47 = math.exp %46 : vector<128x256xf32>
    %c0_26 = arith.constant 0 : index
    %c0_27 = arith.constant 0 : index
    %48 = vector.load %arg11[%c0_26, %c0_27] : memref<128x1xf32, #tpu.memory_space<vmem>>, vector<128x1xf32>
    %49 = vector.broadcast %48 : vector<128x1xf32> to vector<128x256xf32>
    %50 = arith.mulf %47, %49 : vector<128x256xf32>
    %c0_28 = arith.constant 0 : index
    %c0_29 = arith.constant 0 : index
    %51 = vector.load %arg12[%c0_28, %c0_29] : memref<128x128xf32, #tpu.memory_space<vmem>>, vector<128x128xf32>
    %cst_30 = arith.constant dense<0.000000e+00> : vector<128x256xf32>
    %52 = tpu.matmul %51, %50, %cst_30 {dimension_numbers = #tpu.dot_dimension_numbers<[1], [0], [0], [1], [0, 0, 1, 1], [], []>} : vector<128x128xf32>, vector<128x256xf32>, vector<128x256xf32> -> vector<128x256xf32>
    %c0_31 = arith.constant 0 : index
    %c0_32 = arith.constant 0 : index
    %53 = vector.load %arg13[%c0_31, %c0_32] : memref<128x1xf32, #tpu.memory_space<vmem>>, vector<128x1xf32>
    %54 = vector.broadcast %53 : vector<128x1xf32> to vector<128x256xf32>
    %55 = arith.addf %52, %54 : vector<128x256xf32>
    %cst_33 = arith.constant 5.000000e-01 : f32
    %56 = vector.broadcast %cst_33 : f32 to vector<128x256xf32>
    %57 = arith.mulf %56, %55 : vector<128x256xf32>
    %cst_34 = arith.constant 0.707106769 : f32
    %58 = vector.broadcast %cst_34 : f32 to vector<128x256xf32>
    %59 = arith.mulf %55, %58 : vector<128x256xf32>
    %60 = math.erf %59 : vector<128x256xf32>
    %cst_35 = arith.constant 1.000000e+00 : f32
    %61 = vector.broadcast %cst_35 : f32 to vector<128x256xf32>
    %62 = arith.addf %61, %60 : vector<128x256xf32>
    %63 = arith.mulf %57, %62 : vector<128x256xf32>
    %c0_36 = arith.constant 0 : index
    %c0_37 = arith.constant 0 : index
    %64 = vector.load %arg14[%c0_36, %c0_37] : memref<4x128xf32, #tpu.memory_space<vmem>>, vector<4x128xf32>
    %cst_38 = arith.constant dense<0.000000e+00> : vector<4x256xf32>
    %65 = tpu.matmul %64, %63, %cst_38 {dimension_numbers = #tpu.dot_dimension_numbers<[1], [0], [0], [1], [0, 0, 1, 1], [], []>} : vector<4x128xf32>, vector<128x256xf32>, vector<4x256xf32> -> vector<4x256xf32>
    %c0_39 = arith.constant 0 : index
    %c0_40 = arith.constant 0 : index
    %66 = vector.load %arg15[%c0_39, %c0_40] : memref<4x1xf32, #tpu.memory_space<vmem>>, vector<4x1xf32>
    %67 = vector.broadcast %66 : vector<4x1xf32> to vector<4x256xf32>
    %68 = arith.addf %65, %67 : vector<4x256xf32>
    %69 = vector.extract_strided_slice %68 {offsets = [0, 0], sizes = [4, 16], strides = [1, 1]} : vector<4x256xf32> to vector<4x16xf32>
    %c0_41 = arith.constant 0 : index
    %c0_42 = arith.constant 0 : index
    %c0_43 = arith.constant 0 : index
    %70 = vector.load %arg31[%c0_41, %c0_42, %c0_43] : memref<4x16x16xf32, #tpu.memory_space<vmem>>, vector<4x1x16xf32>
    %71 = vector.shape_cast %70 : vector<4x1x16xf32> to vector<4x16xf32>
    %72 = vector.shape_cast %69 : vector<4x16xf32> to vector<4x1x16xf32>
    tpu.vector_store %arg31[%c0_41, %c0_42, %c0_43], %72 {strides = array<i32>} : memref<4x16x16xf32, #tpu.memory_space<vmem>>, vector<4x1x16xf32>,
    %73 = vector.extract_strided_slice %68 {offsets = [0, 16], sizes = [4, 16], strides = [1, 1]} : vector<4x256xf32> to vector<4x16xf32>
    %c0_44 = arith.constant 0 : index
    %c1 = arith.constant 1 : index
    %c0_45 = arith.constant 0 : index
    %74 = vector.load %arg31[%c0_44, %c1, %c0_45] : memref<4x16x16xf32, #tpu.memory_space<vmem>>, vector<4x1x16xf32>
    %75 = vector.shape_cast %74 : vector<4x1x16xf32> to vector<4x16xf32>
    %76 = vector.shape_cast %73 : vector<4x16xf32> to vector<4x1x16xf32>
    tpu.vector_store %arg31[%c0_44, %c1, %c0_45], %76 {strides = array<i32>} : memref<4x16x16xf32, #tpu.memory_space<vmem>>, vector<4x1x16xf32>,
    %77 = vector.extract_strided_slice %68 {offsets = [0, 32], sizes = [4, 16], strides = [1, 1]} : vector<4x256xf32> to vector<4x16xf32>
    %c0_46 = arith.constant 0 : index
    %c2 = arith.constant 2 : index
    %c0_47 = arith.constant 0 : index
    %78 = vector.load %arg31[%c0_46, %c2, %c0_47] : memref<4x16x16xf32, #tpu.memory_space<vmem>>, vector<4x1x16xf32>
    %79 = vector.shape_cast %78 : vector<4x1x16xf32> to vector<4x16xf32>
    %80 = vector.shape_cast %77 : vector<4x16xf32> to vector<4x1x16xf32>
    tpu.vector_store %arg31[%c0_46, %c2, %c0_47], %80 {strides = array<i32>} : memref<4x16x16xf32, #tpu.memory_space<vmem>>, vector<4x1x16xf32>,
    %81 = vector.extract_strided_slice %68 {offsets = [0, 48], sizes = [4, 16], strides = [1, 1]} : vector<4x256xf32> to vector<4x16xf32>
    %c0_48 = arith.constant 0 : index
    %c3 = arith.constant 3 : index
    %c0_49 = arith.constant 0 : index
    %82 = vector.load %arg31[%c0_48, %c3, %c0_49] : memref<4x16x16xf32, #tpu.memory_space<vmem>>, vector<4x1x16xf32>
    %83 = vector.shape_cast %82 : vector<4x1x16xf32> to vector<4x16xf32>
    %84 = vector.shape_cast %81 : vector<4x16xf32> to vector<4x1x16xf32>
    tpu.vector_store %arg31[%c0_48, %c3, %c0_49], %84 {strides = array<i32>} : memref<4x16x16xf32, #tpu.memory_space<vmem>>, vector<4x1x16xf32>,
    %85 = vector.extract_strided_slice %68 {offsets = [0, 64], sizes = [4, 16], strides = [1, 1]} : vector<4x256xf32> to vector<4x16xf32>
    %c0_50 = arith.constant 0 : index
    %c4 = arith.constant 4 : index
    %c0_51 = arith.constant 0 : index
    %86 = vector.load %arg31[%c0_50, %c4, %c0_51] : memref<4x16x16xf32, #tpu.memory_space<vmem>>, vector<4x1x16xf32>
    %87 = vector.shape_cast %86 : vector<4x1x16xf32> to vector<4x16xf32>
    %88 = vector.shape_cast %85 : vector<4x16xf32> to vector<4x1x16xf32>
    tpu.vector_store %arg31[%c0_50, %c4, %c0_51], %88 {strides = array<i32>} : memref<4x16x16xf32, #tpu.memory_space<vmem>>, vector<4x1x16xf32>,
    %89 = vector.extract_strided_slice %68 {offsets = [0, 80], sizes = [4, 16], strides = [1, 1]} : vector<4x256xf32> to vector<4x16xf32>
    %c0_52 = arith.constant 0 : index
    %c5 = arith.constant 5 : index
    %c0_53 = arith.constant 0 : index
    %90 = vector.load %arg31[%c0_52, %c5, %c0_53] : memref<4x16x16xf32, #tpu.memory_space<vmem>>, vector<4x1x16xf32>
    %91 = vector.shape_cast %90 : vector<4x1x16xf32> to vector<4x16xf32>
    %92 = vector.shape_cast %89 : vector<4x16xf32> to vector<4x1x16xf32>
    tpu.vector_store %arg31[%c0_52, %c5, %c0_53], %92 {strides = array<i32>} : memref<4x16x16xf32, #tpu.memory_space<vmem>>, vector<4x1x16xf32>,
    %93 = vector.extract_strided_slice %68 {offsets = [0, 96], sizes = [4, 16], strides = [1, 1]} : vector<4x256xf32> to vector<4x16xf32>
    %c0_54 = arith.constant 0 : index
    %c6 = arith.constant 6 : index
    %c0_55 = arith.constant 0 : index
    %94 = vector.load %arg31[%c0_54, %c6, %c0_55] : memref<4x16x16xf32, #tpu.memory_space<vmem>>, vector<4x1x16xf32>
    %95 = vector.shape_cast %94 : vector<4x1x16xf32> to vector<4x16xf32>
    %96 = vector.shape_cast %93 : vector<4x16xf32> to vector<4x1x16xf32>
    tpu.vector_store %arg31[%c0_54, %c6, %c0_55], %96 {strides = array<i32>} : memref<4x16x16xf32, #tpu.memory_space<vmem>>, vector<4x1x16xf32>,
    %97 = vector.extract_strided_slice %68 {offsets = [0, 112], sizes = [4, 16], strides = [1, 1]} : vector<4x256xf32> to vector<4x16xf32>
    %c0_56 = arith.constant 0 : index
    %c7 = arith.constant 7 : index
    %c0_57 = arith.constant 0 : index
    %98 = vector.load %arg31[%c0_56, %c7, %c0_57] : memref<4x16x16xf32, #tpu.memory_space<vmem>>, vector<4x1x16xf32>
    %99 = vector.shape_cast %98 : vector<4x1x16xf32> to vector<4x16xf32>
    %100 = vector.shape_cast %97 : vector<4x16xf32> to vector<4x1x16xf32>
    tpu.vector_store %arg31[%c0_56, %c7, %c0_57], %100 {strides = array<i32>} : memref<4x16x16xf32, #tpu.memory_space<vmem>>, vector<4x1x16xf32>,
    %101 = vector.extract_strided_slice %68 {offsets = [0, 128], sizes = [4, 16], strides = [1, 1]} : vector<4x256xf32> to vector<4x16xf32>
    %c0_58 = arith.constant 0 : index
    %c8 = arith.constant 8 : index
    %c0_59 = arith.constant 0 : index
    %102 = vector.load %arg31[%c0_58, %c8, %c0_59] : memref<4x16x16xf32, #tpu.memory_space<vmem>>, vector<4x1x16xf32>
    %103 = vector.shape_cast %102 : vector<4x1x16xf32> to vector<4x16xf32>
    %104 = vector.shape_cast %101 : vector<4x16xf32> to vector<4x1x16xf32>
    tpu.vector_store %arg31[%c0_58, %c8, %c0_59], %104 {strides = array<i32>} : memref<4x16x16xf32, #tpu.memory_space<vmem>>, vector<4x1x16xf32>,
    %105 = vector.extract_strided_slice %68 {offsets = [0, 144], sizes = [4, 16], strides = [1, 1]} : vector<4x256xf32> to vector<4x16xf32>
    %c0_60 = arith.constant 0 : index
    %c9 = arith.constant 9 : index
    %c0_61 = arith.constant 0 : index
    %106 = vector.load %arg31[%c0_60, %c9, %c0_61] : memref<4x16x16xf32, #tpu.memory_space<vmem>>, vector<4x1x16xf32>
    %107 = vector.shape_cast %106 : vector<4x1x16xf32> to vector<4x16xf32>
    %108 = vector.shape_cast %105 : vector<4x16xf32> to vector<4x1x16xf32>
    tpu.vector_store %arg31[%c0_60, %c9, %c0_61], %108 {strides = array<i32>} : memref<4x16x16xf32, #tpu.memory_space<vmem>>, vector<4x1x16xf32>,
    %109 = vector.extract_strided_slice %68 {offsets = [0, 160], sizes = [4, 16], strides = [1, 1]} : vector<4x256xf32> to vector<4x16xf32>
    %c0_62 = arith.constant 0 : index
    %c10 = arith.constant 10 : index
    %c0_63 = arith.constant 0 : index
    %110 = vector.load %arg31[%c0_62, %c10, %c0_63] : memref<4x16x16xf32, #tpu.memory_space<vmem>>, vector<4x1x16xf32>
    %111 = vector.shape_cast %110 : vector<4x1x16xf32> to vector<4x16xf32>
    %112 = vector.shape_cast %109 : vector<4x16xf32> to vector<4x1x16xf32>
    tpu.vector_store %arg31[%c0_62, %c10, %c0_63], %112 {strides = array<i32>} : memref<4x16x16xf32, #tpu.memory_space<vmem>>, vector<4x1x16xf32>,
    %113 = vector.extract_strided_slice %68 {offsets = [0, 176], sizes = [4, 16], strides = [1, 1]} : vector<4x256xf32> to vector<4x16xf32>
    %c0_64 = arith.constant 0 : index
    %c11 = arith.constant 11 : index
    %c0_65 = arith.constant 0 : index
    %114 = vector.load %arg31[%c0_64, %c11, %c0_65] : memref<4x16x16xf32, #tpu.memory_space<vmem>>, vector<4x1x16xf32>
    %115 = vector.shape_cast %114 : vector<4x1x16xf32> to vector<4x16xf32>
    %116 = vector.shape_cast %113 : vector<4x16xf32> to vector<4x1x16xf32>
    tpu.vector_store %arg31[%c0_64, %c11, %c0_65], %116 {strides = array<i32>} : memref<4x16x16xf32, #tpu.memory_space<vmem>>, vector<4x1x16xf32>,
    %117 = vector.extract_strided_slice %68 {offsets = [0, 192], sizes = [4, 16], strides = [1, 1]} : vector<4x256xf32> to vector<4x16xf32>
    %c0_66 = arith.constant 0 : index
    %c12 = arith.constant 12 : index
    %c0_67 = arith.constant 0 : index
    %118 = vector.load %arg31[%c0_66, %c12, %c0_67] : memref<4x16x16xf32, #tpu.memory_space<vmem>>, vector<4x1x16xf32>
    %119 = vector.shape_cast %118 : vector<4x1x16xf32> to vector<4x16xf32>
    %120 = vector.shape_cast %117 : vector<4x16xf32> to vector<4x1x16xf32>
    tpu.vector_store %arg31[%c0_66, %c12, %c0_67], %120 {strides = array<i32>} : memref<4x16x16xf32, #tpu.memory_space<vmem>>, vector<4x1x16xf32>,
    %121 = vector.extract_strided_slice %68 {offsets = [0, 208], sizes = [4, 16], strides = [1, 1]} : vector<4x256xf32> to vector<4x16xf32>
    %c0_68 = arith.constant 0 : index
    %c13 = arith.constant 13 : index
    %c0_69 = arith.constant 0 : index
    %122 = vector.load %arg31[%c0_68, %c13, %c0_69] : memref<4x16x16xf32, #tpu.memory_space<vmem>>, vector<4x1x16xf32>
    %123 = vector.shape_cast %122 : vector<4x1x16xf32> to vector<4x16xf32>
    %124 = vector.shape_cast %121 : vector<4x16xf32> to vector<4x1x16xf32>
    tpu.vector_store %arg31[%c0_68, %c13, %c0_69], %124 {strides = array<i32>} : memref<4x16x16xf32, #tpu.memory_space<vmem>>, vector<4x1x16xf32>,
    %125 = vector.extract_strided_slice %68 {offsets = [0, 224], sizes = [4, 16], strides = [1, 1]} : vector<4x256xf32> to vector<4x16xf32>
    %c0_70 = arith.constant 0 : index
    %c14 = arith.constant 14 : index
    %c0_71 = arith.constant 0 : index
    %126 = vector.load %arg31[%c0_70, %c14, %c0_71] : memref<4x16x16xf32, #tpu.memory_space<vmem>>, vector<4x1x16xf32>
    %127 = vector.shape_cast %126 : vector<4x1x16xf32> to vector<4x16xf32>
    %128 = vector.shape_cast %125 : vector<4x16xf32> to vector<4x1x16xf32>
    tpu.vector_store %arg31[%c0_70, %c14, %c0_71], %128 {strides = array<i32>} : memref<4x16x16xf32, #tpu.memory_space<vmem>>, vector<4x1x16xf32>,
    %129 = vector.extract_strided_slice %68 {offsets = [0, 240], sizes = [4, 16], strides = [1, 1]} : vector<4x256xf32> to vector<4x16xf32>
    %c0_72 = arith.constant 0 : index
    %c15 = arith.constant 15 : index
    %c0_73 = arith.constant 0 : index
    %130 = vector.load %arg31[%c0_72, %c15, %c0_73] : memref<4x16x16xf32, #tpu.memory_space<vmem>>, vector<4x1x16xf32>
    %131 = vector.shape_cast %130 : vector<4x1x16xf32> to vector<4x16xf32>
    %132 = vector.shape_cast %129 : vector<4x16xf32> to vector<4x1x16xf32>
    tpu.vector_store %arg31[%c0_72, %c15, %c0_73], %132 {strides = array<i32>} : memref<4x16x16xf32, #tpu.memory_space<vmem>>, vector<4x1x16xf32>,
    %c0_74 = arith.constant 0 : index
    %c0_75 = arith.constant 0 : index
    %c0_76 = arith.constant 0 : index
    %133 = vector.load %arg3[%c0_74, %c0_75, %c0_76] : memref<1x1x16xf32, #tpu.memory_space<vmem>>, vector<1x1x16xf32>
    %134 = vector.shape_cast %133 : vector<1x1x16xf32> to vector<1x16xf32>
    %cst_77 = arith.constant 5.000000e-01 : f32
    %135 = vector.broadcast %cst_77 : f32 to vector<1x16xf32>
    %136 = arith.cmpf ogt, %134, %135 : vector<1x16xf32>
    %c0_78 = arith.constant 0 : index
    %c0_79 = arith.constant 0 : index
    %c0_80 = arith.constant 0 : index
    %137 = vector.load %arg31[%c0_78, %c0_79, %c0_80] : memref<4x16x16xf32, #tpu.memory_space<vmem>>, vector<1x16x16xf32>
    %138 = vector.shape_cast %137 : vector<1x16x16xf32> to vector<16x16xf32>
    %cst_81 = arith.constant 0xFF800000 : f32
    %139 = vector.shape_cast %136 : vector<1x16xi1> to vector<1x16xi1>
    %140 = vector.broadcast %139 : vector<1x16xi1> to vector<16x16xi1>
    %141 = vector.broadcast %cst_81 : f32 to vector<16x16xf32>
    %142 = arith.select %140, %141, %138 : vector<16x16xi1>, vector<16x16xf32>
    %c1_82 = arith.constant 1 : index
    %c0_83 = arith.constant 0 : index
    %c0_84 = arith.constant 0 : index
    %143 = vector.load %arg31[%c1_82, %c0_83, %c0_84] : memref<4x16x16xf32, #tpu.memory_space<vmem>>, vector<1x16x16xf32>
    %144 = vector.shape_cast %143 : vector<1x16x16xf32> to vector<16x16xf32>
    %cst_85 = arith.constant 0xFF800000 : f32
    %145 = vector.shape_cast %136 : vector<1x16xi1> to vector<1x16xi1>
    %146 = vector.broadcast %145 : vector<1x16xi1> to vector<16x16xi1>
    %147 = vector.broadcast %cst_85 : f32 to vector<16x16xf32>
    %148 = arith.select %146, %147, %144 : vector<16x16xi1>, vector<16x16xf32>
    %c2_86 = arith.constant 2 : index
    %c0_87 = arith.constant 0 : index
    %c0_88 = arith.constant 0 : index
    %149 = vector.load %arg31[%c2_86, %c0_87, %c0_88] : memref<4x16x16xf32, #tpu.memory_space<vmem>>, vector<1x16x16xf32>
    %150 = vector.shape_cast %149 : vector<1x16x16xf32> to vector<16x16xf32>
    %cst_89 = arith.constant 0xFF800000 : f32
    %151 = vector.shape_cast %136 : vector<1x16xi1> to vector<1x16xi1>
    %152 = vector.broadcast %151 : vector<1x16xi1> to vector<16x16xi1>
    %153 = vector.broadcast %cst_89 : f32 to vector<16x16xf32>
    %154 = arith.select %152, %153, %150 : vector<16x16xi1>, vector<16x16xf32>
    %c3_90 = arith.constant 3 : index
    %c0_91 = arith.constant 0 : index
    %c0_92 = arith.constant 0 : index
    %155 = vector.load %arg31[%c3_90, %c0_91, %c0_92] : memref<4x16x16xf32, #tpu.memory_space<vmem>>, vector<1x16x16xf32>
    %156 = vector.shape_cast %155 : vector<1x16x16xf32> to vector<16x16xf32>
    %cst_93 = arith.constant 0xFF800000 : f32
    %157 = vector.shape_cast %136 : vector<1x16xi1> to vector<1x16xi1>
    %158 = vector.broadcast %157 : vector<1x16xi1> to vector<16x16xi1>
    %159 = vector.broadcast %cst_93 : f32 to vector<16x16xf32>
    %160 = arith.select %158, %159, %156 : vector<16x16xi1>, vector<16x16xf32>
    %c0_94 = arith.constant 0 : index
    %c0_95 = arith.constant 0 : index
    %c0_96 = arith.constant 0 : index
    %161 = vector.load %arg16[%c0_94, %c0_95, %c0_96] : memref<2x1x32xf32, #tpu.memory_space<vmem>>, vector<1x1x32xf32>
    %162 = vector.shape_cast %161 : vector<1x1x32xf32> to vector<1x32xf32>
    %c0_97 = arith.constant 0 : index
    %c0_98 = arith.constant 0 : index
    %c0_99 = arith.constant 0 : index
    %163 = vector.load %arg17[%c0_97, %c0_98, %c0_99] : memref<2x1x32xf32, #tpu.memory_space<vmem>>, vector<1x1x32xf32>
    %164 = vector.shape_cast %163 : vector<1x1x32xf32> to vector<1x32xf32>
    %cst_100 = arith.constant dense<0.000000e+00> : vector<16xf32>
    %165 = vector.multi_reduction <add>, %36, %cst_100 [1] : vector<16x32xf32> to vector<16xf32>
    %166 = vector.shape_cast %165 : vector<16xf32> to vector<16x1xf32>
    %cst_101 = arith.constant 3.200000e+01 : f32
    %167 = vector.broadcast %cst_101 : f32 to vector<16x1xf32>
    %168 = arith.divf %166, %167 : vector<16x1xf32>
    %169 = vector.broadcast %168 : vector<16x1xf32> to vector<16x32xf32>
    %170 = arith.subf %36, %169 : vector<16x32xf32>
    %171 = arith.mulf %170, %170 : vector<16x32xf32>
    %cst_102 = arith.constant dense<0.000000e+00> : vector<16xf32>
    %172 = vector.multi_reduction <add>, %171, %cst_102 [1] : vector<16x32xf32> to vector<16xf32>
    %173 = vector.shape_cast %172 : vector<16xf32> to vector<16x1xf32>
    %cst_103 = arith.constant 3.200000e+01 : f32
    %174 = vector.broadcast %cst_103 : f32 to vector<16x1xf32>
    %175 = arith.divf %173, %174 : vector<16x1xf32>
    %176 = vector.broadcast %168 : vector<16x1xf32> to vector<16x32xf32>
    %177 = arith.subf %36, %176 : vector<16x32xf32>
    %cst_104 = arith.constant 9.99999974E-6 : f32
    %178 = vector.broadcast %cst_104 : f32 to vector<16x1xf32>
    %179 = arith.addf %175, %178 : vector<16x1xf32>
    %180 = math.rsqrt %179 : vector<16x1xf32>
    %181 = vector.broadcast %180 : vector<16x1xf32> to vector<16x32xf32>
    %182 = arith.mulf %177, %181 : vector<16x32xf32>
    %183 = vector.broadcast %162 : vector<1x32xf32> to vector<16x32xf32>
    %184 = arith.mulf %182, %183 : vector<16x32xf32>
    %185 = vector.broadcast %164 : vector<1x32xf32> to vector<16x32xf32>
    %186 = arith.addf %184, %185 : vector<16x32xf32>
    %c0_105 = arith.constant 0 : index
    %c0_106 = arith.constant 0 : index
    %c0_107 = arith.constant 0 : index
    %187 = vector.load %arg18[%c0_105, %c0_106, %c0_107] : memref<2x32x96xf32, #tpu.memory_space<vmem>>, vector<1x32x96xf32>
    %188 = vector.shape_cast %187 : vector<1x32x96xf32> to vector<32x96xf32>
    %cst_108 = arith.constant dense<0.000000e+00> : vector<16x96xf32>
    %189 = tpu.matmul %186, %188, %cst_108 {dimension_numbers = #tpu.dot_dimension_numbers<[1], [0], [0], [1], [0, 0, 1, 1], [], []>} : vector<16x32xf32>, vector<32x96xf32>, vector<16x96xf32> -> vector<16x96xf32>
    %c0_109 = arith.constant 0 : index
    %c0_110 = arith.constant 0 : index
    %c0_111 = arith.constant 0 : index
    %190 = vector.load %arg19[%c0_109, %c0_110, %c0_111] : memref<2x1x96xf32, #tpu.memory_space<vmem>>, vector<1x1x96xf32>
    %191 = vector.shape_cast %190 : vector<1x1x96xf32> to vector<1x96xf32>
    %192 = vector.broadcast %191 : vector<1x96xf32> to vector<16x96xf32>
    %193 = arith.addf %189, %192 : vector<16x96xf32>
    %194 = vector.extract_strided_slice %193 {offsets = [0, 0], sizes = [16, 8], strides = [1, 1]} : vector<16x96xf32> to vector<16x8xf32>
    %195 = vector.extract_strided_slice %193 {offsets = [0, 32], sizes = [16, 8], strides = [1, 1]} : vector<16x96xf32> to vector<16x8xf32>
    %196 = vector.extract_strided_slice %193 {offsets = [0, 64], sizes = [16, 8], strides = [1, 1]} : vector<16x96xf32> to vector<16x8xf32>
    %cst_112 = arith.constant dense<0.000000e+00> : vector<16x16xf32>
    %197 = tpu.matmul %194, %195, %cst_112 {dimension_numbers = #tpu.dot_dimension_numbers<[1], [1], [0], [0], [0, 0, 1, 0], [], []>} : vector<16x8xf32>, vector<16x8xf32>, vector<16x16xf32> -> vector<16x16xf32>
    %198 = arith.addf %197, %142 : vector<16x16xf32>
    %cst_113 = arith.constant dense<0xFF800000> : vector<16xf32>
    %199 = vector.multi_reduction <maximumf>, %198, %cst_113 [1] : vector<16x16xf32> to vector<16xf32>
    %200 = vector.shape_cast %199 : vector<16xf32> to vector<16x1xf32>
    %201 = vector.broadcast %200 : vector<16x1xf32> to vector<16x16xf32>
    %202 = arith.subf %198, %201 : vector<16x16xf32>
    %203 = math.exp %202 : vector<16x16xf32>
    %cst_114 = arith.constant dense<0.000000e+00> : vector<16xf32>
    %204 = vector.multi_reduction <add>, %203, %cst_114 [1] : vector<16x16xf32> to vector<16xf32>
    %205 = vector.shape_cast %204 : vector<16xf32> to vector<16x1xf32>
    %206 = tpu.reciprocal %205 {approx = true} : vector<16x1xf32> -> vector<16x1xf32>
    %207 = vector.broadcast %206 : vector<16x1xf32> to vector<16x16xf32>
    %208 = arith.mulf %203, %207 : vector<16x16xf32>
    %cst_115 = arith.constant dense<0.000000e+00> : vector<16x8xf32>
    %209 = tpu.matmul %208, %196, %cst_115 {dimension_numbers = #tpu.dot_dimension_numbers<[1], [0], [0], [1], [0, 0, 1, 1], [], []>} : vector<16x16xf32>, vector<16x8xf32>, vector<16x8xf32> -> vector<16x8xf32>
    %210 = vector.extract_strided_slice %193 {offsets = [0, 8], sizes = [16, 8], strides = [1, 1]} : vector<16x96xf32> to vector<16x8xf32>
    %211 = vector.extract_strided_slice %193 {offsets = [0, 40], sizes = [16, 8], strides = [1, 1]} : vector<16x96xf32> to vector<16x8xf32>
    %212 = vector.extract_strided_slice %193 {offsets = [0, 72], sizes = [16, 8], strides = [1, 1]} : vector<16x96xf32> to vector<16x8xf32>
    %cst_116 = arith.constant dense<0.000000e+00> : vector<16x16xf32>
    %213 = tpu.matmul %210, %211, %cst_116 {dimension_numbers = #tpu.dot_dimension_numbers<[1], [1], [0], [0], [0, 0, 1, 0], [], []>} : vector<16x8xf32>, vector<16x8xf32>, vector<16x16xf32> -> vector<16x16xf32>
    %214 = arith.addf %213, %148 : vector<16x16xf32>
    %cst_117 = arith.constant dense<0xFF800000> : vector<16xf32>
    %215 = vector.multi_reduction <maximumf>, %214, %cst_117 [1] : vector<16x16xf32> to vector<16xf32>
    %216 = vector.shape_cast %215 : vector<16xf32> to vector<16x1xf32>
    %217 = vector.broadcast %216 : vector<16x1xf32> to vector<16x16xf32>
    %218 = arith.subf %214, %217 : vector<16x16xf32>
    %219 = math.exp %218 : vector<16x16xf32>
    %cst_118 = arith.constant dense<0.000000e+00> : vector<16xf32>
    %220 = vector.multi_reduction <add>, %219, %cst_118 [1] : vector<16x16xf32> to vector<16xf32>
    %221 = vector.shape_cast %220 : vector<16xf32> to vector<16x1xf32>
    %222 = tpu.reciprocal %221 {approx = true} : vector<16x1xf32> -> vector<16x1xf32>
    %223 = vector.broadcast %222 : vector<16x1xf32> to vector<16x16xf32>
    %224 = arith.mulf %219, %223 : vector<16x16xf32>
    %cst_119 = arith.constant dense<0.000000e+00> : vector<16x8xf32>
    %225 = tpu.matmul %224, %212, %cst_119 {dimension_numbers = #tpu.dot_dimension_numbers<[1], [0], [0], [1], [0, 0, 1, 1], [], []>} : vector<16x16xf32>, vector<16x8xf32>, vector<16x8xf32> -> vector<16x8xf32>
    %226 = vector.extract_strided_slice %193 {offsets = [0, 16], sizes = [16, 8], strides = [1, 1]} : vector<16x96xf32> to vector<16x8xf32>
    %227 = vector.extract_strided_slice %193 {offsets = [0, 48], sizes = [16, 8], strides = [1, 1]} : vector<16x96xf32> to vector<16x8xf32>
    %228 = vector.extract_strided_slice %193 {offsets = [0, 80], sizes = [16, 8], strides = [1, 1]} : vector<16x96xf32> to vector<16x8xf32>
    %cst_120 = arith.constant dense<0.000000e+00> : vector<16x16xf32>
    %229 = tpu.matmul %226, %227, %cst_120 {dimension_numbers = #tpu.dot_dimension_numbers<[1], [1], [0], [0], [0, 0, 1, 0], [], []>} : vector<16x8xf32>, vector<16x8xf32>, vector<16x16xf32> -> vector<16x16xf32>
    %230 = arith.addf %229, %154 : vector<16x16xf32>
    %cst_121 = arith.constant dense<0xFF800000> : vector<16xf32>
    %231 = vector.multi_reduction <maximumf>, %230, %cst_121 [1] : vector<16x16xf32> to vector<16xf32>
    %232 = vector.shape_cast %231 : vector<16xf32> to vector<16x1xf32>
    %233 = vector.broadcast %232 : vector<16x1xf32> to vector<16x16xf32>
    %234 = arith.subf %230, %233 : vector<16x16xf32>
    %235 = math.exp %234 : vector<16x16xf32>
    %cst_122 = arith.constant dense<0.000000e+00> : vector<16xf32>
    %236 = vector.multi_reduction <add>, %235, %cst_122 [1] : vector<16x16xf32> to vector<16xf32>
    %237 = vector.shape_cast %236 : vector<16xf32> to vector<16x1xf32>
    %238 = tpu.reciprocal %237 {approx = true} : vector<16x1xf32> -> vector<16x1xf32>
    %239 = vector.broadcast %238 : vector<16x1xf32> to vector<16x16xf32>
    %240 = arith.mulf %235, %239 : vector<16x16xf32>
    %cst_123 = arith.constant dense<0.000000e+00> : vector<16x8xf32>
    %241 = tpu.matmul %240, %228, %cst_123 {dimension_numbers = #tpu.dot_dimension_numbers<[1], [0], [0], [1], [0, 0, 1, 1], [], []>} : vector<16x16xf32>, vector<16x8xf32>, vector<16x8xf32> -> vector<16x8xf32>
    %242 = vector.extract_strided_slice %193 {offsets = [0, 24], sizes = [16, 8], strides = [1, 1]} : vector<16x96xf32> to vector<16x8xf32>
    %243 = vector.extract_strided_slice %193 {offsets = [0, 56], sizes = [16, 8], strides = [1, 1]} : vector<16x96xf32> to vector<16x8xf32>
    %244 = vector.extract_strided_slice %193 {offsets = [0, 88], sizes = [16, 8], strides = [1, 1]} : vector<16x96xf32> to vector<16x8xf32>
    %cst_124 = arith.constant dense<0.000000e+00> : vector<16x16xf32>
    %245 = tpu.matmul %242, %243, %cst_124 {dimension_numbers = #tpu.dot_dimension_numbers<[1], [1], [0], [0], [0, 0, 1, 0], [], []>} : vector<16x8xf32>, vector<16x8xf32>, vector<16x16xf32> -> vector<16x16xf32>
    %246 = arith.addf %245, %160 : vector<16x16xf32>
    %cst_125 = arith.constant dense<0xFF800000> : vector<16xf32>
    %247 = vector.multi_reduction <maximumf>, %246, %cst_125 [1] : vector<16x16xf32> to vector<16xf32>
    %248 = vector.shape_cast %247 : vector<16xf32> to vector<16x1xf32>
    %249 = vector.broadcast %248 : vector<16x1xf32> to vector<16x16xf32>
    %250 = arith.subf %246, %249 : vector<16x16xf32>
    %251 = math.exp %250 : vector<16x16xf32>
    %cst_126 = arith.constant dense<0.000000e+00> : vector<16xf32>
    %252 = vector.multi_reduction <add>, %251, %cst_126 [1] : vector<16x16xf32> to vector<16xf32>
    %253 = vector.shape_cast %252 : vector<16xf32> to vector<16x1xf32>
    %254 = tpu.reciprocal %253 {approx = true} : vector<16x1xf32> -> vector<16x1xf32>
    %255 = vector.broadcast %254 : vector<16x1xf32> to vector<16x16xf32>
    %256 = arith.mulf %251, %255 : vector<16x16xf32>
    %cst_127 = arith.constant dense<0.000000e+00> : vector<16x8xf32>
    %257 = tpu.matmul %256, %244, %cst_127 {dimension_numbers = #tpu.dot_dimension_numbers<[1], [0], [0], [1], [0, 0, 1, 1], [], []>} : vector<16x16xf32>, vector<16x8xf32>, vector<16x8xf32> -> vector<16x8xf32>
    %258 = tpu.concatenate %209, %225, %241, %257 in 1 : vector<16x8xf32>, vector<16x8xf32>, vector<16x8xf32>, vector<16x8xf32> -> vector<16x32xf32>
    %c0_128 = arith.constant 0 : index
    %c0_129 = arith.constant 0 : index
    %c0_130 = arith.constant 0 : index
    %259 = vector.load %arg20[%c0_128, %c0_129, %c0_130] : memref<2x32x32xf32, #tpu.memory_space<vmem>>, vector<1x32x32xf32>
    %260 = vector.shape_cast %259 : vector<1x32x32xf32> to vector<32x32xf32>
    %cst_131 = arith.constant dense<0.000000e+00> : vector<16x32xf32>
    %261 = tpu.matmul %258, %260, %cst_131 {dimension_numbers = #tpu.dot_dimension_numbers<[1], [0], [0], [1], [0, 0, 1, 1], [], []>} : vector<16x32xf32>, vector<32x32xf32>, vector<16x32xf32> -> vector<16x32xf32>
    %262 = arith.addf %36, %261 : vector<16x32xf32>
    %c0_132 = arith.constant 0 : index
    %c0_133 = arith.constant 0 : index
    %c0_134 = arith.constant 0 : index
    %263 = vector.load %arg21[%c0_132, %c0_133, %c0_134] : memref<2x1x32xf32, #tpu.memory_space<vmem>>, vector<1x1x32xf32>
    %264 = vector.shape_cast %263 : vector<1x1x32xf32> to vector<1x32xf32>
    %265 = vector.broadcast %264 : vector<1x32xf32> to vector<16x32xf32>
    %266 = arith.addf %262, %265 : vector<16x32xf32>
    %c0_135 = arith.constant 0 : index
    %c0_136 = arith.constant 0 : index
    %c0_137 = arith.constant 0 : index
    %267 = vector.load %arg22[%c0_135, %c0_136, %c0_137] : memref<2x1x32xf32, #tpu.memory_space<vmem>>, vector<1x1x32xf32>
    %268 = vector.shape_cast %267 : vector<1x1x32xf32> to vector<1x32xf32>
    %c0_138 = arith.constant 0 : index
    %c0_139 = arith.constant 0 : index
    %c0_140 = arith.constant 0 : index
    %269 = vector.load %arg23[%c0_138, %c0_139, %c0_140] : memref<2x1x32xf32, #tpu.memory_space<vmem>>, vector<1x1x32xf32>
    %270 = vector.shape_cast %269 : vector<1x1x32xf32> to vector<1x32xf32>
    %cst_141 = arith.constant dense<0.000000e+00> : vector<16xf32>
    %271 = vector.multi_reduction <add>, %266, %cst_141 [1] : vector<16x32xf32> to vector<16xf32>
    %272 = vector.shape_cast %271 : vector<16xf32> to vector<16x1xf32>
    %cst_142 = arith.constant 3.200000e+01 : f32
    %273 = vector.broadcast %cst_142 : f32 to vector<16x1xf32>
    %274 = arith.divf %272, %273 : vector<16x1xf32>
    %275 = vector.broadcast %274 : vector<16x1xf32> to vector<16x32xf32>
    %276 = arith.subf %266, %275 : vector<16x32xf32>
    %277 = arith.mulf %276, %276 : vector<16x32xf32>
    %cst_143 = arith.constant dense<0.000000e+00> : vector<16xf32>
    %278 = vector.multi_reduction <add>, %277, %cst_143 [1] : vector<16x32xf32> to vector<16xf32>
    %279 = vector.shape_cast %278 : vector<16xf32> to vector<16x1xf32>
    %cst_144 = arith.constant 3.200000e+01 : f32
    %280 = vector.broadcast %cst_144 : f32 to vector<16x1xf32>
    %281 = arith.divf %279, %280 : vector<16x1xf32>
    %282 = vector.broadcast %274 : vector<16x1xf32> to vector<16x32xf32>
    %283 = arith.subf %266, %282 : vector<16x32xf32>
    %cst_145 = arith.constant 9.99999974E-6 : f32
    %284 = vector.broadcast %cst_145 : f32 to vector<16x1xf32>
    %285 = arith.addf %281, %284 : vector<16x1xf32>
    %286 = math.rsqrt %285 : vector<16x1xf32>
    %287 = vector.broadcast %286 : vector<16x1xf32> to vector<16x32xf32>
    %288 = arith.mulf %283, %287 : vector<16x32xf32>
    %289 = vector.broadcast %268 : vector<1x32xf32> to vector<16x32xf32>
    %290 = arith.mulf %288, %289 : vector<16x32xf32>
    %291 = vector.broadcast %270 : vector<1x32xf32> to vector<16x32xf32>
    %292 = arith.addf %290, %291 : vector<16x32xf32>
    %c0_146 = arith.constant 0 : index
    %c0_147 = arith.constant 0 : index
    %c0_148 = arith.constant 0 : index
    %293 = vector.load %arg24[%c0_146, %c0_147, %c0_148] : memref<2x32x64xf32, #tpu.memory_space<vmem>>, vector<1x32x64xf32>
    %294 = vector.shape_cast %293 : vector<1x32x64xf32> to vector<32x64xf32>
    %cst_149 = arith.constant dense<0.000000e+00> : vector<16x64xf32>
    %295 = tpu.matmul %292, %294, %cst_149 {dimension_numbers = #tpu.dot_dimension_numbers<[1], [0], [0], [1], [0, 0, 1, 1], [], []>} : vector<16x32xf32>, vector<32x64xf32>, vector<16x64xf32> -> vector<16x64xf32>
    %c0_150 = arith.constant 0 : index
    %c0_151 = arith.constant 0 : index
    %c0_152 = arith.constant 0 : index
    %296 = vector.load %arg25[%c0_150, %c0_151, %c0_152] : memref<2x1x64xf32, #tpu.memory_space<vmem>>, vector<1x1x64xf32>
    %297 = vector.shape_cast %296 : vector<1x1x64xf32> to vector<1x64xf32>
    %298 = vector.broadcast %297 : vector<1x64xf32> to vector<16x64xf32>
    %299 = arith.addf %295, %298 : vector<16x64xf32>
    %cst_153 = arith.constant 5.000000e-01 : f32
    %300 = vector.broadcast %cst_153 : f32 to vector<16x64xf32>
    %301 = arith.mulf %300, %299 : vector<16x64xf32>
    %cst_154 = arith.constant 0.707106769 : f32
    %302 = vector.broadcast %cst_154 : f32 to vector<16x64xf32>
    %303 = arith.mulf %299, %302 : vector<16x64xf32>
    %304 = math.erf %303 : vector<16x64xf32>
    %cst_155 = arith.constant 1.000000e+00 : f32
    %305 = vector.broadcast %cst_155 : f32 to vector<16x64xf32>
    %306 = arith.addf %305, %304 : vector<16x64xf32>
    %307 = arith.mulf %301, %306 : vector<16x64xf32>
    %c0_156 = arith.constant 0 : index
    %c0_157 = arith.constant 0 : index
    %c0_158 = arith.constant 0 : index
    %308 = vector.load %arg26[%c0_156, %c0_157, %c0_158] : memref<2x64x32xf32, #tpu.memory_space<vmem>>, vector<1x64x32xf32>
    %309 = vector.shape_cast %308 : vector<1x64x32xf32> to vector<64x32xf32>
    %cst_159 = arith.constant dense<0.000000e+00> : vector<16x32xf32>
    %310 = tpu.matmul %307, %309, %cst_159 {dimension_numbers = #tpu.dot_dimension_numbers<[1], [0], [0], [1], [0, 0, 1, 1], [], []>} : vector<16x64xf32>, vector<64x32xf32>, vector<16x32xf32> -> vector<16x32xf32>
    %311 = arith.addf %266, %310 : vector<16x32xf32>
    %c0_160 = arith.constant 0 : index
    %c0_161 = arith.constant 0 : index
    %c0_162 = arith.constant 0 : index
    %312 = vector.load %arg27[%c0_160, %c0_161, %c0_162] : memref<2x1x32xf32, #tpu.memory_space<vmem>>, vector<1x1x32xf32>
    %313 = vector.shape_cast %312 : vector<1x1x32xf32> to vector<1x32xf32>
    %314 = vector.broadcast %313 : vector<1x32xf32> to vector<16x32xf32>
    %315 = arith.addf %311, %314 : vector<16x32xf32>
    %c1_163 = arith.constant 1 : index
    %c0_164 = arith.constant 0 : index
    %c0_165 = arith.constant 0 : index
    %316 = vector.load %arg16[%c1_163, %c0_164, %c0_165] : memref<2x1x32xf32, #tpu.memory_space<vmem>>, vector<1x1x32xf32>
    %317 = vector.shape_cast %316 : vector<1x1x32xf32> to vector<1x32xf32>
    %c1_166 = arith.constant 1 : index
    %c0_167 = arith.constant 0 : index
    %c0_168 = arith.constant 0 : index
    %318 = vector.load %arg17[%c1_166, %c0_167, %c0_168] : memref<2x1x32xf32, #tpu.memory_space<vmem>>, vector<1x1x32xf32>
    %319 = vector.shape_cast %318 : vector<1x1x32xf32> to vector<1x32xf32>
    %cst_169 = arith.constant dense<0.000000e+00> : vector<16xf32>
    %320 = vector.multi_reduction <add>, %315, %cst_169 [1] : vector<16x32xf32> to vector<16xf32>
    %321 = vector.shape_cast %320 : vector<16xf32> to vector<16x1xf32>
    %cst_170 = arith.constant 3.200000e+01 : f32
    %322 = vector.broadcast %cst_170 : f32 to vector<16x1xf32>
    %323 = arith.divf %321, %322 : vector<16x1xf32>
    %324 = vector.broadcast %323 : vector<16x1xf32> to vector<16x32xf32>
    %325 = arith.subf %315, %324 : vector<16x32xf32>
    %326 = arith.mulf %325, %325 : vector<16x32xf32>
    %cst_171 = arith.constant dense<0.000000e+00> : vector<16xf32>
    %327 = vector.multi_reduction <add>, %326, %cst_171 [1] : vector<16x32xf32> to vector<16xf32>
    %328 = vector.shape_cast %327 : vector<16xf32> to vector<16x1xf32>
    %cst_172 = arith.constant 3.200000e+01 : f32
    %329 = vector.broadcast %cst_172 : f32 to vector<16x1xf32>
    %330 = arith.divf %328, %329 : vector<16x1xf32>
    %331 = vector.broadcast %323 : vector<16x1xf32> to vector<16x32xf32>
    %332 = arith.subf %315, %331 : vector<16x32xf32>
    %cst_173 = arith.constant 9.99999974E-6 : f32
    %333 = vector.broadcast %cst_173 : f32 to vector<16x1xf32>
    %334 = arith.addf %330, %333 : vector<16x1xf32>
    %335 = math.rsqrt %334 : vector<16x1xf32>
    %336 = vector.broadcast %335 : vector<16x1xf32> to vector<16x32xf32>
    %337 = arith.mulf %332, %336 : vector<16x32xf32>
    %338 = vector.broadcast %317 : vector<1x32xf32> to vector<16x32xf32>
    %339 = arith.mulf %337, %338 : vector<16x32xf32>
    %340 = vector.broadcast %319 : vector<1x32xf32> to vector<16x32xf32>
    %341 = arith.addf %339, %340 : vector<16x32xf32>
    %c1_174 = arith.constant 1 : index
    %c0_175 = arith.constant 0 : index
    %c0_176 = arith.constant 0 : index
    %342 = vector.load %arg18[%c1_174, %c0_175, %c0_176] : memref<2x32x96xf32, #tpu.memory_space<vmem>>, vector<1x32x96xf32>
    %343 = vector.shape_cast %342 : vector<1x32x96xf32> to vector<32x96xf32>
    %cst_177 = arith.constant dense<0.000000e+00> : vector<16x96xf32>
    %344 = tpu.matmul %341, %343, %cst_177 {dimension_numbers = #tpu.dot_dimension_numbers<[1], [0], [0], [1], [0, 0, 1, 1], [], []>} : vector<16x32xf32>, vector<32x96xf32>, vector<16x96xf32> -> vector<16x96xf32>
    %c1_178 = arith.constant 1 : index
    %c0_179 = arith.constant 0 : index
    %c0_180 = arith.constant 0 : index
    %345 = vector.load %arg19[%c1_178, %c0_179, %c0_180] : memref<2x1x96xf32, #tpu.memory_space<vmem>>, vector<1x1x96xf32>
    %346 = vector.shape_cast %345 : vector<1x1x96xf32> to vector<1x96xf32>
    %347 = vector.broadcast %346 : vector<1x96xf32> to vector<16x96xf32>
    %348 = arith.addf %344, %347 : vector<16x96xf32>
    %349 = vector.extract_strided_slice %348 {offsets = [0, 0], sizes = [16, 8], strides = [1, 1]} : vector<16x96xf32> to vector<16x8xf32>
    %350 = vector.extract_strided_slice %348 {offsets = [0, 32], sizes = [16, 8], strides = [1, 1]} : vector<16x96xf32> to vector<16x8xf32>
    %351 = vector.extract_strided_slice %348 {offsets = [0, 64], sizes = [16, 8], strides = [1, 1]} : vector<16x96xf32> to vector<16x8xf32>
    %cst_181 = arith.constant dense<0.000000e+00> : vector<16x16xf32>
    %352 = tpu.matmul %349, %350, %cst_181 {dimension_numbers = #tpu.dot_dimension_numbers<[1], [1], [0], [0], [0, 0, 1, 0], [], []>} : vector<16x8xf32>, vector<16x8xf32>, vector<16x16xf32> -> vector<16x16xf32>
    %353 = arith.addf %352, %198 : vector<16x16xf32>
    %cst_182 = arith.constant dense<0xFF800000> : vector<16xf32>
    %354 = vector.multi_reduction <maximumf>, %353, %cst_182 [1] : vector<16x16xf32> to vector<16xf32>
    %355 = vector.shape_cast %354 : vector<16xf32> to vector<16x1xf32>
    %356 = vector.broadcast %355 : vector<16x1xf32> to vector<16x16xf32>
    %357 = arith.subf %353, %356 : vector<16x16xf32>
    %358 = math.exp %357 : vector<16x16xf32>
    %cst_183 = arith.constant dense<0.000000e+00> : vector<16xf32>
    %359 = vector.multi_reduction <add>, %358, %cst_183 [1] : vector<16x16xf32> to vector<16xf32>
    %360 = vector.shape_cast %359 : vector<16xf32> to vector<16x1xf32>
    %361 = tpu.reciprocal %360 {approx = true} : vector<16x1xf32> -> vector<16x1xf32>
    %362 = vector.broadcast %361 : vector<16x1xf32> to vector<16x16xf32>
    %363 = arith.mulf %358, %362 : vector<16x16xf32>
    %cst_184 = arith.constant dense<0.000000e+00> : vector<16x8xf32>
    %364 = tpu.matmul %363, %351, %cst_184 {dimension_numbers = #tpu.dot_dimension_numbers<[1], [0], [0], [1], [0, 0, 1, 1], [], []>} : vector<16x16xf32>, vector<16x8xf32>, vector<16x8xf32> -> vector<16x8xf32>
    %365 = vector.extract_strided_slice %348 {offsets = [0, 8], sizes = [16, 8], strides = [1, 1]} : vector<16x96xf32> to vector<16x8xf32>
    %366 = vector.extract_strided_slice %348 {offsets = [0, 40], sizes = [16, 8], strides = [1, 1]} : vector<16x96xf32> to vector<16x8xf32>
    %367 = vector.extract_strided_slice %348 {offsets = [0, 72], sizes = [16, 8], strides = [1, 1]} : vector<16x96xf32> to vector<16x8xf32>
    %cst_185 = arith.constant dense<0.000000e+00> : vector<16x16xf32>
    %368 = tpu.matmul %365, %366, %cst_185 {dimension_numbers = #tpu.dot_dimension_numbers<[1], [1], [0], [0], [0, 0, 1, 0], [], []>} : vector<16x8xf32>, vector<16x8xf32>, vector<16x16xf32> -> vector<16x16xf32>
    %369 = arith.addf %368, %214 : vector<16x16xf32>
    %cst_186 = arith.constant dense<0xFF800000> : vector<16xf32>
    %370 = vector.multi_reduction <maximumf>, %369, %cst_186 [1] : vector<16x16xf32> to vector<16xf32>
    %371 = vector.shape_cast %370 : vector<16xf32> to vector<16x1xf32>
    %372 = vector.broadcast %371 : vector<16x1xf32> to vector<16x16xf32>
    %373 = arith.subf %369, %372 : vector<16x16xf32>
    %374 = math.exp %373 : vector<16x16xf32>
    %cst_187 = arith.constant dense<0.000000e+00> : vector<16xf32>
    %375 = vector.multi_reduction <add>, %374, %cst_187 [1] : vector<16x16xf32> to vector<16xf32>
    %376 = vector.shape_cast %375 : vector<16xf32> to vector<16x1xf32>
    %377 = tpu.reciprocal %376 {approx = true} : vector<16x1xf32> -> vector<16x1xf32>
    %378 = vector.broadcast %377 : vector<16x1xf32> to vector<16x16xf32>
    %379 = arith.mulf %374, %378 : vector<16x16xf32>
    %cst_188 = arith.constant dense<0.000000e+00> : vector<16x8xf32>
    %380 = tpu.matmul %379, %367, %cst_188 {dimension_numbers = #tpu.dot_dimension_numbers<[1], [0], [0], [1], [0, 0, 1, 1], [], []>} : vector<16x16xf32>, vector<16x8xf32>, vector<16x8xf32> -> vector<16x8xf32>
    %381 = vector.extract_strided_slice %348 {offsets = [0, 16], sizes = [16, 8], strides = [1, 1]} : vector<16x96xf32> to vector<16x8xf32>
    %382 = vector.extract_strided_slice %348 {offsets = [0, 48], sizes = [16, 8], strides = [1, 1]} : vector<16x96xf32> to vector<16x8xf32>
    %383 = vector.extract_strided_slice %348 {offsets = [0, 80], sizes = [16, 8], strides = [1, 1]} : vector<16x96xf32> to vector<16x8xf32>
    %cst_189 = arith.constant dense<0.000000e+00> : vector<16x16xf32>
    %384 = tpu.matmul %381, %382, %cst_189 {dimension_numbers = #tpu.dot_dimension_numbers<[1], [1], [0], [0], [0, 0, 1, 0], [], []>} : vector<16x8xf32>, vector<16x8xf32>, vector<16x16xf32> -> vector<16x16xf32>
    %385 = arith.addf %384, %230 : vector<16x16xf32>
    %cst_190 = arith.constant dense<0xFF800000> : vector<16xf32>
    %386 = vector.multi_reduction <maximumf>, %385, %cst_190 [1] : vector<16x16xf32> to vector<16xf32>
    %387 = vector.shape_cast %386 : vector<16xf32> to vector<16x1xf32>
    %388 = vector.broadcast %387 : vector<16x1xf32> to vector<16x16xf32>
    %389 = arith.subf %385, %388 : vector<16x16xf32>
    %390 = math.exp %389 : vector<16x16xf32>
    %cst_191 = arith.constant dense<0.000000e+00> : vector<16xf32>
    %391 = vector.multi_reduction <add>, %390, %cst_191 [1] : vector<16x16xf32> to vector<16xf32>
    %392 = vector.shape_cast %391 : vector<16xf32> to vector<16x1xf32>
    %393 = tpu.reciprocal %392 {approx = true} : vector<16x1xf32> -> vector<16x1xf32>
    %394 = vector.broadcast %393 : vector<16x1xf32> to vector<16x16xf32>
    %395 = arith.mulf %390, %394 : vector<16x16xf32>
    %cst_192 = arith.constant dense<0.000000e+00> : vector<16x8xf32>
    %396 = tpu.matmul %395, %383, %cst_192 {dimension_numbers = #tpu.dot_dimension_numbers<[1], [0], [0], [1], [0, 0, 1, 1], [], []>} : vector<16x16xf32>, vector<16x8xf32>, vector<16x8xf32> -> vector<16x8xf32>
    %397 = vector.extract_strided_slice %348 {offsets = [0, 24], sizes = [16, 8], strides = [1, 1]} : vector<16x96xf32> to vector<16x8xf32>
    %398 = vector.extract_strided_slice %348 {offsets = [0, 56], sizes = [16, 8], strides = [1, 1]} : vector<16x96xf32> to vector<16x8xf32>
    %399 = vector.extract_strided_slice %348 {offsets = [0, 88], sizes = [16, 8], strides = [1, 1]} : vector<16x96xf32> to vector<16x8xf32>
    %cst_193 = arith.constant dense<0.000000e+00> : vector<16x16xf32>
    %400 = tpu.matmul %397, %398, %cst_193 {dimension_numbers = #tpu.dot_dimension_numbers<[1], [1], [0], [0], [0, 0, 1, 0], [], []>} : vector<16x8xf32>, vector<16x8xf32>, vector<16x16xf32> -> vector<16x16xf32>
    %401 = arith.addf %400, %246 : vector<16x16xf32>
    %cst_194 = arith.constant dense<0xFF800000> : vector<16xf32>
    %402 = vector.multi_reduction <maximumf>, %401, %cst_194 [1] : vector<16x16xf32> to vector<16xf32>
    %403 = vector.shape_cast %402 : vector<16xf32> to vector<16x1xf32>
    %404 = vector.broadcast %403 : vector<16x1xf32> to vector<16x16xf32>
    %405 = arith.subf %401, %404 : vector<16x16xf32>
    %406 = math.exp %405 : vector<16x16xf32>
    %cst_195 = arith.constant dense<0.000000e+00> : vector<16xf32>
    %407 = vector.multi_reduction <add>, %406, %cst_195 [1] : vector<16x16xf32> to vector<16xf32>
    %408 = vector.shape_cast %407 : vector<16xf32> to vector<16x1xf32>
    %409 = tpu.reciprocal %408 {approx = true} : vector<16x1xf32> -> vector<16x1xf32>
    %410 = vector.broadcast %409 : vector<16x1xf32> to vector<16x16xf32>
    %411 = arith.mulf %406, %410 : vector<16x16xf32>
    %cst_196 = arith.constant dense<0.000000e+00> : vector<16x8xf32>
    %412 = tpu.matmul %411, %399, %cst_196 {dimension_numbers = #tpu.dot_dimension_numbers<[1], [0], [0], [1], [0, 0, 1, 1], [], []>} : vector<16x16xf32>, vector<16x8xf32>, vector<16x8xf32> -> vector<16x8xf32>
    %413 = tpu.concatenate %364, %380, %396, %412 in 1 : vector<16x8xf32>, vector<16x8xf32>, vector<16x8xf32>, vector<16x8xf32> -> vector<16x32xf32>
    %c1_197 = arith.constant 1 : index
    %c0_198 = arith.constant 0 : index
    %c0_199 = arith.constant 0 : index
    %414 = vector.load %arg20[%c1_197, %c0_198, %c0_199] : memref<2x32x32xf32, #tpu.memory_space<vmem>>, vector<1x32x32xf32>
    %415 = vector.shape_cast %414 : vector<1x32x32xf32> to vector<32x32xf32>
    %cst_200 = arith.constant dense<0.000000e+00> : vector<16x32xf32>
    %416 = tpu.matmul %413, %415, %cst_200 {dimension_numbers = #tpu.dot_dimension_numbers<[1], [0], [0], [1], [0, 0, 1, 1], [], []>} : vector<16x32xf32>, vector<32x32xf32>, vector<16x32xf32> -> vector<16x32xf32>
    %417 = arith.addf %315, %416 : vector<16x32xf32>
    %c1_201 = arith.constant 1 : index
    %c0_202 = arith.constant 0 : index
    %c0_203 = arith.constant 0 : index
    %418 = vector.load %arg21[%c1_201, %c0_202, %c0_203] : memref<2x1x32xf32, #tpu.memory_space<vmem>>, vector<1x1x32xf32>
    %419 = vector.shape_cast %418 : vector<1x1x32xf32> to vector<1x32xf32>
    %420 = vector.broadcast %419 : vector<1x32xf32> to vector<16x32xf32>
    %421 = arith.addf %417, %420 : vector<16x32xf32>
    %c1_204 = arith.constant 1 : index
    %c0_205 = arith.constant 0 : index
    %c0_206 = arith.constant 0 : index
    %422 = vector.load %arg22[%c1_204, %c0_205, %c0_206] : memref<2x1x32xf32, #tpu.memory_space<vmem>>, vector<1x1x32xf32>
    %423 = vector.shape_cast %422 : vector<1x1x32xf32> to vector<1x32xf32>
    %c1_207 = arith.constant 1 : index
    %c0_208 = arith.constant 0 : index
    %c0_209 = arith.constant 0 : index
    %424 = vector.load %arg23[%c1_207, %c0_208, %c0_209] : memref<2x1x32xf32, #tpu.memory_space<vmem>>, vector<1x1x32xf32>
    %425 = vector.shape_cast %424 : vector<1x1x32xf32> to vector<1x32xf32>
    %cst_210 = arith.constant dense<0.000000e+00> : vector<16xf32>
    %426 = vector.multi_reduction <add>, %421, %cst_210 [1] : vector<16x32xf32> to vector<16xf32>
    %427 = vector.shape_cast %426 : vector<16xf32> to vector<16x1xf32>
    %cst_211 = arith.constant 3.200000e+01 : f32
    %428 = vector.broadcast %cst_211 : f32 to vector<16x1xf32>
    %429 = arith.divf %427, %428 : vector<16x1xf32>
    %430 = vector.broadcast %429 : vector<16x1xf32> to vector<16x32xf32>
    %431 = arith.subf %421, %430 : vector<16x32xf32>
    %432 = arith.mulf %431, %431 : vector<16x32xf32>
    %cst_212 = arith.constant dense<0.000000e+00> : vector<16xf32>
    %433 = vector.multi_reduction <add>, %432, %cst_212 [1] : vector<16x32xf32> to vector<16xf32>
    %434 = vector.shape_cast %433 : vector<16xf32> to vector<16x1xf32>
    %cst_213 = arith.constant 3.200000e+01 : f32
    %435 = vector.broadcast %cst_213 : f32 to vector<16x1xf32>
    %436 = arith.divf %434, %435 : vector<16x1xf32>
    %437 = vector.broadcast %429 : vector<16x1xf32> to vector<16x32xf32>
    %438 = arith.subf %421, %437 : vector<16x32xf32>
    %cst_214 = arith.constant 9.99999974E-6 : f32
    %439 = vector.broadcast %cst_214 : f32 to vector<16x1xf32>
    %440 = arith.addf %436, %439 : vector<16x1xf32>
    %441 = math.rsqrt %440 : vector<16x1xf32>
    %442 = vector.broadcast %441 : vector<16x1xf32> to vector<16x32xf32>
    %443 = arith.mulf %438, %442 : vector<16x32xf32>
    %444 = vector.broadcast %423 : vector<1x32xf32> to vector<16x32xf32>
    %445 = arith.mulf %443, %444 : vector<16x32xf32>
    %446 = vector.broadcast %425 : vector<1x32xf32> to vector<16x32xf32>
    %447 = arith.addf %445, %446 : vector<16x32xf32>
    %c1_215 = arith.constant 1 : index
    %c0_216 = arith.constant 0 : index
    %c0_217 = arith.constant 0 : index
    %448 = vector.load %arg24[%c1_215, %c0_216, %c0_217] : memref<2x32x64xf32, #tpu.memory_space<vmem>>, vector<1x32x64xf32>
    %449 = vector.shape_cast %448 : vector<1x32x64xf32> to vector<32x64xf32>
    %cst_218 = arith.constant dense<0.000000e+00> : vector<16x64xf32>
    %450 = tpu.matmul %447, %449, %cst_218 {dimension_numbers = #tpu.dot_dimension_numbers<[1], [0], [0], [1], [0, 0, 1, 1], [], []>} : vector<16x32xf32>, vector<32x64xf32>, vector<16x64xf32> -> vector<16x64xf32>
    %c1_219 = arith.constant 1 : index
    %c0_220 = arith.constant 0 : index
    %c0_221 = arith.constant 0 : index
    %451 = vector.load %arg25[%c1_219, %c0_220, %c0_221] : memref<2x1x64xf32, #tpu.memory_space<vmem>>, vector<1x1x64xf32>
    %452 = vector.shape_cast %451 : vector<1x1x64xf32> to vector<1x64xf32>
    %453 = vector.broadcast %452 : vector<1x64xf32> to vector<16x64xf32>
    %454 = arith.addf %450, %453 : vector<16x64xf32>
    %cst_222 = arith.constant 5.000000e-01 : f32
    %455 = vector.broadcast %cst_222 : f32 to vector<16x64xf32>
    %456 = arith.mulf %455, %454 : vector<16x64xf32>
    %cst_223 = arith.constant 0.707106769 : f32
    %457 = vector.broadcast %cst_223 : f32 to vector<16x64xf32>
    %458 = arith.mulf %454, %457 : vector<16x64xf32>
    %459 = math.erf %458 : vector<16x64xf32>
    %cst_224 = arith.constant 1.000000e+00 : f32
    %460 = vector.broadcast %cst_224 : f32 to vector<16x64xf32>
    %461 = arith.addf %460, %459 : vector<16x64xf32>
    %462 = arith.mulf %456, %461 : vector<16x64xf32>
    %c1_225 = arith.constant 1 : index
    %c0_226 = arith.constant 0 : index
    %c0_227 = arith.constant 0 : index
    %463 = vector.load %arg26[%c1_225, %c0_226, %c0_227] : memref<2x64x32xf32, #tpu.memory_space<vmem>>, vector<1x64x32xf32>
    %464 = vector.shape_cast %463 : vector<1x64x32xf32> to vector<64x32xf32>
    %cst_228 = arith.constant dense<0.000000e+00> : vector<16x32xf32>
    %465 = tpu.matmul %462, %464, %cst_228 {dimension_numbers = #tpu.dot_dimension_numbers<[1], [0], [0], [1], [0, 0, 1, 1], [], []>} : vector<16x64xf32>, vector<64x32xf32>, vector<16x32xf32> -> vector<16x32xf32>
    %466 = arith.addf %421, %465 : vector<16x32xf32>
    %c1_229 = arith.constant 1 : index
    %c0_230 = arith.constant 0 : index
    %c0_231 = arith.constant 0 : index
    %467 = vector.load %arg27[%c1_229, %c0_230, %c0_231] : memref<2x1x32xf32, #tpu.memory_space<vmem>>, vector<1x1x32xf32>
    %468 = vector.shape_cast %467 : vector<1x1x32xf32> to vector<1x32xf32>
    %469 = vector.broadcast %468 : vector<1x32xf32> to vector<16x32xf32>
    %470 = arith.addf %466, %469 : vector<16x32xf32>
    %c0_232 = arith.constant 0 : index
    %c0_233 = arith.constant 0 : index
    %471 = vector.load %arg28[%c0_232, %c0_233] : memref<1x32xf32, #tpu.memory_space<vmem>>, vector<1x32xf32>
    %c0_234 = arith.constant 0 : index
    %c0_235 = arith.constant 0 : index
    %472 = vector.load %arg29[%c0_234, %c0_235] : memref<1x32xf32, #tpu.memory_space<vmem>>, vector<1x32xf32>
    %cst_236 = arith.constant dense<0.000000e+00> : vector<16xf32>
    %473 = vector.multi_reduction <add>, %470, %cst_236 [1] : vector<16x32xf32> to vector<16xf32>
    %474 = vector.shape_cast %473 : vector<16xf32> to vector<16x1xf32>
    %cst_237 = arith.constant 3.200000e+01 : f32
    %475 = vector.broadcast %cst_237 : f32 to vector<16x1xf32>
    %476 = arith.divf %474, %475 : vector<16x1xf32>
    %477 = vector.broadcast %476 : vector<16x1xf32> to vector<16x32xf32>
    %478 = arith.subf %470, %477 : vector<16x32xf32>
    %479 = arith.mulf %478, %478 : vector<16x32xf32>
    %cst_238 = arith.constant dense<0.000000e+00> : vector<16xf32>
    %480 = vector.multi_reduction <add>, %479, %cst_238 [1] : vector<16x32xf32> to vector<16xf32>
    %481 = vector.shape_cast %480 : vector<16xf32> to vector<16x1xf32>
    %cst_239 = arith.constant 3.200000e+01 : f32
    %482 = vector.broadcast %cst_239 : f32 to vector<16x1xf32>
    %483 = arith.divf %481, %482 : vector<16x1xf32>
    %484 = vector.broadcast %476 : vector<16x1xf32> to vector<16x32xf32>
    %485 = arith.subf %470, %484 : vector<16x32xf32>
    %cst_240 = arith.constant 9.99999974E-6 : f32
    %486 = vector.broadcast %cst_240 : f32 to vector<16x1xf32>
    %487 = arith.addf %483, %486 : vector<16x1xf32>
    %488 = math.rsqrt %487 : vector<16x1xf32>
    %489 = vector.broadcast %488 : vector<16x1xf32> to vector<16x32xf32>
    %490 = arith.mulf %485, %489 : vector<16x32xf32>
    %491 = vector.broadcast %471 : vector<1x32xf32> to vector<16x32xf32>
    %492 = arith.mulf %490, %491 : vector<16x32xf32>
    %493 = vector.broadcast %472 : vector<1x32xf32> to vector<16x32xf32>
    %494 = arith.addf %492, %493 : vector<16x32xf32>
    %c0_241 = arith.constant 0 : index
    %c0_242 = arith.constant 0 : index
    %c0_243 = arith.constant 0 : index
    %495 = vector.load %arg30[%c0_241, %c0_242, %c0_243] : memref<1x16x32xf32, #tpu.memory_space<vmem>>, vector<1x16x32xf32>
    %496 = vector.shape_cast %495 : vector<1x16x32xf32> to vector<16x32xf32>
    %497 = vector.shape_cast %494 : vector<16x32xf32> to vector<1x16x32xf32>
    tpu.vector_store %arg30[%c0_241, %c0_242, %c0_243], %497 {strides = array<i32>} : memref<1x16x32xf32, #tpu.memory_space<vmem>>, vector<1x16x32xf32>,
    return
  }
  func.func @transform_0(%arg0: i32) -> (i32, i32, i32) {
    %c0_i32 = arith.constant 0 : i32
    %c0_i32_0 = arith.constant 0 : i32
    %c0_i32_1 = arith.constant 0 : i32
    return %arg0, %c0_i32, %c0_i32_0 : i32, i32, i32
  }
  func.func @transform_1(%arg0: i32) -> (i32, i32, i32) {
    %c0_i32 = arith.constant 0 : i32
    %c0_i32_0 = arith.constant 0 : i32
    %c0_i32_1 = arith.constant 0 : i32
    return %arg0, %c0_i32, %c0_i32_0 : i32, i32, i32
  }
  func.func @transform_2(%arg0: i32) -> (i32, i32, i32) {
    %c0_i32 = arith.constant 0 : i32
    %c0_i32_0 = arith.constant 0 : i32
    %c0_i32_1 = arith.constant 0 : i32
    return %arg0, %c0_i32, %c0_i32_0 : i32, i32, i32
  }
  func.func @transform_3(%arg0: i32) -> (i32, i32, i32) {
    %c0_i32 = arith.constant 0 : i32
    %c0_i32_0 = arith.constant 0 : i32
    %c0_i32_1 = arith.constant 0 : i32
    return %arg0, %c0_i32, %c0_i32_0 : i32, i32, i32
  }
  func.func @transform_4(%arg0: i32) -> (i32, i32) {
    %c0_i32 = arith.constant 0 : i32
    %c0_i32_0 = arith.constant 0 : i32
    %c0_i32_1 = arith.constant 0 : i32
    return %c0_i32, %c0_i32_0 : i32, i32
  }
  func.func @transform_5(%arg0: i32) -> (i32, i32) {
    %c0_i32 = arith.constant 0 : i32
    %c0_i32_0 = arith.constant 0 : i32
    %c0_i32_1 = arith.constant 0 : i32
    return %c0_i32, %c0_i32_0 : i32, i32
  }
  func.func @transform_6(%arg0: i32) -> (i32, i32) {
    %c0_i32 = arith.constant 0 : i32
    %c0_i32_0 = arith.constant 0 : i32
    %c0_i32_1 = arith.constant 0 : i32
    return %c0_i32, %c0_i32_0 : i32, i32
  }
  func.func @transform_7(%arg0: i32) -> (i32, i32) {
    %c0_i32 = arith.constant 0 : i32
    %c0_i32_0 = arith.constant 0 : i32
    %c0_i32_1 = arith.constant 0 : i32
    return %c0_i32, %c0_i32_0 : i32, i32
  }
  func.func @transform_8(%arg0: i32) -> (i32, i32) {
    %c0_i32 = arith.constant 0 : i32
    %c0_i32_0 = arith.constant 0 : i32
    %c0_i32_1 = arith.constant 0 : i32
    return %c0_i32, %c0_i32_0 : i32, i32
  }
  func.func @transform_9(%arg0: i32) -> (i32, i32) {
    %c0_i32 = arith.constant 0 : i32
    %c0_i32_0 = arith.constant 0 : i32
    %c0_i32_1 = arith.constant 0 : i32
    return %c0_i32, %c0_i32_0 : i32, i32
  }
  func.func @transform_10(%arg0: i32) -> (i32, i32) {
    %c0_i32 = arith.constant 0 : i32
    %c0_i32_0 = arith.constant 0 : i32
    %c0_i32_1 = arith.constant 0 : i32
    return %c0_i32, %c0_i32_0 : i32, i32
  }
  func.func @transform_11(%arg0: i32) -> (i32, i32) {
    %c0_i32 = arith.constant 0 : i32
    %c0_i32_0 = arith.constant 0 : i32
    %c0_i32_1 = arith.constant 0 : i32
    return %c0_i32, %c0_i32_0 : i32, i32
  }
  func.func @transform_12(%arg0: i32) -> (i32, i32) {
    %c0_i32 = arith.constant 0 : i32
    %c0_i32_0 = arith.constant 0 : i32
    %c0_i32_1 = arith.constant 0 : i32
    return %c0_i32, %c0_i32_0 : i32, i32
  }
  func.func @transform_13(%arg0: i32) -> (i32, i32) {
    %c0_i32 = arith.constant 0 : i32
    %c0_i32_0 = arith.constant 0 : i32
    %c0_i32_1 = arith.constant 0 : i32
    return %c0_i32, %c0_i32_0 : i32, i32
  }
  func.func @transform_14(%arg0: i32) -> (i32, i32) {
    %c0_i32 = arith.constant 0 : i32
    %c0_i32_0 = arith.constant 0 : i32
    %c0_i32_1 = arith.constant 0 : i32
    return %c0_i32, %c0_i32_0 : i32, i32
  }
  func.func @transform_15(%arg0: i32) -> (i32, i32, i32) {
    %c0_i32 = arith.constant 0 : i32
    %c0_i32_0 = arith.constant 0 : i32
    %c0_i32_1 = arith.constant 0 : i32
    %c0_i32_2 = arith.constant 0 : i32
    return %c0_i32, %c0_i32_0, %c0_i32_1 : i32, i32, i32
  }
  func.func @transform_16(%arg0: i32) -> (i32, i32, i32) {
    %c0_i32 = arith.constant 0 : i32
    %c0_i32_0 = arith.constant 0 : i32
    %c0_i32_1 = arith.constant 0 : i32
    %c0_i32_2 = arith.constant 0 : i32
    return %c0_i32, %c0_i32_0, %c0_i32_1 : i32, i32, i32
  }
  func.func @transform_17(%arg0: i32) -> (i32, i32, i32) {
    %c0_i32 = arith.constant 0 : i32
    %c0_i32_0 = arith.constant 0 : i32
    %c0_i32_1 = arith.constant 0 : i32
    %c0_i32_2 = arith.constant 0 : i32
    return %c0_i32, %c0_i32_0, %c0_i32_1 : i32, i32, i32
  }
  func.func @transform_18(%arg0: i32) -> (i32, i32, i32) {
    %c0_i32 = arith.constant 0 : i32
    %c0_i32_0 = arith.constant 0 : i32
    %c0_i32_1 = arith.constant 0 : i32
    %c0_i32_2 = arith.constant 0 : i32
    return %c0_i32, %c0_i32_0, %c0_i32_1 : i32, i32, i32
  }
  func.func @transform_19(%arg0: i32) -> (i32, i32, i32) {
    %c0_i32 = arith.constant 0 : i32
    %c0_i32_0 = arith.constant 0 : i32
    %c0_i32_1 = arith.constant 0 : i32
    %c0_i32_2 = arith.constant 0 : i32
    return %c0_i32, %c0_i32_0, %c0_i32_1 : i32, i32, i32
  }
  func.func @transform_20(%arg0: i32) -> (i32, i32, i32) {
    %c0_i32 = arith.constant 0 : i32
    %c0_i32_0 = arith.constant 0 : i32
    %c0_i32_1 = arith.constant 0 : i32
    %c0_i32_2 = arith.constant 0 : i32
    return %c0_i32, %c0_i32_0, %c0_i32_1 : i32, i32, i32
  }
  func.func @transform_21(%arg0: i32) -> (i32, i32, i32) {
    %c0_i32 = arith.constant 0 : i32
    %c0_i32_0 = arith.constant 0 : i32
    %c0_i32_1 = arith.constant 0 : i32
    %c0_i32_2 = arith.constant 0 : i32
    return %c0_i32, %c0_i32_0, %c0_i32_1 : i32, i32, i32
  }
  func.func @transform_22(%arg0: i32) -> (i32, i32, i32) {
    %c0_i32 = arith.constant 0 : i32
    %c0_i32_0 = arith.constant 0 : i32
    %c0_i32_1 = arith.constant 0 : i32
    %c0_i32_2 = arith.constant 0 : i32
    return %c0_i32, %c0_i32_0, %c0_i32_1 : i32, i32, i32
  }
  func.func @transform_23(%arg0: i32) -> (i32, i32, i32) {
    %c0_i32 = arith.constant 0 : i32
    %c0_i32_0 = arith.constant 0 : i32
    %c0_i32_1 = arith.constant 0 : i32
    %c0_i32_2 = arith.constant 0 : i32
    return %c0_i32, %c0_i32_0, %c0_i32_1 : i32, i32, i32
  }
  func.func @transform_24(%arg0: i32) -> (i32, i32, i32) {
    %c0_i32 = arith.constant 0 : i32
    %c0_i32_0 = arith.constant 0 : i32
    %c0_i32_1 = arith.constant 0 : i32
    %c0_i32_2 = arith.constant 0 : i32
    return %c0_i32, %c0_i32_0, %c0_i32_1 : i32, i32, i32
  }
  func.func @transform_25(%arg0: i32) -> (i32, i32, i32) {
    %c0_i32 = arith.constant 0 : i32
    %c0_i32_0 = arith.constant 0 : i32
    %c0_i32_1 = arith.constant 0 : i32
    %c0_i32_2 = arith.constant 0 : i32
    return %c0_i32, %c0_i32_0, %c0_i32_1 : i32, i32, i32
  }
  func.func @transform_26(%arg0: i32) -> (i32, i32, i32) {
    %c0_i32 = arith.constant 0 : i32
    %c0_i32_0 = arith.constant 0 : i32
    %c0_i32_1 = arith.constant 0 : i32
    %c0_i32_2 = arith.constant 0 : i32
    return %c0_i32, %c0_i32_0, %c0_i32_1 : i32, i32, i32
  }
  func.func @transform_27(%arg0: i32) -> (i32, i32) {
    %c0_i32 = arith.constant 0 : i32
    %c0_i32_0 = arith.constant 0 : i32
    %c0_i32_1 = arith.constant 0 : i32
    return %c0_i32, %c0_i32_0 : i32, i32
  }
  func.func @transform_28(%arg0: i32) -> (i32, i32) {
    %c0_i32 = arith.constant 0 : i32
    %c0_i32_0 = arith.constant 0 : i32
    %c0_i32_1 = arith.constant 0 : i32
    return %c0_i32, %c0_i32_0 : i32, i32
  }
  func.func @transform_29(%arg0: i32) -> (i32, i32, i32) {
    %c0_i32 = arith.constant 0 : i32
    %c0_i32_0 = arith.constant 0 : i32
    %c0_i32_1 = arith.constant 0 : i32
    return %arg0, %c0_i32, %c0_i32_0 : i32, i32, i32
  }
}

</mosaic_0001>

<bundles_post_ra>
// kernel: pocket_transformer_forward.1
= control target key start
LH: loop header
LB: loop body
LE: loop exit
PB: predicated region body
PF: predicated region fallthrough
CT: control target
= control target key end

     0   :  { %s6434_s6 = smov 1   ;;  %s6435_s10 = smov 2   ;;  %s7686_s0 = inlined_call_operand.smem [shape: u32[30], index: -1, kind: input, shape index: {}] }
   0x1   :  { %s6491_s5 = sld [smem:[%s7686_s0]]   ;;  %s6436_s14 = smov 3  }
   0x2   :  { %s6496_s9 = sld [smem:[%s7686_s0 + %s6434_s6]]   ;;  %s6437_s18 = smov 4  }
   0x3   :  { %s6501_s13 = sld [smem:[%s7686_s0 + %s6435_s10]]   ;;  %s6438_s22 = smov 5  }
   0x4   :  { %s6506_s17 = sld [smem:[%s7686_s0 + %s6436_s14]]   ;;  %s6439_s26 = smov 6  }
   0x5   :  { %s6511_s21 = sld [smem:[%s7686_s0 + %s6437_s18]]   ;;  %s6440_s30 = smov 7  }
   0x6   :  { %s6516_s25 = sld [smem:[%s7686_s0 + %s6438_s22]]   ;;  %s6441_s4 = smov 8  }
   0x7   :  { %7732 = sst [smem:[#allocation6_spill]] %s6491_s5  ;;  %s6442_s10 = smov 9  }
   0x8   :  { %7733 = sst [smem:[#allocation7_spill]] %s6496_s9  ;;  %s6443_s15 = smov 10  }
   0x9   :  { %7734 = sst [smem:[#allocation8_spill]] %s6501_s13  ;;  %s6444_s20 = smov 11  }
   0xa   :  { %7735 = sst [smem:[#allocation9_spill]] %s6506_s17  ;;  %s6446_s1 = smov 13  }
   0xb   :  { %7736 = sst [smem:[#allocation10_spill]] %s6511_s21  ;;  %s6447_s7 = smov 14  }
   0xc   :  { %s6521_s29 = sld [smem:[%s7686_s0 + %s6439_s26]]   ;;  %s6445_s26 = smov 12  }
   0xd   :  { %s6526_s3 = sld [smem:[%s7686_s0 + %s6440_s30]]   ;;  %s6449_s22 = smov 16  }
   0xe   :  { %s6531_s8 = sld [smem:[%s7686_s0 + %s6441_s4]]   ;;  %s6450_s28 = smov 17  }
   0xf   :  { %s6536_s14 = sld [smem:[%s7686_s0 + %s6442_s10]]  }
  0x10   :  { %s6541_s19 = sld [smem:[%s7686_s0 + %s6443_s15]]   ;;  %s6448_s15 = smov 15  }
  0x11   :  { %s6546_s24 = sld [smem:[%s7686_s0 + %s6444_s20]]  }
  0x12   :  { %s6551_s30 = sld [smem:[%s7686_s0 + %s6445_s26]]  }
  0x13   :  { %7737 = sst [smem:[#allocation11_spill]] %s6526_s3 }
  0x14   :  { %7738 = sst [smem:[#allocation12_spill]] %s6531_s8 }
  0x15   :  { %7739 = sst [smem:[#allocation13_spill]] %s6536_s14 }
  0x16   :  { %7740 = sst [smem:[#allocation14_spill]] %s6541_s19 }
  0x17   :  { %7741 = sst [smem:[#allocation15_spill]] %s6546_s24 }
  0x18   :  { %s6556_s6 = sld [smem:[%s7686_s0 + %s6446_s1]]  }
  0x19   :  { %s6561_s12 = sld [smem:[%s7686_s0 + %s6447_s7]]   ;;  %s6451_s7 = smov 18  }
  0x1a   :  { %s6566_s20 = sld [smem:[%s7686_s0 + %s6448_s15]]   ;;  %s6452_s15 = smov 19  }
  0x1b   :  { %s6571_s27 = sld [smem:[%s7686_s0 + %s6449_s22]]   ;;  %s6453_s22 = smov 20  }
  0x1c   :  { %s6576_s4 = sld [smem:[%s7686_s0 + %s6450_s28]]   ;;  %s6454_s28 = smov 21  }
  0x1e   :  { %7742 = sst [smem:[#allocation16_spill]] %s6556_s6 }
  0x1f   :  { %7743 = sst [smem:[#allocation17_spill]] %s6561_s12 }
  0x20   :  { %7744 = sst [smem:[#allocation18_spill]] %s6566_s20 }
  0x21   :  { %7745 = sst [smem:[#allocation19_spill]] %s6571_s27 }
  0x22   :  { %7746 = sst [smem:[#allocation20_spill]] %s6576_s4 }
  0x23   :  { %s6581_s6 = sld [smem:[%s7686_s0 + %s6451_s7]]   ;;  %s6455_s7 = smov 22  }
  0x24   :  { %s6586_s20 = sld [smem:[%s7686_s0 + %s6452_s15]]   ;;  %s6456_s15 = smov 23  }
  0x25   :  { %s6591_s27 = sld [smem:[%s7686_s0 + %s6453_s22]]   ;;  %s6457_s22 = smov 24  }
  0x26   :  { %s6596_s4 = sld [smem:[%s7686_s0 + %s6454_s28]]   ;;  %s6458_s28 = smov 25  }
  0x29   :  { %7747 = sst [smem:[#allocation21_spill]] %s6581_s6 }
  0x2a   :  { %7748 = sst [smem:[#allocation22_spill]] %s6586_s20 }
  0x2b   :  { %7749 = sst [smem:[#allocation23_spill]] %s6591_s27 }
  0x2c   :  { %7750 = sst [smem:[#allocation24_spill]] %s6596_s4 }
  0x2d   :  { %s6601_s6 = sld [smem:[%s7686_s0 + %s6455_s7]]   ;;  %s6459_s7 = smov 26  }
  0x2e   :  { %s6606_s20 = sld [smem:[%s7686_s0 + %s6456_s15]]   ;;  %s6460_s15 = smov 27  }
  0x2f   :  { %s6611_s27 = sld [smem:[%s7686_s0 + %s6457_s22]]   ;;  %s6461_s22 = smov 28  }
  0x30   :  { %s6616_s4 = sld [smem:[%s7686_s0 + %s6458_s28]]   ;;  %s6462_s28 = smov 29  }
  0x33   :  { %7751 = sst [smem:[#allocation25_spill]] %s6601_s6 }
  0x34   :  { %7752 = sst [smem:[#allocation26_spill]] %s6606_s20 }
  0x35   :  { %7753 = sst [smem:[#allocation27_spill]] %s6611_s27 }
  0x36   :  { %7754 = sst [smem:[#allocation28_spill]] %s6616_s4 }
  0x37   :  { %s6621_s6 = sld [smem:[%s7686_s0 + %s6459_s7]]  }
  0x38   :  { %s6626_s20 = sld [smem:[%s7686_s0 + %s6460_s15]]  }
  0x39   :  { %s6631_s27 = sld [smem:[%s7686_s0 + %s6461_s22]]  }
  0x3a   :  { %s6636_s4 = sld [smem:[%s7686_s0 + %s6462_s28]]  }
  0x3d   :  { %7755 = sst [smem:[#allocation29_spill]] %s6621_s6 }
  0x3e   :  { %64 = vsyncpa [#allocation4], 0 }
  0x3f   :  { %66 = vsyncpa [#allocation4 + $0x1], 0  ;;  %s6638_s7 = smov 0   ;;  %s6640_s10 = smov 0  }
  0x40   :  { %s6642_s11 = smov 0   ;;  %s6644_s15 = smov 0  }
  0x41 LB: > { %s7756_s6 = sld [smem:[#allocation29_spill]]  ;;  %s7757_s24 = sld [smem:[#allocation15_spill]]  ;;  %s6420_s7 = sphi %s6638_s7, %s7801_s7   ;;  %s6432_s15 = sphi %s6644_s15, %s7804_s15   ;;  %s6428_s11 = sphi %s6642_s11, %s7803_s11   ;;  %s6424_s10 = sphi %s6640_s10, %s7802_s10  }
  0x42   : > { %s7758_s19 = sld [smem:[#allocation14_spill]]  ;;  %s7759_s14 = sld [smem:[#allocation13_spill]] }
  0x43   : > { %s7760_s8 = sld [smem:[#allocation12_spill]]  ;;  %s6659_s0 = sadd.s32 4294967295, %s6432_s15  }
  0x44   : > { %s5275_s16 = sadd.s32 4294967294, %s6432_s15   ;;  %s6663_s18 = sadd.s32 1, %s6432_s15  }
  0x45   : > { %s708_s22 = sadd.s32 1, %s6428_s11  ;;  %s705_s23 = ssub.s32 %s6432_s15, %s6663_s18 }
  0x46   : > { %p718_p0 = scmp.ne.s32.totalorder %s6428_s11, %s6424_s10  ;;  %p706_p1 = scmp.eq.s32.totalorder %s705_s23, 0 }
  0x47   : > { %p719_p2 = scmp.eq.s32.totalorder %s6659_s0, 1  ;;  %p724_p3 = scmp.ne.s32.totalorder %s6424_s10, %s6420_s7 }
  0x48   : > { %p725_p4 = scmp.eq.s32.totalorder %s5275_s16, 1  ;;  %p5278_p7 = scmp.ge.s32.totalorder %s6432_s15, 1 }
  0x49   : > { %s6674_s26 = scalar_select %p706_p1, %s6428_s11, %s708_s22  }
  0x4a   : > { %p6676_p5 = por %p719_p2, %p718_p0  ;;  %p6680_p6 = por %p725_p4, %p724_p3 }
  0x4b   : > { %p847_p8 = scmp.lt.s32.totalorder %s6432_s15, 3 }
  0x4d   : > { %p848_p9 = pnand %p5278_p7, %p847_p8 }
  0x4e   : > { %s7763_s21 = sld [smem:[#allocation10_spill]] (!%p848_p9)  ;;  %s7764_s13 = sld [smem:[#allocation8_spill]] (!%p848_p9)  ;;  %v1113_v0 = vld [vmem:[%s7760_s8 + $0x10] sm:$0xff] (!%p848_p9)  ;;  %v1111_v1 = vld [vmem:[%s7760_s8] sm:$0xff] (!%p848_p9)  ;;  %vm969_vm0 = vcmask (!%p848_p9), 1042432   ;;  %v6463_v2 = vmov (!%p848_p9), 0   ;;  %v1128_v55 = vlaneseq (!%p848_p9) }
  0x4f   : > { %851 = sbr.rel (%p848_p9) target bundleno = 8181 (0x1ff5), region = 136  ;;  %p935_p10 = scmp.lt.s32.totalorder (!%p848_p9), %s6659_s0, 1  ;;  %6065 = vset.pattern.permute.xlu1 (!%p848_p9), %v6463_v2  ;;  %6064 = vset.pattern.permute.xlu0 (!%p848_p9), %v6463_v2  ;;  %v1114_v4 = vld [vmem:[%s7760_s8 + $0x18] sm:$0xff] (!%p848_p9)  ;;  %v1112_v5 = vld [vmem:[%s7760_s8 + $0x8] sm:$0xff] (!%p848_p9)  ;;  %vm962_vm1 = vcmask (!%p848_p9), 23552   ;;  %v1282_v11 = vld [vmem:[%s7759_s14] sm:$0xff] (!%p848_p9) }
  0x50   : > { %s7765_s5 = sld [smem:[#allocation6_spill]] (!%p848_p9)  ;;  %1150 = vperm.xlu1 (!%p848_p9), %6065, %v1113_v0   ;;  %1140 = vperm.xlu0 (!%p848_p9), %6064, %v1111_v1   ;;  %v1283_v7 = vld [vmem:[%s7759_s14 + $0x8] sm:$0xff] (!%p848_p9)  ;;  %v1115_v13 = vld [vmem:[%s7760_s8 + $0x20] sm:$0xff] (!%p848_p9)  ;;  %v1285_v14 = vld [vmem:[%s7759_s14 + $0x18] sm:$0xff] (!%p848_p9)  ;;  %s7766_s17 = sld [smem:[#allocation9_spill]] (!%p848_p9)  ;;  %v6464_v54 = vmov (!%p848_p9), 0.0  }
  0x51   : > { %v1116_v12 = vld [vmem:[%s7760_s8 + $0x28] sm:$0xff] (!%p848_p9)  ;;  %v1284_v15 = vld [vmem:[%s7759_s14 + $0x10] sm:$0xff] (!%p848_p9)  ;;  %v1118_v16 = vld [vmem:[%s7760_s8 + $0x38] sm:$0xff] (!%p848_p9)  ;;  %1778 = vmatprep.mubr.f32.mxu1 (!%p848_p9), %v6464_v54  ;;  %v6750_v56 = vshrl.u32 (!%p848_p9), %v1128_v55, 7  ;;  %vm1050_vm3 = vcmask (!%p848_p9), 261120   ;;  %s7767_s9 = sld [smem:[#allocation7_spill]] (!%p848_p9) }
  0x52   : > { %v1117_v17 = vld [vmem:[%s7760_s8 + $0x30] sm:$0xff] (!%p848_p9)  ;;  %v1287_v18 = vld [vmem:[%s7759_s14 + $0x28] sm:$0xff] (!%p848_p9)  ;;  %v1286_v19 = vld [vmem:[%s7759_s14 + $0x20] sm:$0xff] (!%p848_p9)  ;;  %s7768_s3 = sld [smem:[#allocation11_spill]] (!%p848_p9)  ;;  %s7769_s12 = sld [smem:[#allocation17_spill]] (!%p848_p9)  ;;  %vm2142_vm4 = vcmask (!%p848_p9), 122880  }
  0x53   : > { %v1120_v20 = vld [vmem:[%s7760_s8 + $0x48] sm:$0xff] (!%p848_p9)  ;;  %v1119_v21 = vld [vmem:[%s7760_s8 + $0x40] sm:$0xff] (!%p848_p9)  ;;  %v1289_v22 = vld [vmem:[%s7759_s14 + $0x38] sm:$0xff] (!%p848_p9)  ;;  %v1134_v57 = vsub.s32 (!%p848_p9), 1, %v6750_v56  ;;  %v6755_v58 = vsub.s32 (!%p848_p9), 0, %v6750_v56  ;;  %vm2605_vm5 = vcmask (!%p848_p9), 64512  }
  0x54   : > { %v954_v3 = vld [vmem:[%s7763_s21] sm:$0x7] (!%p848_p9)  ;;  %1155 = vperm.xlu1 (!%p848_p9), %6065, %v1114_v4   ;;  %1145 = vperm.xlu0 (!%p848_p9), %6064, %v1112_v5   ;;  %v1288_v23 = vld [vmem:[%s7759_s14 + $0x30] sm:$0xff] (!%p848_p9)  ;;  %v1475_v24 = vld [vmem:[%s7758_s19 + $0x8] sm:$0xff] (!%p848_p9)  ;;  %vm2689_vm8 = vcmask (!%p848_p9), 130048   ;;  %vm3427_vm9 = vcmask (!%p848_p9), 195584  }
  0x55   : > { %5532 = vmatprep.subr.msk.mxu0 (!%p848_p9), %vm969_vm0, %v954_v3  ;;  %v1474_v25 = vld [vmem:[%s7758_s19] sm:$0xff] (!%p848_p9)  ;;  %v1122_v26 = vld [vmem:[%s7760_s8 + $0x58] sm:$0xff] (!%p848_p9)  ;;  %v1121_v27 = vld [vmem:[%s7760_s8 + $0x50] sm:$0xff] (!%p848_p9)  ;;  %s7789_s21 = sld [smem:[#allocation25_spill]] (!%p848_p9)  ;;  %vm3680_vm10 = vcmask (!%p848_p9), 523264  }
  0x56   : > { %s6691_s2 = scalar_select %p935_p10, %s6659_s0, 1  ;;  %5533 = vmatpush3.msk.msra.mxu0 %vm969_vm0, %v954_v3  ;;  %v1291_v28 = vld [vmem:[%s7759_s14 + $0x48] sm:$0xff]  ;;  %v1290_v29 = vld [vmem:[%s7759_s14 + $0x40] sm:$0xff]  ;;  %v1477_v30 = vld [vmem:[%s7758_s19 + $0x18] sm:$0xff] }
  0x57   : > { %v1476_v31 = vld [vmem:[%s7758_s19 + $0x10] sm:$0xff]  ;;  %v1124_v32 = vld [vmem:[%s7760_s8 + $0x68] sm:$0xff]  ;;  %v1123_v33 = vld [vmem:[%s7760_s8 + $0x60] sm:$0xff] }
  0x58   : > { %s947_s16 = scalar_lea.vmem %s7764_s13, %s6691_s2  ;;  %s5406_s22 = sshll.u32 %s6691_s2, 4  ;;  %1305 = vperm.xlu1 %6065, %v1283_v7   ;;  %1300 = vperm.xlu0 %6064, %v1282_v11   ;;  %v1293_v34 = vld [vmem:[%s7759_s14 + $0x58] sm:$0xff]  ;;  %v1292_v35 = vld [vmem:[%s7759_s14 + $0x50] sm:$0xff]  ;;  %v1479_v36 = vld [vmem:[%s7758_s19 + $0x28] sm:$0xff] }
  0x59   : > { %v2436_v6 = vld [vmem:[%s947_s16] sm:$0x1]  ;;  %s939_s23 = scalar_lea.vmem %s7765_s5, %s5406_s22  ;;  %v1126_v38 = vld [vmem:[%s7760_s8 + $0x78] sm:$0xff]  ;;  %v1125_v39 = vld [vmem:[%s7760_s8 + $0x70] sm:$0xff]  ;;  %s5284_s16 = sshll.u32 %s6691_s2, 1 }
  0x5a   : > { %vm2437_vm2 = vcmp.gt.f32.partialorder %v2436_v6, 0.5  ;;  %v952_v9 = vld [vmem:[%s939_s23] sm:$0xff]  ;;  %v953_v10 = vld [vmem:[%s939_s23 + $0x8] sm:$0xff]  ;;  %v1481_v42 = vld [vmem:[%s7758_s19 + $0x38] sm:$0xff]  ;;  %s951_s23 = scalar_lea.vmem %s7766_s17, %s5284_s16  ;;  %s6811_s16 = scalar_lea.vmem %s7767_s9, %s5406_s22 }
  0x5b   : > { %v6702_v8 = vsel %vm2437_vm2, 1, %v6463_v2  ;;  %5534 = vmatprep.mubr.msk.f32.mxu0 %vm962_vm1, %v952_v9  ;;  %v1478_v37 = vld [vmem:[%s7758_s19 + $0x20] sm:$0xff]  ;;  %v1295_v40 = vld [vmem:[%s7759_s14 + $0x68] sm:$0xff]  ;;  %v1480_v43 = vld [vmem:[%s7758_s19 + $0x30] sm:$0xff]  ;;  %s7770_s2 = sld [smem:[#allocation20_spill]]  ;;  %s7771_s22 = sld [smem:[#allocation16_spill]] }
  0x5c   : > { %5535 = vmatmul.mubr.msk.f32.vlgmr.msra.gmra.mrb[0].mxu0 %vm962_vm1, %v953_v10  ;;  %1165 = vperm.xlu1 %6065, %v1116_v12   ;;  %v1294_v41 = vld [vmem:[%s7759_s14 + $0x60] sm:$0xff]  ;;  %v1297_v44 = vld [vmem:[%s7759_s14 + $0x78] sm:$0xff]  ;;  %v1296_v45 = vld [vmem:[%s7759_s14 + $0x70] sm:$0xff]  ;;  %s7724_s5 = smov 64   ;;  %s7720_s8 = smov 112  }
  0x5d   : > { %1160 = vperm.xlu0 %6064, %v1115_v13   ;;  %v1483_v46 = vld [vmem:[%s7758_s19 + $0x48] sm:$0xff]  ;;  %v1482_v47 = vld [vmem:[%s7758_s19 + $0x40] sm:$0xff]  ;;  %v1485_v48 = vld [vmem:[%s7758_s19 + $0x58] sm:$0xff]  ;;  %2106 = vmatprep.mubr.f32.mxu0 %v6464_v54  ;;  %s7703_s9 = smov 80   ;;  %s7705_s13 = smov 16  }
  0x5e   : > { %v1484_v49 = vld [vmem:[%s7758_s19 + $0x50] sm:$0xff]  ;;  %v1487_v50 = vld [vmem:[%s7758_s19 + $0x68] sm:$0xff]  ;;  %v1486_v51 = vld [vmem:[%s7758_s19 + $0x60] sm:$0xff]  ;;  %s7782_s14 = smov 48   ;;  %s7783_s17 = smov 16  }
  0x5f   : > { %v1489_v52 = vld [vmem:[%s7758_s19 + $0x78] sm:$0xff]  ;;  %v1488_v53 = vld [vmem:[%s7758_s19 + $0x70] sm:$0xff]  ;;  %v1110_v59 = vld [vmem:[%s951_s23] sm:$0x3]  ;;  %s7772_s23 = sld [smem:[#allocation18_spill]]  ;;  %s7788_s19 = sld [smem:[#allocation24_spill]] }
  0x60   : > { %1315 = vperm.xlu1 %6065, %v1285_v14   ;;  %v6757_v62 = vrot.slane %v1110_v59, %v1134_v57  ;;  %v6760_v63 = vrot.slane %v1110_v59, %v6755_v58  ;;  %vm7155_vm6 = vmpackc.low %vm2605_vm5, %vm2605_vm5 }
  0x61   : > { %1310 = vperm.xlu0 %6064, %v1284_v15  }
  0x64   : > { %1175 = vperm.xlu1 %6065, %v1118_v16  }
  0x65   : > { %1170 = vperm.xlu0 %6064, %v1117_v17  }
  0x68   : > { %1325 = vperm.xlu1 %6065, %v1287_v18  }
  0x69   : > { %1320 = vperm.xlu0 %6064, %v1286_v19  }
  0x6c   : > { %1185 = vperm.xlu1 %6065, %v1120_v20  }
  0x6d   : > { %1180 = vperm.xlu0 %6064, %v1119_v21  }
  0x70   : > { %1335 = vperm.xlu1 %6065, %v1289_v22  }
  0x71   : > { %1330 = vperm.xlu0 %6064, %v1288_v23  }
  0x74   : > { %1497 = vperm.xlu1 %6065, %v1475_v24  }
  0x75   : > { %1492 = vperm.xlu0 %6064, %v1474_v25  }
  0x78   : > { %1195 = vperm.xlu1 %6065, %v1122_v26  }
  0x79   : > { %1190 = vperm.xlu0 %6064, %v1121_v27  }
  0x7c   : > { %1345 = vperm.xlu1 %6065, %v1291_v28  }
  0x7d   : > { %1340 = vperm.xlu0 %6064, %v1290_v29  }
  0x80   : > { %1507 = vperm.xlu1 %6065, %v1477_v30  }
  0x81   : > { %1502 = vperm.xlu0 %6064, %v1476_v31  }
  0x84   : > { %1205 = vperm.xlu1 %6065, %v1124_v32  }
  0x85   : > { %1200 = vperm.xlu0 %6064, %v1123_v33  }
  0x88   : > { %1355 = vperm.xlu1 %6065, %v1293_v34  }
  0x89   : > { %1350 = vperm.xlu0 %6064, %v1292_v35  }
  0x8c   : > { %1517 = vperm.xlu1 %6065, %v1479_v36  }
  0x8d   : > { %1512 = vperm.xlu0 %6064, %v1478_v37  }
  0x90   : > { %1215 = vperm.xlu1 %6065, %v1126_v38  }
  0x91   : > { %1210 = vperm.xlu0 %6064, %v1125_v39  }
  0x94   : > { %1365 = vperm.xlu1 %6065, %v1295_v40  }
  0x95   : > { %1360 = vperm.xlu0 %6064, %v1294_v41  }
  0x98   : > { %1527 = vperm.xlu1 %6065, %v1481_v42  }
  0x99   : > { %1522 = vperm.xlu0 %6064, %v1480_v43  }
  0x9c   : > { %1375 = vperm.xlu1 %6065, %v1297_v44  }
  0x9d   : > { %1370 = vperm.xlu0 %6064, %v1296_v45  }
  0xa0   : > { %1537 = vperm.xlu1 %6065, %v1483_v46  }
  0xa1   : > { %1532 = vperm.xlu0 %6064, %v1482_v47  }
  0xa4   : > { %1547 = vperm.xlu1 %6065, %v1485_v48  }
  0xa5   : > { %1542 = vperm.xlu0 %6064, %v1484_v49  }
  0xa8   : > { %1557 = vperm.xlu1 %6065, %v1487_v50  }
  0xa9   : > { %1552 = vperm.xlu0 %6064, %v1486_v51  }
  0xac   : > { %1567 = vperm.xlu1 %6065, %v1489_v52  }
  0xad   : > { %1562 = vperm.xlu0 %6064, %v1488_v53  }
  0xcf   : > { %v1151_v60 = vpop.permute.xlu1 %1150  ;;  %v1141_v61 = vpop.permute.xlu0 %1140 }
  0xd0   : > { %v1218_v3 = vsub.f32 %v6760_v63, %v1141_v61  ;;  %v1219_v4 = vsub.f32 %v6757_v62, %v1141_v61  ;;  %v1222_v24 = vsub.f32 %v6760_v63, %v1151_v60  ;;  %v1223_v26 = vsub.f32 %v6757_v62, %v1151_v60 }
  0xd2   : > { %v1250_v10 = vmul.f32 %v1218_v3, %v1218_v3  ;;  %v1251_v11 = vmul.f32 %v1219_v4, %v1219_v4  ;;  %v1254_v33 = vmul.f32 %v1222_v24, %v1222_v24  ;;  %v1255_v34 = vmul.f32 %v1223_v26, %v1223_v26 }
  0xd3   : > { %v1156_v0 = vpop.permute.xlu1 %1155  ;;  %v1146_v1 = vpop.permute.xlu0 %1145 }
  0xd4   : > { %v1221_v2 = vsub.f32 %v6757_v62, %v1146_v1  ;;  %v1220_v7 = vsub.f32 %v6760_v63, %v1146_v1  ;;  %v1224_v20 = vsub.f32 %v6760_v63, %v1156_v0  ;;  %v1225_v22 = vsub.f32 %v6757_v62, %v1156_v0 }
  0xd6   : > { %v1253_v9 = vmul.f32 %v1221_v2, %v1221_v2  ;;  %v1252_v14 = vmul.f32 %v1220_v7, %v1220_v7  ;;  %v1256_v30 = vmul.f32 %v1224_v20, %v1224_v20  ;;  %v1257_v32 = vmul.f32 %v1225_v22, %v1225_v22 }
  0xd7   : > { %v1306_v5 = vpop.permute.xlu1 %1305  ;;  %v1301_v6 = vpop.permute.xlu0 %1300 }
  0xd8   : > { %v1381_v15 = vmul.f32 %v1306_v5, %v1253_v9  ;;  %v1378_v16 = vmul.f32 %v1301_v6, %v1250_v10  ;;  %v1379_v17 = vmul.f32 %v1301_v6, %v1251_v11  ;;  %v1380_v21 = vmul.f32 %v1306_v5, %v1252_v14 }
  0xda   : > { %v1416_v23 = vmul.f32 1.442695, %v1381_v15  ;;  %v1410_v25 = vmul.f32 1.442695, %v1378_v16  ;;  %v1412_v27 = vmul.f32 1.442695, %v1379_v17 }
  0xdb   : > { %v1166_v12 = vpop.permute.xlu1 %1165  ;;  %v1414_v31 = vmul.f32 1.442695, %v1380_v21 }
  0xdc   : > { %v1161_v13 = vpop.permute.xlu0 %1160  ;;  %6146 = vpow2.f32 %v1416_v23  ;;  %v1228_v43 = vsub.f32 %v6760_v63, %v1166_v12  ;;  %v1229_v45 = vsub.f32 %v6757_v62, %v1166_v12 }
  0xdd   : > { %6148 = vpow2.f32 %v1410_v25  ;;  %v1226_v47 = vsub.f32 %v6760_v63, %v1161_v13  ;;  %v1227_v50 = vsub.f32 %v6757_v62, %v1161_v13 }
  0xde   : > { %6150 = vpow2.f32 %v1412_v27  ;;  %v1260_v57 = vmul.f32 %v1228_v43, %v1228_v43  ;;  %v1261_v60 = vmul.f32 %v1229_v45, %v1229_v45 }
  0xdf   : > { %v1316_v18 = vpop.permute.xlu1 %1315  ;;  %6152 = vpow2.f32 %v1414_v31  ;;  %v1258_v0 = vmul.f32 %v1226_v47, %v1226_v47  ;;  %v1259_v1 = vmul.f32 %v1227_v50, %v1227_v50 }
  0xe0   : > { %v1311_v19 = vpop.permute.xlu0 %1310  ;;  %v1384_v37 = vmul.f32 %v1316_v18, %v1256_v30  ;;  %v1385_v38 = vmul.f32 %v1316_v18, %v1257_v32 }
  0xe1   : > { %v1382_v39 = vmul.f32 %v1311_v19, %v1254_v33  ;;  %v1383_v40 = vmul.f32 %v1311_v19, %v1255_v34 }
  0xe2   : > { %v1422_v44 = vmul.f32 1.442695, %v1384_v37  ;;  %v1424_v46 = vmul.f32 1.442695, %v1385_v38 }
  0xe3   : > { %v1176_v28 = vpop.permute.xlu1 %1175  ;;  %v1418_v48 = vmul.f32 1.442695, %v1382_v39  ;;  %v1420_v51 = vmul.f32 1.442695, %v1383_v40 }
  0xe4   : > { %v1171_v29 = vpop.permute.xlu0 %1170  ;;  %6154 = vpow2.f32 %v1422_v44  ;;  %v1232_v9 = vsub.f32 %v6760_v63, %v1176_v28  ;;  %v1233_v14 = vsub.f32 %v6757_v62, %v1176_v28 }
  0xe5   : > { %6156 = vpow2.f32 %v1424_v46  ;;  %v1230_v15 = vsub.f32 %v6760_v63, %v1171_v29  ;;  %v1231_v20 = vsub.f32 %v6757_v62, %v1171_v29 }
  0xe6   : > { %v6147_v49 = vpop.eup %6146  ;;  %6158 = vpow2.f32 %v1418_v48  ;;  %v1264_v22 = vmul.f32 %v1232_v9, %v1232_v9  ;;  %v1265_v30 = vmul.f32 %v1233_v14, %v1233_v14 }
  0xe7   : > { %v1326_v35 = vpop.permute.xlu1 %1325  ;;  %v6149_v55 = vpop.eup %6148  ;;  %6160 = vpow2.f32 %v1420_v51  ;;  %v1262_v28 = vmul.f32 %v1230_v15, %v1230_v15 }
  0xe8   : > { %v1321_v36 = vpop.permute.xlu0 %1320  ;;  %v6151_v59 = vpop.eup %6150  ;;  %v1388_v4 = vmul.f32 %v1326_v35, %v1260_v57  ;;  %v1389_v10 = vmul.f32 %v1326_v35, %v1261_v60 }
  0xe9   : > { %v6153_v61 = vpop.eup %6152  ;;  %v1386_v12 = vmul.f32 %v1321_v36, %v1258_v0  ;;  %v1387_v16 = vmul.f32 %v1321_v36, %v1259_v1  ;;  %v1263_v36 = vmul.f32 %v1231_v20, %v1231_v20 }
  0xea   : > { %v1430_v21 = vmul.f32 1.442695, %v1388_v4  ;;  %v1432_v23 = vmul.f32 1.442695, %v1389_v10 }
  0xeb   : > { %v1186_v41 = vpop.permute.xlu1 %1185  ;;  %v1426_v25 = vmul.f32 1.442695, %v1386_v12  ;;  %v1428_v31 = vmul.f32 1.442695, %v1387_v16 }
  0xec   : > { %v6770_v42 = vpop.permute.xlu0 %1180  ;;  %v1236_v26 = vsub.f32 %v6760_v63, %v1186_v41  ;;  %v1237_v32 = vsub.f32 %v6757_v62, %v1186_v41  ;;  %6162 = vpow2.f32 %v1430_v21 }
  0xed   : > { %6164 = vpow2.f32 %v1432_v23  ;;  %v1234_v37 = vsub.f32 %v6760_v63, %v6770_v42  ;;  %v1235_v40 = vsub.f32 %v6757_v62, %v6770_v42 }
  0xee   : > { %v6155_v24 = vpop.eup %6154  ;;  %6166 = vpow2.f32 %v1426_v25  ;;  %v1268_v39 = vmul.f32 %v1236_v26, %v1236_v26  ;;  %v1269_v43 = vmul.f32 %v1237_v32, %v1237_v32 }
  0xef   : > { %v1336_v52 = vpop.permute.xlu1 %1335  ;;  %v6157_v27 = vpop.eup %6156  ;;  %6168 = vpow2.f32 %v1428_v31  ;;  %v1266_v51 = vmul.f32 %v1234_v37, %v1234_v37  ;;  %v1267_v60 = vmul.f32 %v1235_v40, %v1235_v40 }
  0xf0   : > { %v1331_v53 = vpop.permute.xlu0 %1330  ;;  %v6159_v35 = vpop.eup %6158  ;;  %v1392_v38 = vmul.f32 %v1336_v52, %v1264_v22  ;;  %v1393_v44 = vmul.f32 %v1336_v52, %v1265_v30 }
  0xf1   : > { %v6161_v29 = vpop.eup %6160  ;;  %v1390_v41 = vmul.f32 %v1331_v53, %v1262_v28  ;;  %v1391_v47 = vmul.f32 %v1331_v53, %v1263_v36 }
  0xf2   : > { %v1440_v1 = vmul.f32 1.442695, %v1393_v44 }
  0xf3   : > { %v1498_v2 = vpop.permute.xlu1 %1497  ;;  %v1434_v53 = vmul.f32 1.442695, %v1390_v41 }
  0xf4   : > { %v1493_v3 = vpop.permute.xlu0 %1492  ;;  %v1573_v6 = vmul.f32 %v6147_v49, %v1498_v2  ;;  %v1572_v11 = vmul.f32 %v6153_v61, %v1498_v2 }
  0xf5   : > { %v1571_v5 = vmul.f32 %v6151_v59, %v1493_v3  ;;  %v1570_v7 = vmul.f32 %v6149_v55, %v1493_v3  ;;  %v1438_v55 = vmul.f32 1.442695, %v1392_v38 }
  0xf6   : > { %v6163_v10 = vpop.eup %6162 }
  0xf7   : > { %v5753_v13 = vpack.c.bf16 %v1573_v6, %v1571_v5  ;;  %v1196_v17 = vpop.permute.xlu1 %1195  ;;  %v5755_v19 = vpack.c.bf16 %v1572_v11, %v1570_v7  ;;  %v1436_v5 = vmul.f32 1.442695, %v1391_v47  ;;  %6170 = vpow2.f32 %v1438_v55  ;;  %v6165_v15 = vpop.eup %6164 }
  0xf8   : > { %v1191_v18 = vpop.permute.xlu0 %1190  ;;  %v1240_v57 = vsub.f32 %v6760_v63, %v1196_v17  ;;  %v1241_v61 = vsub.f32 %v6757_v62, %v1196_v17  ;;  %6172 = vpow2.f32 %v1440_v1  ;;  %v6167_v20 = vpop.eup %6166 }
  0xf9   : > { %5754 = vmatprep.subr.bf16.mxu1 %v5753_v13  ;;  %v1238_v52 = vsub.f32 %v6760_v63, %v1191_v18  ;;  %v1239_v7 = vsub.f32 %v6757_v62, %v1191_v18  ;;  %6174 = vpow2.f32 %v1434_v53  ;;  %v6169_v21 = vpop.eup %6168 }
  0xfa   : > { %5756 = vmatpush1.bf16.msra.mxu1 %v5755_v19  ;;  %v1272_v6 = vmul.f32 %v1240_v57, %v1240_v57  ;;  %v1273_v11 = vmul.f32 %v1241_v61, %v1241_v61  ;;  %6176 = vpow2.f32 %v1436_v5 }
  0xfb   : > { %v1346_v33 = vpop.permute.xlu1 %1345  ;;  %v1270_v16 = vmul.f32 %v1238_v52, %v1238_v52  ;;  %v1271_v22 = vmul.f32 %v1239_v7, %v1239_v7 }
  0xfc   : > { %v1341_v34 = vpop.permute.xlu0 %1340  ;;  %v1396_v0 = vmul.f32 %v1346_v33, %v1268_v39  ;;  %v1397_v9 = vmul.f32 %v1346_v33, %v1269_v43 }
  0xfd   : > { %v1394_v13 = vmul.f32 %v1341_v34, %v1266_v51  ;;  %v1395_v14 = vmul.f32 %v1341_v34, %v1267_v60 }
  0xfe   : > { %v1446_v12 = vmul.f32 1.442695, %v1396_v0  ;;  %v1448_v23 = vmul.f32 1.442695, %v1397_v9 }
  0xff   : > { %v1508_v45 = vpop.permute.xlu1 %1507  ;;  %v1444_v25 = vmul.f32 1.442695, %v1395_v14 }
 0x100   : > { %v1503_v46 = vpop.permute.xlu0 %1502  ;;  %v1576_v48 = vmul.f32 %v6155_v24, %v1508_v45  ;;  %v1577_v49 = vmul.f32 %v6157_v27, %v1508_v45  ;;  %6178 = vpow2.f32 %v1446_v12  ;;  %v1442_v24 = vmul.f32 1.442695, %v1394_v13 }
 0x101   : > { %v1574_v50 = vmul.f32 %v6159_v35, %v1503_v46  ;;  %v1575_v59 = vmul.f32 %v6161_v29, %v1503_v46  ;;  %6180 = vpow2.f32 %v1448_v23  ;;  %v6171_v44 = vpop.eup %6170 }
 0x102   : > { %6182 = vpow2.f32 %v1442_v24  ;;  %v6173_v55 = vpop.eup %6172 }
 0x103   : > { %v5759_v42 = vpack.c.bf16 %v1576_v48, %v1574_v50  ;;  %v1206_v2 = vpop.permute.xlu1 %1205  ;;  %v5757_v4 = vpack.c.bf16 %v1577_v49, %v1575_v59  ;;  %6184 = vpow2.f32 %v1444_v25  ;;  %v6175_v59 = vpop.eup %6174 }
 0x104   : > { %v1201_v3 = vpop.permute.xlu0 %1200  ;;  %v1244_v27 = vsub.f32 %v6760_v63, %v1206_v2  ;;  %v1245_v30 = vsub.f32 %v6757_v62, %v1206_v2  ;;  %v6177_v61 = vpop.eup %6176 }
 0x105   : > { %5758 = vmatprep.subr.bf16.mxu1 %v5757_v4  ;;  %v1242_v28 = vsub.f32 %v6760_v63, %v1201_v3  ;;  %v1243_v34 = vsub.f32 %v6757_v62, %v1201_v3 }
 0x106   : > { %5760 = vmatpush1.bf16.msra.mxu1 %v5759_v42  ;;  %v1276_v48 = vmul.f32 %v1244_v27, %v1244_v27  ;;  %v1277_v49 = vmul.f32 %v1245_v30, %v1245_v30 }
 0x107   : > { %v1356_v17 = vpop.permute.xlu1 %1355  ;;  %v1274_v50 = vmul.f32 %v1242_v28, %v1242_v28  ;;  %v1275_v51 = vmul.f32 %v1243_v34, %v1243_v34 }
 0x108   : > { %v1351_v19 = vpop.permute.xlu0 %1350  ;;  %v1400_v18 = vmul.f32 %v1356_v17, %v1272_v6  ;;  %v1401_v26 = vmul.f32 %v1356_v17, %v1273_v11 }
 0x109   : > { %v1398_v31 = vmul.f32 %v1351_v19, %v1270_v16  ;;  %v1399_v38 = vmul.f32 %v1351_v19, %v1271_v22 }
 0x10a   : > { %v1454_v37 = vmul.f32 1.442695, %v1400_v18  ;;  %v1456_v40 = vmul.f32 1.442695, %v1401_v26  ;;  %v6179_v3 = vpop.eup %6178 }
 0x10b   : > { %v1518_v32 = vpop.permute.xlu1 %1517  ;;  %v1450_v41 = vmul.f32 1.442695, %v1398_v31  ;;  %v1452_v57 = vmul.f32 1.442695, %v1399_v38  ;;  %v6181_v12 = vpop.eup %6180 }
 0x10c   : > { %v1513_v33 = vpop.permute.xlu0 %1512  ;;  %v1580_v35 = vmul.f32 %v6163_v10, %v1518_v32  ;;  %v1581_v36 = vmul.f32 %v6165_v15, %v1518_v32  ;;  %6186 = vpow2.f32 %v1454_v37 }
 0x10d   : > { %v1578_v29 = vmul.f32 %v6167_v20, %v1513_v33  ;;  %v1579_v39 = vmul.f32 %v6169_v21, %v1513_v33  ;;  %6188 = vpow2.f32 %v1456_v40 }
 0x10e   : > { %6190 = vpow2.f32 %v1450_v41 }
 0x10f   : > { %v5763_v43 = vpack.c.bf16 %v1580_v35, %v1578_v29  ;;  %v1216_v45 = vpop.permute.xlu1 %1215  ;;  %v5761_v47 = vpack.c.bf16 %v1581_v36, %v1579_v39  ;;  %6192 = vpow2.f32 %v1452_v57 }
 0x110   : > { %v1211_v46 = vpop.permute.xlu0 %1210  ;;  %v1248_v60 = vsub.f32 %v6760_v63, %v1216_v45  ;;  %v1249_v0 = vsub.f32 %v6757_v62, %v1216_v45 }
 0x111   : > { %5762 = vmatprep.subr.bf16.mxu1 %v5761_v47  ;;  %v1246_v42 = vsub.f32 %v6760_v63, %v1211_v46  ;;  %v1247_v1 = vsub.f32 %v6757_v62, %v1211_v46  ;;  %v6183_v62 = vpop.eup %6182 }
 0x112   : > { %5764 = vmatpush1.bf16.msra.mxu1 %v5763_v43  ;;  %v1280_v7 = vmul.f32 %v1248_v60, %v1248_v60  ;;  %v1281_v13 = vmul.f32 %v1249_v0, %v1249_v0  ;;  %v6185_v22 = vpop.eup %6184 }
 0x113   : > { %v1366_v52 = vpop.permute.xlu1 %1365  ;;  %v1278_v14 = vmul.f32 %v1246_v42, %v1246_v42  ;;  %v1279_v15 = vmul.f32 %v1247_v1, %v1247_v1 }
 0x114   : > { %v1361_v2 = vpop.permute.xlu0 %1360  ;;  %v1404_v4 = vmul.f32 %v1366_v52, %v1276_v48  ;;  %v1405_v53 = vmul.f32 %v1366_v52, %v1277_v49 }
 0x115   : > { %v1402_v5 = vmul.f32 %v1361_v2, %v1274_v50  ;;  %v1403_v6 = vmul.f32 %v1361_v2, %v1275_v51 }
 0x116   : > { %v1462_v9 = vmul.f32 1.442695, %v1404_v4  ;;  %v1464_v10 = vmul.f32 1.442695, %v1405_v53  ;;  %v6187_v24 = vpop.eup %6186 }
 0x117   : > { %v1458_v11 = vmul.f32 1.442695, %v1402_v5  ;;  %v1460_v16 = vmul.f32 1.442695, %v1403_v6  ;;  %v1528_v63 = vpop.permute.xlu1 %1527  ;;  %v6189_v30 = vpop.eup %6188  ;;  %v5285_v6 = vld [vmem:[%s6516_s25] ss:$0 sm:$0xff] }
 0x118   : > { %v1523_v17 = vpop.permute.xlu0 %1522  ;;  %6194 = vpow2.f32 %v1462_v9  ;;  %v1584_v19 = vmul.f32 %v6171_v44, %v1528_v63  ;;  %v1585_v20 = vmul.f32 %v6173_v55, %v1528_v63  ;;  %v6191_v34 = vpop.eup %6190 }
 0x119   : > { %v1582_v21 = vmul.f32 %v6175_v59, %v1523_v17  ;;  %6196 = vpow2.f32 %v1464_v10  ;;  %v1583_v23 = vmul.f32 %v6177_v61, %v1523_v17  ;;  %v6193_v37 = vpop.eup %6192 }
 0x11a   : > { %6198 = vpow2.f32 %v1458_v11 }
 0x11b   : > { %v5767_v18 = vpack.c.bf16 %v1584_v19, %v1582_v21  ;;  %6200 = vpow2.f32 %v1460_v16  ;;  %v1376_v25 = vpop.permute.xlu1 %1375  ;;  %v5765_v27 = vpack.c.bf16 %v1585_v20, %v1583_v23 }
 0x11c   : > { %v1371_v26 = vpop.permute.xlu0 %1370  ;;  %v1408_v28 = vmul.f32 %v1376_v25, %v1280_v7  ;;  %v1409_v31 = vmul.f32 %v1376_v25, %v1281_v13 }
 0x11d   : > { %v1406_v32 = vmul.f32 %v1371_v26, %v1278_v14  ;;  %v1407_v33 = vmul.f32 %v1371_v26, %v1279_v15  ;;  %5766 = vmatprep.subr.bf16.mxu1 %v5765_v27  ;;  %v1602_v26 = vld [vmem:[%s7757_s24] sm:$0xff]  ;;  %v1603_v27 = vld [vmem:[%s7757_s24 + $0x8] sm:$0xff] }
 0x11e   : > { %v1470_v35 = vmul.f32 1.442695, %v1408_v28  ;;  %v1472_v36 = vmul.f32 1.442695, %v1409_v31  ;;  %5768 = vmatpush1.bf16.msra.mxu1 %v5767_v18  ;;  %v1618_v31 = vld [vmem:[%s6551_s30] sm:$0xff] }
 0x11f   : > { %v1466_v29 = vmul.f32 1.442695, %v1406_v32  ;;  %v1468_v38 = vmul.f32 1.442695, %v1407_v33  ;;  %v1538_v39 = vpop.permute.xlu1 %1537  ;;  %v1604_v32 = vld [vmem:[%s7757_s24 + $0x10] sm:$0xff]  ;;  %v1605_v33 = vld [vmem:[%s7757_s24 + $0x18] sm:$0xff] }
 0x120   : > { %v1533_v40 = vpop.permute.xlu0 %1532  ;;  %6202 = vpow2.f32 %v1470_v35  ;;  %v1588_v43 = vmul.f32 %v6179_v3, %v1538_v39  ;;  %v1589_v44 = vmul.f32 %v6181_v12, %v1538_v39  ;;  %v1607_v35 = vld [vmem:[%s7757_s24 + $0x28] sm:$0xff]  ;;  %v1612_v39 = vld [vmem:[%s7757_s24 + $0x50] sm:$0xff] }
 0x121   : > { %v1586_v41 = vmul.f32 %v6183_v62, %v1533_v40  ;;  %6204 = vpow2.f32 %v1472_v36  ;;  %v1587_v45 = vmul.f32 %v6185_v22, %v1533_v40  ;;  %v1608_v36 = vld [vmem:[%s7757_s24 + $0x30] sm:$0xff]  ;;  %v1613_v40 = vld [vmem:[%s7757_s24 + $0x58] sm:$0xff] }
 0x122   : > { %v6195_v46 = vpop.eup %6194  ;;  %6206 = vpow2.f32 %v1466_v29  ;;  %v1609_v29 = vld [vmem:[%s7757_s24 + $0x38] sm:$0xff] }
 0x123   : > { %v5771_v47 = vpack.c.bf16 %v1588_v43, %v1586_v41  ;;  %v6197_v48 = vpop.eup %6196  ;;  %6208 = vpow2.f32 %v1468_v38  ;;  %v1548_v49 = vpop.permute.xlu1 %1547  ;;  %v5769_v51 = vpack.c.bf16 %v1589_v44, %v1587_v45  ;;  %v1611_v38 = vld [vmem:[%s7757_s24 + $0x48] sm:$0xff]  ;;  %v1614_v43 = vld [vmem:[%s7757_s24 + $0x60] sm:$0xff] }
 0x124   : > { %v1543_v50 = vpop.permute.xlu0 %1542  ;;  %v6199_v55 = vpop.eup %6198  ;;  %v1592_v57 = vmul.f32 %v6187_v24, %v1548_v49  ;;  %v1593_v59 = vmul.f32 %v6189_v30, %v1548_v49  ;;  %v1094_v30 = vld [vmem:[%s6811_s16] sm:$0xff]  ;;  %v1615_v44 = vld [vmem:[%s7757_s24 + $0x68] sm:$0xff] }
 0x125   : > { %v1590_v60 = vmul.f32 %v6191_v34, %v1543_v50  ;;  %v1591_v61 = vmul.f32 %v6193_v37, %v1543_v50  ;;  %v6201_v0 = vpop.eup %6200  ;;  %5770 = vmatprep.subr.bf16.mxu1 %v5769_v51  ;;  %v1096_v28 = vsub.f32 1.0, %v1094_v30  ;;  %v1606_v34 = vld [vmem:[%s7757_s24 + $0x20] sm:$0xff] }
 0x126   : > { %5772 = vmatpush1.bf16.msra.mxu1 %v5771_v47  ;;  %v1610_v37 = vld [vmem:[%s7757_s24 + $0x40] sm:$0xff]  ;;  %v1616_v47 = vld [vmem:[%s7757_s24 + $0x70] sm:$0xff] }
 0x127   : > { %v5773_v42 = vpack.c.bf16 %v1593_v59, %v1591_v61  ;;  %v5775_v1 = vpack.c.bf16 %v1592_v57, %v1590_v60  ;;  %v1558_v52 = vpop.permute.xlu1 %1557  ;;  %v1095_v61 = vld [vmem:[%s6811_s16 + $0x8] sm:$0xff]  ;;  %s7773_s16 = sld [smem:[#allocation19_spill]] }
 0x128   : > { %v1553_v2 = vpop.permute.xlu0 %1552  ;;  %v1596_v3 = vmul.f32 %v6195_v46, %v1558_v52  ;;  %v1597_v4 = vmul.f32 %v6197_v48, %v1558_v52 }
 0x129   : > { %v1594_v53 = vmul.f32 %v6199_v55, %v1553_v2  ;;  %v1595_v5 = vmul.f32 %v6201_v0, %v1553_v2  ;;  %5774 = vmatprep.subr.bf16.mxu1 %v5773_v42  ;;  %v1617_v55 = vld [vmem:[%s7757_s24 + $0x78] sm:$0xff]  ;;  %v1097_v0 = vsub.f32 1.0, %v1095_v61  ;;  %v1619_v42 = vld [vmem:[%s6551_s30 + $0x8] sm:$0xff]  ;;  %s7790_s24 = sld [smem:[#allocation27_spill]] }
 0x12a   : > { %v6203_v7 = vpop.eup %6202  ;;  %5776 = vmatpush1.bf16.msra.mxu1 %v5775_v1 }
 0x12b   : > { %v5777_v10 = vpack.c.bf16 %v1597_v4, %v1595_v5  ;;  %v5779_v11 = vpack.c.bf16 %v1596_v3, %v1594_v53  ;;  %v6205_v12 = vpop.eup %6204  ;;  %v1568_v15 = vpop.permute.xlu1 %1567 }
 0x12c   : > { %v6207_v16 = vpop.eup %6206  ;;  %v1600_v17 = vmul.f32 %v6203_v7, %v1568_v15  ;;  %v1601_v62 = vmul.f32 %v6205_v12, %v1568_v15  ;;  %v1563_v19 = vpop.permute.xlu0 %1562 }
 0x12d   : > { %5778 = vmatprep.subr.bf16.mxu1 %v5777_v10  ;;  %v6209_v20 = vpop.eup %6208  ;;  %v1598_v21 = vmul.f32 %v6207_v16, %v1563_v19 }
 0x12e   : > { %v1599_v23 = vmul.f32 %v6209_v20, %v1563_v19  ;;  %5780 = vmatpush1.bf16.msra.mxu1 %v5779_v11  ;;  %v5290_v19 = vld [vmem:[%s7768_s3] ss:$0 sm:$0xff]  ;;  %s7774_s3 = sld [smem:[#allocation21_spill]] }
 0x12f   : > { %v5536_v9 = vpop.f32.mrb[0].mxu0  ;;  %v5783_v24 = vpack.c.bf16 %v1600_v17, %v1598_v21 }
 0x130   : > { %v6799_v13 = vadd.f32 %v5536_v9, %v5285_v6  ;;  %v1039_v14 = vpop.f32.mrb[1].mxu0  ;;  %v5781_v25 = vpack.c.bf16 %v1601_v62, %v1599_v23 }
 0x131   : > { %v6801_v63 = vadd.f32 %v5285_v6, %v1039_v14 }
 0x132   : > { %v1054_v22 = vsel %vm1050_vm3, %v6799_v13, 0.0  ;;  %5782 = vmatprep.subr.bf16.mxu1 %v5781_v25 }
 0x133   : > { %1055 = vadd.xlane.f32.xlu1 %v1054_v22  ;;  %v1051_v18 = vsel %vm1050_vm3, %v6801_v63, 0.0  ;;  %5784 = vmatpush1.bf16.msra.mxu1 %v5783_v24 }
 0x134   : > { %1052 = vadd.xlane.f32.xlu0 %v1051_v18 }
 0x136   : > { %1779 = vmatmul.mubr.f32.vlgmr.msra.gmra.mrb[0].mxu1 %v1602_v26 }
 0x137   : > { %1784 = vmatprep.mubr.f32.mxu1 %v6464_v54 }
 0x13a   : > { %1785 = vmatmul.mubr.f32.gmra.mrb[2].mxu1 %v1603_v27 }
 0x13b   : > { %1790 = vmatprep.mubr.f32.mxu1 %v6464_v54 }
 0x13e   : > { %1791 = vmatmul.mubr.f32.gmra.mrb[4].mxu1 %v1604_v32 }
 0x13f   : > { %1796 = vmatprep.mubr.f32.mxu1 %v6464_v54 }
 0x142   : > { %1797 = vmatmul.mubr.f32.gmra.mrb[6].mxu1 %v1605_v33 }
 0x143   : > { %1802 = vmatprep.mubr.f32.mxu1 %v6464_v54 }
 0x144   : > { %1100 = vperm.xlu1 %6065, %v1096_v28  }
 0x146   : > { %1803 = vmatmul.mubr.f32.gmra.mrb[8].mxu1 %v1606_v34 }
 0x147   : > { %1808 = vmatprep.mubr.f32.mxu1 %v6464_v54 }
 0x148   : > { %1636 = vperm.xlu1 %6065, %v1618_v31  }
 0x14a   : > { %1809 = vmatmul.mubr.f32.gmra.mrb[10].mxu1 %v1607_v35 }
 0x14b   : > { %1814 = vmatprep.mubr.f32.mxu1 %v6464_v54 }
 0x14e   : > { %1815 = vmatmul.mubr.f32.gmra.mrb[12].mxu1 %v1608_v36 }
 0x14f   : > { %1820 = vmatprep.mubr.f32.mxu1 %v6464_v54 }
 0x152   : > { %1821 = vmatmul.mubr.f32.gmra.mrb[14].mxu1 %v1609_v29 }
 0x153   : > { %1826 = vmatprep.mubr.f32.mxu1 %v6464_v54 }
 0x156   : > { %1827 = vmatmul.mubr.f32.gmra.mrb[16].mxu1 %v1610_v37 }
 0x157   : > { %1832 = vmatprep.mubr.f32.mxu1 %v6464_v54 }
 0x15a   : > { %1833 = vmatmul.mubr.f32.gmra.mrb[18].mxu1 %v1611_v38 }
 0x15b   : > { %1838 = vmatprep.mubr.f32.mxu1 %v6464_v54 }
 0x15e   : > { %1839 = vmatmul.mubr.f32.gmra.mrb[20].mxu1 %v1612_v39 }
 0x15f   : > { %1844 = vmatprep.mubr.f32.mxu1 %v6464_v54 }
 0x162   : > { %1845 = vmatmul.mubr.f32.gmra.mrb[22].mxu1 %v1613_v40 }
 0x163   : > { %1850 = vmatprep.mubr.f32.mxu1 %v6464_v54 }
 0x166   : > { %1851 = vmatmul.mubr.f32.gmra.mrb[24].mxu1 %v1614_v43 }
 0x167   : > { %1856 = vmatprep.mubr.f32.mxu1 %v6464_v54 }
 0x16a   : > { %1857 = vmatmul.mubr.f32.gmra.mrb[26].mxu1 %v1615_v44 }
 0x16b   : > { %1862 = vmatprep.mubr.f32.mxu1 %v6464_v54 }
 0x16e   : > { %1863 = vmatmul.mubr.f32.gmra.mrb[28].mxu1 %v1616_v47 }
 0x16f   : > { %1868 = vmatprep.mubr.f32.mxu1 %v6464_v54 }
 0x172   : > { %1869 = vmatmul.mubr.f32.gmra.mrb[30].mxu1 %v1617_v55 }
 0x1c0   : > { %v1056_v41 = vpop.xlane.xlu1 %1055 }
 0x1c1   : > { %v1059_v45 = vmul.f32 0.03125, %v1056_v41  ;;  %v1053_v46 = vpop.xlane.xlu0 %1052 }
 0x1c2   : > { %v1058_v48 = vmul.f32 0.03125, %v1053_v46 }
 0x1c3   : > { %v1061_v49 = vsub.f32 %v6799_v13, %v1059_v45 }
 0x1c4   : > { %v1060_v50 = vsub.f32 %v6801_v63, %v1058_v48  ;;  %v1101_v53 = vpop.permute.xlu1 %1100  ;;  %v5289_v63 = vld [vmem:[%s6521_s29] ss:$0 sm:$0xff] }
 0x1c5   : > { %v1063_v51 = vmul.f32 %v1061_v49, %v1061_v49 }
 0x1c6   : > { %v1062_v59 = vmul.f32 %v1060_v50, %v1060_v50 }
 0x1c7   : > { %v1067_v57 = vsel %vm1050_vm3, %v1063_v51, 0.0 }
 0x1c8   : > { %1068 = vadd.xlane.f32.xlu0 %v1067_v57  ;;  %v1064_v60 = vsel %vm1050_vm3, %v1062_v59, 0.0  ;;  %v1637_v10 = vpop.permute.xlu1 %1636  ;;  %v1620_v59 = vld [vmem:[%s6551_s30 + $0x10] sm:$0xff] }
 0x1cc   : > { %1065 = vadd.xlane.f32.xlu0 %v1064_v60  ;;  %v1622_v60 = vld [vmem:[%s6551_s30 + $0x20] sm:$0xff] }
 0x1e2   : > { %1105 = vperm.xlu0 %6064, %v1097_v0  }
 0x1e6   : > { %1641 = vperm.xlu0 %6064, %v1619_v42  }
 0x209   : > { %v1780_v1 = vpop.f32.mrb[0].mxu1 }
 0x20a   : > { %v1782_v52 = vpop.f32.mrb[1].mxu1  ;;  %v1781_v11 = vadd.f32 %v1780_v1, %v1637_v10  ;;  %v1621_v1 = vld [vmem:[%s6551_s30 + $0x18] sm:$0xff] }
 0x20b   : > { %v1783_v12 = vadd.f32 %v1782_v52, %v1637_v10 }
 0x20c   : > { %v1907_v14 = vmul.f32 0.70710677, %v1781_v11  ;;  %v1875_v39 = vmul.f32 0.5, %v1781_v11  ;;  %v1628_v11 = vld [vmem:[%s6551_s30 + $0x50] sm:$0xff] }
 0x20d   : > { %v1786_v2 = vpop.f32.mrb[2].mxu1  ;;  %v1908_v15 = vmul.f32 0.70710677, %v1783_v12  ;;  %v1876_v44 = vmul.f32 0.5, %v1783_v12 }
 0x20e   : > { %v1788_v3 = vpop.f32.mrb[3].mxu1 }
 0x211   : > { %v6861_v55 = vpop.f32.mrb[4].mxu1 }
 0x212   : > { %v6863_v57 = vpop.f32.mrb[5].mxu1 }
 0x215   : > { %v6867_v61 = vpop.f32.mrb[6].mxu1 }
 0x216   : > { %v6869_v0 = vpop.f32.mrb[7].mxu1 }
 0x219   : > { %v1804_v42 = vpop.f32.mrb[8].mxu1 }
 0x21a   : > { %v1806_v52 = vpop.f32.mrb[9].mxu1 }
 0x255   : > { %v1069_v4 = vpop.xlane.xlu0 %1068 }
 0x256   : > { %v1071_v54 = vmul.f32 0.03125, %v1069_v4  ;;  %v1623_v4 = vld [vmem:[%s6551_s30 + $0x28] sm:$0xff] }
 0x258   : > { %v1073_v5 = vadd.f32 1e-05, %v1071_v54 }
 0x259   : > { %v1066_v6 = vpop.xlane.xlu0 %1065 }
 0x25a   : > { %6210 = vrsqrt.f32 %v1073_v5  ;;  %v1070_v7 = vmul.f32 0.03125, %v1066_v6 }
 0x25c   : > { %v1072_v9 = vadd.f32 1e-05, %v1070_v7 }
 0x25e   : > { %6212 = vrsqrt.f32 %v1072_v9  ;;  %v1625_v9 = vld [vmem:[%s6551_s30 + $0x38] sm:$0xff] }
 0x25f   : > { %6214 = verf.f32 %v1907_v14 }
 0x260   : > { %6216 = verf.f32 %v1908_v15  ;;  %v1627_v15 = vld [vmem:[%s6551_s30 + $0x48] sm:$0xff] }
 0x261   : > { %v1106_v13 = vpop.permute.xlu0 %1105 }
 0x264   : > { %v6211_v16 = vpop.eup %6210 }
 0x265   : > { %v1077_v17 = vmul.f32 %v6211_v16, %v1061_v49  ;;  %v1642_v62 = vpop.permute.xlu0 %1641 }
 0x266   : > { %v1787_v20 = vadd.f32 %v1786_v2, %v1642_v62  ;;  %v1789_v21 = vadd.f32 %v1788_v3, %v1642_v62  ;;  %v1624_v2 = vld [vmem:[%s6551_s30 + $0x30] sm:$0xff]  ;;  %v6873_v3 = vpop.f32.mrb[10].mxu1 }
 0x267   : > { %v1085_v22 = vmul.f32 %v5289_v63, %v1077_v17  ;;  %v6876_v54 = vpop.f32.mrb[11].mxu1 }
 0x268   : > { %v6213_v23 = vpop.eup %6212  ;;  %v1909_v18 = vmul.f32 0.70710677, %v1787_v20  ;;  %v1910_v24 = vmul.f32 0.70710677, %v1789_v21  ;;  %v1877_v40 = vmul.f32 0.5, %v1787_v20  ;;  %v1878_v41 = vmul.f32 0.5, %v1789_v21 }
 0x269   : > { %v1076_v25 = vmul.f32 %v6213_v23, %v1060_v50  ;;  %v1093_v26 = vadd.f32 %v5290_v19, %v1085_v22  ;;  %v6215_v33 = vpop.eup %6214  ;;  %v6879_v5 = vpop.f32.mrb[12].mxu1  ;;  %v1632_v20 = vld [vmem:[%s6551_s30 + $0x70] sm:$0xff] }
 0x26a   : > { %6218 = verf.f32 %v1909_v18  ;;  %v6217_v34 = vpop.eup %6216  ;;  %v1971_v36 = vadd.f32 1.0, %v6215_v33  ;;  %v6881_v6 = vpop.f32.mrb[13].mxu1  ;;  %v1631_v18 = vld [vmem:[%s6551_s30 + $0x68] sm:$0xff] }
 0x26b   : > { %v1084_v27 = vmul.f32 %v5289_v63, %v1076_v25  ;;  %v6853_v30 = vmul.f32 %v1106_v13, %v1093_v26  ;;  %6220 = verf.f32 %v1910_v24  ;;  %v1972_v37 = vadd.f32 1.0, %v6217_v34  ;;  %v6883_v7 = vpop.f32.mrb[14].mxu1  ;;  %v1630_v63 = vld [vmem:[%s6551_s30 + $0x60] sm:$0xff] }
 0x26c   : > { %v2003_v46 = vmul.f32 %v1971_v36, %v1875_v39  ;;  %v6886_v10 = vpop.f32.mrb[15].mxu1 }
 0x26d   : > { %v1092_v28 = vadd.f32 %v5290_v19, %v1084_v27  ;;  %v2468_v31 = vsel %vm1050_vm3, %v6853_v30, 0.0  ;;  %v2004_v48 = vmul.f32 %v1972_v37, %v1876_v44  ;;  %v6889_v12 = vpop.f32.mrb[16].mxu1  ;;  %v1629_v19 = vld [vmem:[%s6551_s30 + $0x58] sm:$0xff] }
 0x26e   : > { %2469 = vadd.xlane.f32.xlu0 %v2468_v31  ;;  %v6891_v13 = vpop.f32.mrb[17].mxu1 }
 0x26f   : > { %v6857_v32 = vmul.f32 %v1101_v53, %v1092_v28  ;;  %v1626_v53 = vld [vmem:[%s6551_s30 + $0x40] sm:$0xff]  ;;  %v6893_v14 = vpop.f32.mrb[18].mxu1  ;;  %v1633_v28 = vld [vmem:[%s6551_s30 + $0x78] sm:$0xff] }
 0x270   : > { %v6896_v16 = vpop.f32.mrb[19].mxu1 }
 0x271   : > { %v2465_v35 = vsel %vm1050_vm3, %v6857_v32, 0.0  ;;  %v6899_v17 = vpop.f32.mrb[20].mxu1 }
 0x272   : > { %2466 = vadd.xlane.f32.xlu1 %v2465_v35  ;;  %v6901_v62 = vpop.f32.mrb[21].mxu1 }
 0x273   : > { %v6905_v21 = vpop.f32.mrb[22].mxu1 }
 0x274   : > { %v6219_v29 = vpop.eup %6218  ;;  %v6907_v22 = vpop.f32.mrb[23].mxu1 }
 0x275   : > { %v6221_v38 = vpop.eup %6220  ;;  %v1973_v43 = vadd.f32 1.0, %v6219_v29  ;;  %v6909_v23 = vpop.f32.mrb[24].mxu1 }
 0x276   : > { %v1974_v45 = vadd.f32 1.0, %v6221_v38  ;;  %v6912_v24 = vpop.f32.mrb[25].mxu1 }
 0x277   : > { %v2005_v47 = vmul.f32 %v1973_v43, %v1877_v40  ;;  %v6914_v25 = vpop.f32.mrb[26].mxu1 }
 0x278   : > { %v2006_v49 = vmul.f32 %v1974_v45, %v1878_v41  ;;  %v6916_v26 = vpop.f32.mrb[27].mxu1 }
 0x279   : > { %v5787_v50 = vpack.c.bf16 %v2005_v47, %v2003_v46  ;;  %v6918_v27 = vpop.f32.mrb[28].mxu1 }
 0x27a   : > { %v5785_v51 = vpack.c.bf16 %v2006_v49, %v2004_v48  ;;  %v6921_v31 = vpop.f32.mrb[29].mxu1 }
 0x27b   : > { %v6923_v33 = vpop.f32.mrb[30].mxu1 }
 0x27c   : > { %5786 = vmatprep.subr.bf16.mxu0 %v5785_v51  ;;  %v6925_v34 = vpop.f32.mrb[31].mxu1 }
 0x27d   : > { %5788 = vmatpush1.bf16.msra.mxu0 %v5787_v50 }
 0x283   : > { %1646 = vperm.xlu1 %6065, %v1620_v59  }
 0x284   : > { %1656 = vperm.xlu0 %6064, %v1622_v60  }
 0x287   : > { %1651 = vperm.xlu1 %6065, %v1621_v1  }
 0x288   : > { %1666 = vperm.xlu0 %6064, %v1624_v2  }
 0x28b   : > { %1661 = vperm.xlu1 %6065, %v1623_v4  }
 0x28c   : > { %1676 = vperm.xlu0 %6064, %v1626_v53  }
 0x28f   : > { %1671 = vperm.xlu1 %6065, %v1625_v9  }
 0x290   : > { %1686 = vperm.xlu0 %6064, %v1628_v11  }
 0x293   : > { %1681 = vperm.xlu1 %6065, %v1627_v15  }
 0x294   : > { %1696 = vperm.xlu0 %6064, %v1630_v63  }
 0x297   : > { %1691 = vperm.xlu1 %6065, %v1629_v19  }
 0x298   : > { %1706 = vperm.xlu0 %6064, %v1632_v20  }
 0x29b   : > { %1701 = vperm.xlu1 %6065, %v1631_v18  }
 0x29f   : > { %1711 = vperm.xlu1 %6065, %v1633_v28  }
 0x2fb   : > { %v2470_v35 = vpop.xlane.xlu0 %2469 }
 0x2fc   : > { %v2472_v36 = vmul.f32 0.03125, %v2470_v35 }
 0x2fe   : > { %v6928_v29 = vsub.f32 %v6853_v30, %v2472_v36 }
 0x2ff   : > { %v2467_v37 = vpop.xlane.xlu1 %2466 }
 0x300   : > { %v2471_v38 = vmul.f32 0.03125, %v2467_v37  ;;  %v2476_v39 = vmul.f32 %v6928_v29, %v6928_v29 }
 0x302   : > { %v6933_v40 = vsub.f32 %v6857_v32, %v2471_v38  ;;  %v2480_v43 = vsel %vm1050_vm3, %v2476_v39, 0.0 }
 0x303   : > { %v1647_v44 = vpop.permute.xlu1 %1646  ;;  %2481 = vadd.xlane.f32.xlu1 %v2480_v43  ;;  %v1657_v41 = vpop.permute.xlu0 %1656 }
 0x304   : > { %v1793_v45 = vadd.f32 %v6861_v55, %v1647_v44  ;;  %v1805_v46 = vadd.f32 %v1804_v42, %v1657_v41  ;;  %v1795_v47 = vadd.f32 %v6863_v57, %v1647_v44  ;;  %v2475_v48 = vmul.f32 %v6933_v40, %v6933_v40 }
 0x305   : > { %v1807_v50 = vadd.f32 %v1806_v52, %v1657_v41  ;;  %v2036_v41 = vld [vmem:[%s7769_s12] sm:$0xf]  ;;  %s7707_s12 = smov 48  }
 0x306   : > { %v1911_v49 = vmul.f32 0.70710677, %v1793_v45  ;;  %v1915_v51 = vmul.f32 0.70710677, %v1805_v46  ;;  %v2477_v2 = vsel %vm1050_vm3, %v2475_v48, 0.0  ;;  %v6945_v15 = vmul.f32 0.5, %v1793_v45 }
 0x307   : > { %v1652_v59 = vpop.permute.xlu1 %1651  ;;  %v1667_v60 = vpop.permute.xlu0 %1666  ;;  %v1912_v4 = vmul.f32 0.70710677, %v1795_v47  ;;  %2478 = vadd.xlane.f32.xlu0 %v2477_v2  ;;  %v1916_v53 = vmul.f32 0.70710677, %v1807_v50  ;;  %v6948_v19 = vmul.f32 0.5, %v1795_v47  ;;  %v6952_v18 = vmul.f32 0.5, %v1805_v46 }
 0x308   : > { %6222 = verf.f32 %v1911_v49  ;;  %v1799_v1 = vadd.f32 %v6867_v61, %v1652_v59  ;;  %v1817_v55 = vadd.f32 %v6879_v5, %v1667_v60  ;;  %v1801_v57 = vadd.f32 %v6869_v0, %v1652_v59 }
 0x309   : > { %6224 = verf.f32 %v1915_v51  ;;  %v1819_v9 = vadd.f32 %v6881_v6, %v1667_v60  ;;  %v6954_v28 = vmul.f32 0.5, %v1807_v50 }
 0x30a   : > { %v1913_v42 = vmul.f32 0.70710677, %v1799_v1  ;;  %v1919_v63 = vmul.f32 0.70710677, %v1817_v55  ;;  %6226 = verf.f32 %v1912_v4  ;;  %v1914_v0 = vmul.f32 0.70710677, %v1801_v57 }
 0x30b   : > { %v1662_v52 = vpop.permute.xlu1 %1661  ;;  %v1677_v11 = vpop.permute.xlu0 %1676  ;;  %v1920_v35 = vmul.f32 0.70710677, %v1819_v9  ;;  %v6957_v38 = vmul.f32 0.5, %v1799_v1  ;;  %v6959_v39 = vmul.f32 0.5, %v1801_v57  ;;  %v6964_v46 = vmul.f32 0.5, %v1817_v55 }
 0x30c   : > { %v1811_v61 = vadd.f32 %v6873_v3, %v1662_v52  ;;  %v1813_v20 = vadd.f32 %v6876_v54, %v1662_v52  ;;  %v1829_v5 = vadd.f32 %v6889_v12, %v1677_v11  ;;  %6228 = verf.f32 %v1913_v42 }
 0x30d   : > { %6230 = verf.f32 %v1916_v53  ;;  %v1831_v36 = vadd.f32 %v6891_v13, %v1677_v11  ;;  %v6966_v13 = vmul.f32 0.5, %v1819_v9 }
 0x30e   : > { %v1917_v6 = vmul.f32 0.70710677, %v1811_v61  ;;  %6232 = verf.f32 %v1919_v63  ;;  %v1918_v54 = vmul.f32 0.70710677, %v1813_v20  ;;  %v1923_v12 = vmul.f32 0.70710677, %v1829_v5 }
 0x30f   : > { %v1672_v3 = vpop.permute.xlu1 %1671  ;;  %v1687_v37 = vpop.permute.xlu0 %1686  ;;  %v6968_v47 = vmul.f32 0.5, %v1811_v61  ;;  %v6970_v48 = vmul.f32 0.5, %v1813_v20  ;;  %v1924_v49 = vmul.f32 0.70710677, %v1831_v36  ;;  %v6979_v9 = vmul.f32 0.5, %v1831_v36 }
 0x310   : > { %6234 = verf.f32 %v1917_v6  ;;  %v1823_v43 = vadd.f32 %v6883_v7, %v1672_v3  ;;  %v1841_v44 = vadd.f32 %v6899_v17, %v1687_v37  ;;  %v1825_v50 = vadd.f32 %v6886_v10, %v1672_v3 }
 0x311   : > { %6236 = verf.f32 %v1914_v0  ;;  %v6973_v17 = vmul.f32 0.5, %v1829_v5  ;;  %v1843_v1 = vadd.f32 %v6901_v62, %v1687_v37 }
 0x312   : > { %v6223_v45 = vpop.eup %6222  ;;  %6238 = verf.f32 %v1920_v35  ;;  %v1921_v60 = vmul.f32 0.70710677, %v1823_v43  ;;  %v1927_v55 = vmul.f32 0.70710677, %v1841_v44  ;;  %v1922_v52 = vmul.f32 0.70710677, %v1825_v50 }
 0x313   : > { %v1682_v51 = vpop.permute.xlu1 %1681  ;;  %v1697_v59 = vpop.permute.xlu0 %1696  ;;  %6240 = verf.f32 %v1918_v54  ;;  %v1975_v2 = vadd.f32 1.0, %v6223_v45  ;;  %v1889_v61 = vmul.f32 0.5, %v1823_v43  ;;  %v1928_v20 = vmul.f32 0.70710677, %v1843_v1 }
 0x314   : > { %v6225_v7 = vpop.eup %6224  ;;  %2039 = vperm.xlu1 %6065, %v2036_v41   ;;  %6242 = verf.f32 %v1923_v12  ;;  %v1835_v57 = vadd.f32 %v6893_v14, %v1682_v51  ;;  %v1837_v42 = vadd.f32 %v6896_v16, %v1682_v51  ;;  %v1853_v10 = vadd.f32 %v6909_v23, %v1697_v59 }
 0x315   : > { %v1979_v4 = vadd.f32 1.0, %v6225_v7  ;;  %6244 = verf.f32 %v1921_v60  ;;  %v6227_v53 = vpop.eup %6226  ;;  %v6982_v11 = vadd.f32 %v6912_v24, %v1697_v59  ;;  %v6986_v14 = vmul.f32 0.5, %v1825_v50 }
 0x316   : > { %6246 = verf.f32 %v1924_v49  ;;  %v6229_v63 = vpop.eup %6228  ;;  %v1925_v5 = vmul.f32 0.70710677, %v1835_v57  ;;  %v6988_v16 = vmul.f32 0.5, %v1841_v44  ;;  %v6990_v23 = vmul.f32 0.5, %v1843_v1 }
 0x317   : > { %v1692_v62 = vpop.permute.xlu1 %1691  ;;  %6248 = verf.f32 %v1927_v55  ;;  %v6984_v0 = vpop.eup %6230  ;;  %v1926_v6 = vmul.f32 0.70710677, %v1837_v42  ;;  %v6993_v24 = vmul.f32 %v1975_v2, %v6945_v15  ;;  %v6996_v3 = vmul.f32 %v1979_v4, %v6952_v18 }
 0x318   : > { %v1707_v35 = vpop.permute.xlu0 %1706  ;;  %v6233_v36 = vpop.eup %6232  ;;  %6250 = verf.f32 %v1925_v5  ;;  %v1931_v37 = vmul.f32 0.70710677, %v1853_v10  ;;  %v1977_v12 = vadd.f32 1.0, %v6229_v63  ;;  %v6998_v43 = vmul.f32 0.5, %v1835_v57 }
 0x319   : > { %6252 = verf.f32 %v1922_v52  ;;  %v1932_v44 = vmul.f32 0.70710677, %v6982_v11  ;;  %v1847_v45 = vadd.f32 %v6905_v21, %v1692_v62  ;;  %v1849_v49 = vadd.f32 %v6907_v22, %v1692_v62 }
 0x31a   : > { %v6235_v54 = vpop.eup %6234  ;;  %6254 = verf.f32 %v1928_v20  ;;  %v7004_v15 = vadd.f32 %v6918_v27, %v1707_v35  ;;  %v1983_v51 = vadd.f32 1.0, %v6233_v36  ;;  %v7008_v59 = vmul.f32 0.5, %v1837_v42 }
 0x31b   : > { %v6237_v41 = vpop.eup %6236  ;;  %v1702_v18 = vpop.permute.xlu1 %1701  ;;  %6256 = verf.f32 %v1926_v6  ;;  %v7011_v7 = vadd.f32 %v6921_v31, %v1707_v35  ;;  %v1981_v1 = vadd.f32 1.0, %v6235_v54  ;;  %v1929_v2 = vmul.f32 0.70710677, %v1847_v45 }
 0x31c   : > { %v7006_v50 = vpop.eup %6238  ;;  %6258 = verf.f32 %v1931_v37  ;;  %v1930_v21 = vmul.f32 0.70710677, %v1849_v49  ;;  %v2009_v22 = vmul.f32 %v1977_v12, %v6957_v38  ;;  %v7014_v27 = vmul.f32 0.5, %v1853_v10 }
 0x31d   : > { %v6241_v60 = vpop.eup %6240  ;;  %6260 = verf.f32 %v1932_v44  ;;  %v1935_v55 = vmul.f32 0.70710677, %v7004_v15  ;;  %v1936_v42 = vmul.f32 0.70710677, %v7011_v7  ;;  %v7019_v31 = vadd.f32 %v6914_v25, %v1702_v18 }
 0x31e   : > { %v6243_v4 = vpop.eup %6242  ;;  %6262 = verf.f32 %v1929_v2  ;;  %v7022_v52 = vadd.f32 %v6916_v26, %v1702_v18  ;;  %v1976_v20 = vadd.f32 1.0, %v6227_v53  ;;  %v1978_v38 = vadd.f32 1.0, %v6237_v41 }
 0x31f   : > { %v6245_v57 = vpop.eup %6244  ;;  %6264 = verf.f32 %v1930_v21  ;;  %v7025_v5 = vmul.f32 %v1983_v51, %v6964_v46  ;;  %v2013_v6 = vmul.f32 %v1981_v1, %v6968_v47  ;;  %v1933_v35 = vmul.f32 0.70710677, %v7019_v31  ;;  %v1712_v36 = vpop.permute.xlu1 %1711 }
 0x320   : > { %v6247_v62 = vpop.eup %6246  ;;  %v1985_v63 = vadd.f32 1.0, %v6245_v57  ;;  %6266 = verf.f32 %v1935_v55  ;;  %v1987_v25 = vadd.f32 1.0, %v6243_v4  ;;  %v1934_v26 = vmul.f32 0.70710677, %v7022_v52 }
 0x321   : > { %v6249_v10 = vpop.eup %6248  ;;  %6268 = verf.f32 %v1936_v42  ;;  %v2008_v53 = vmul.f32 %v1976_v20, %v6948_v19  ;;  %v2010_v12 = vmul.f32 %v1978_v38, %v6959_v39  ;;  %v5791_v46 = vpack.c.bf16 %v2009_v22, %v6993_v24 }
 0x322   : > { %v7029_v37 = vmul.f32 %v1985_v63, %v1889_v61  ;;  %v6251_v54 = vpop.eup %6250  ;;  %6270 = verf.f32 %v1933_v35  ;;  %v1991_v47 = vadd.f32 1.0, %v6249_v10  ;;  %v7036_v18 = vadd.f32 %v6923_v33, %v1712_v36 }
 0x323   : > { %v6253_v44 = vpop.eup %6252  ;;  %v1989_v41 = vadd.f32 1.0, %v6251_v54  ;;  %6272 = verf.f32 %v1934_v26  ;;  %v5789_v51 = vpack.c.bf16 %v2010_v12, %v2008_v53  ;;  %v7039_v1 = vadd.f32 %v6925_v34, %v1712_v36 }
 0x324   : > { %v6255_v61 = vpop.eup %6254  ;;  %v1980_v2 = vadd.f32 1.0, %v6984_v0  ;;  %v1982_v21 = vadd.f32 1.0, %v6241_v60  ;;  %v7043_v39 = vmul.f32 %v1987_v25, %v6973_v17  ;;  %v1897_v24 = vmul.f32 0.5, %v1847_v45 }
 0x325   : > { %v6257_v19 = vpop.eup %6256  ;;  %v1898_v4 = vmul.f32 0.5, %v1849_v49  ;;  %v1937_v22 = vmul.f32 0.70710677, %v7036_v18  ;;  %v7047_v33 = vmul.f32 %v1989_v41, %v6998_v43  ;;  %5790 = vmatprep.subr.bf16.mxu0 %v5789_v51  ;;  %v1938_v57 = vmul.f32 0.70710677, %v7039_v1 }
 0x326   : > { %v6259_v55 = vpop.eup %6258  ;;  %v2012_v34 = vmul.f32 %v1980_v2, %v6954_v28  ;;  %v2014_v0 = vmul.f32 %v1982_v21, %v6970_v48  ;;  %v7053_v42 = vmul.f32 %v1991_v47, %v6988_v16  ;;  %5792 = vmatpush1.bf16.msra.mxu0 %v5791_v46  ;;  %v5795_v17 = vpack.c.bf16 %v2013_v6, %v6996_v3 }
 0x327   : > { %v6261_v60 = vpop.eup %6260  ;;  %6274 = verf.f32 %v1937_v22  ;;  %v1984_v45 = vadd.f32 1.0, %v7006_v50  ;;  %v1986_v63 = vadd.f32 1.0, %v6253_v44  ;;  %v5799_v20 = vpack.c.bf16 %v7029_v37, %v7025_v5 }
 0x328   : > { %v6263_v49 = vpop.eup %6262  ;;  %6276 = verf.f32 %v1938_v57  ;;  %v5793_v43 = vpack.c.bf16 %v2014_v0, %v2012_v34  ;;  %v1988_v10 = vadd.f32 1.0, %v6247_v62  ;;  %v1990_v16 = vadd.f32 1.0, %v6257_v19 }
 0x329   : > { %v6265_v28 = vpop.eup %6264  ;;  %v1993_v38 = vadd.f32 1.0, %v6263_v49  ;;  %v2016_v48 = vmul.f32 %v1984_v45, %v6966_v13  ;;  %v2018_v36 = vmul.f32 %v1986_v63, %v6986_v14  ;;  %v5803_v3 = vpack.c.bf16 %v7047_v33, %v7043_v39  ;;  %v2507_v49 = vld [vmem:[%s7770_s2] sm:$0xff]  ;;  %v2510_v63 = vld [vmem:[%s7770_s2 + $0x18] sm:$0xff] }
 0x32a   : > { %v6267_v35 = vpop.eup %6266  ;;  %5794 = vmatprep.subr.bf16.mxu0 %v5793_v43  ;;  %v1992_v50 = vadd.f32 1.0, %v6255_v61  ;;  %v1994_v6 = vadd.f32 1.0, %v6265_v28  ;;  %v1995_v26 = vadd.f32 1.0, %v6259_v55  ;;  %v2020_v5 = vmul.f32 %v1988_v10, %v6979_v9  ;;  %v2508_v43 = vld [vmem:[%s7770_s2 + $0x8] sm:$0xff] }
 0x32b   : > { %v6269_v25 = vpop.eup %6268  ;;  %v2025_v54 = vmul.f32 %v1993_v38, %v1897_v24  ;;  %5796 = vmatpush1.bf16.msra.mxu0 %v5795_v17  ;;  %v2022_v37 = vmul.f32 %v1990_v16, %v7008_v59  ;;  %v5797_v62 = vpack.c.bf16 %v2018_v36, %v2016_v48  ;;  %v1996_v46 = vadd.f32 1.0, %v6261_v60 }
 0x32c   : > { %v6271_v13 = vpop.eup %6270  ;;  %v2024_v53 = vmul.f32 %v1992_v50, %v6990_v23  ;;  %v2026_v12 = vmul.f32 %v1994_v6, %v1898_v4  ;;  %v1901_v44 = vmul.f32 0.5, %v7019_v31  ;;  %v1900_v51 = vmul.f32 0.5, %v6982_v11  ;;  %v5291_v6 = vld [vmem:[%s7772_s23] ss:$0 sm:$0xff] }
 0x32d   : > { %v6273_v14 = vpop.eup %6272  ;;  %v1997_v47 = vadd.f32 1.0, %v6271_v13  ;;  %v5801_v41 = vpack.c.bf16 %v2022_v37, %v2020_v5  ;;  %v5807_v61 = vpack.c.bf16 %v2025_v54, %v7053_v42  ;;  %v1902_v2 = vmul.f32 0.5, %v7022_v52  ;;  %5798 = vmatprep.subr.bf16.mxu0 %v5797_v62  ;;  %v5292_v5 = vld [vmem:[%s7773_s16] ss:$0 sm:$0xff] }
 0x32e   : > { %v5805_v9 = vpack.c.bf16 %v2026_v12, %v2024_v53  ;;  %v1998_v59 = vadd.f32 1.0, %v6273_v14  ;;  %v2027_v21 = vmul.f32 %v1995_v26, %v7014_v27  ;;  %v1999_v23 = vadd.f32 1.0, %v6267_v35 }
 0x32f   : > { %v2029_v19 = vmul.f32 %v1997_v47, %v1901_v44  ;;  %5800 = vmatpush1.bf16.msra.mxu0 %v5799_v20  ;;  %v2028_v39 = vmul.f32 %v1996_v46, %v1900_v51  ;;  %v2000_v22 = vadd.f32 1.0, %v6269_v25  ;;  %v1903_v33 = vmul.f32 0.5, %v7004_v15  ;;  %v2035_v20 = vld [vmem:[%s7771_s22] sm:$0xf]  ;;  %s7698_s22 = smov 96  }
 0x330   : > { %5802 = vmatprep.subr.bf16.mxu0 %v5801_v41  ;;  %v2030_v24 = vmul.f32 %v1998_v59, %v1902_v2  ;;  %v1905_v11 = vmul.f32 0.5, %v7036_v18  ;;  %v1904_v27 = vmul.f32 0.5, %v7011_v7  ;;  %v1906_v34 = vmul.f32 0.5, %v7039_v1  ;;  %v2509_v1 = vld [vmem:[%s7770_s2 + $0x10] sm:$0xff] }
 0x331   : > { %v6275_v31 = vpop.eup %6274  ;;  %v5811_v4 = vpack.c.bf16 %v2029_v19, %v2027_v21  ;;  %v2031_v60 = vmul.f32 %v1999_v23, %v1903_v33  ;;  %v5817_v7 = vpack.c.bf16 %v2508_v43, %v2507_v49  ;;  %v5821_v28 = vpack.c.bf16 %v2510_v63, %v2509_v1 }
 0x332   : > { %v6277_v55 = vpop.eup %6276  ;;  %v2001_v52 = vadd.f32 1.0, %v6275_v31  ;;  %v5809_v57 = vpack.c.bf16 %v2030_v24, %v2028_v39  ;;  %v2032_v17 = vmul.f32 %v2000_v22, %v1904_v27  ;;  %v6465_v53 = vmov 1966171168  }
 0x333   : > { %5804 = vmatpush1.bf16.msra.mxu0 %v5803_v3  ;;  %v2002_v0 = vadd.f32 1.0, %v6277_v55  ;;  %v2115_v12 = vunpack.c.l.s4 %v6465_v53  ;;  %v5293_v55 = vld [vmem:[%s7774_s3] ss:$0 sm:$0xff] }
 0x334   : > { %v2033_v42 = vmul.f32 %v2001_v52, %v1905_v11  ;;  %5806 = vmatprep.subr.bf16.mxu0 %v5805_v9 }
 0x335   : > { %v2034_v15 = vmul.f32 %v2002_v0, %v1906_v34  ;;  %v2116_v46 = vunpack.c.0.s8 %v2115_v12 }
 0x336   : > { %v5815_v45 = vpack.c.bf16 %v2033_v42, %v2031_v60 }
 0x337   : > { %5808 = vmatpush1.bf16.msra.mxu0 %v5807_v61  ;;  %v5813_v18 = vpack.c.bf16 %v2034_v15, %v2032_v17  ;;  %v2119_v14 = vsub.s32 %v2116_v46, %v6750_v56 }
 0x338   : > { %5810 = vmatprep.subr.bf16.mxu0 %v5809_v57 }
 0x33b   : > { %5812 = vmatpush1.bf16.msra.mxu0 %v5811_v4 }
 0x33c   : > { %5814 = vmatprep.subr.bf16.mxu0 %v5813_v18 }
 0x33f   : > { %5816 = vmatpush1.bf16.msra.mxu0 %v5815_v45 }
 0x340   : > { %5818 = vmatprep.subr.bf16.mxu0 %v5817_v7 }
 0x342   : > { %2107 = vmatmul.mubr.f32.vlgmr.msra.gmra.mrb[2].mxu0 %v2035_v20 }
 0x343   : > { %5820 = vmatpush3.bf16.msra.mxu0 %v5817_v7 }
 0x344   : > { %5822 = vmatprep.subr.bf16.mxu0 %v5821_v28 }
 0x347   : > { %5824 = vmatpush3.bf16.msra.mxu0 %v5821_v28 }
 0x390   : > { %v2482_v38 = vpop.xlane.xlu1 %2481 }
 0x391   : > { %v2484_v48 = vmul.f32 0.03125, %v2482_v38 }
 0x393   : > { %v2486_v10 = vadd.f32 1e-05, %v2484_v48 }
 0x394   : > { %v2479_v16 = vpop.xlane.xlu0 %2478  ;;  %v2040_v44 = vpop.permute.xlu1 %2039 }
 0x395   : > { %6278 = vrsqrt.f32 %v2486_v10  ;;  %v2483_v35 = vmul.f32 0.03125, %v2479_v16 }
 0x397   : > { %v2485_v36 = vadd.f32 1e-05, %v2483_v35  ;;  %v2444_v35 = vrot.slane %v6702_v8, %v6755_v58 }
 0x399   : > { %6280 = vrsqrt.f32 %v2485_v36  ;;  %vm7174_vm7 = vcmp.eq.s32.totalorder %v2444_v35, 1 }
 0x39f   : > { %v6279_v3 = vpop.eup %6278 }
 0x3a0   : > { %v2490_v50 = vmul.f32 %v6279_v3, %v6928_v29 }
 0x3a2   : > { %v2498_v54 = vmul.f32 %v5291_v6, %v2490_v50 }
 0x3a3   : > { %v6281_v25 = vpop.eup %6280 }
 0x3a4   : > { %v2489_v26 = vmul.f32 %v6281_v25, %v6933_v40  ;;  %v2506_v62 = vadd.f32 %v5292_v5, %v2498_v54 }
 0x3a6   : > { %v2497_v37 = vmul.f32 %v5291_v6, %v2489_v26 }
 0x3a8   : > { %v2505_v13 = vadd.f32 %v5292_v5, %v2497_v37 }
 0x3aa   : > { %5545 = vmatprep.mubr.msk.f32.mxu0 %vm1050_vm3, %v2505_v13 }
 0x3ab   : > { %5546 = vmatmul.mubr.msk.f32.vlgmr.msra.gmra.mrb[4].mxu0 %vm1050_vm3, %v2506_v62 }
 0x415   : > { %v2108_v29 = vpop.f32.mrb[2].mxu0 }
 0x416   : > { %v2109_v47 = vadd.f32 %v2108_v29, %v2040_v44  ;;  %v2110_v41 = vpop.f32.mrb[3].mxu0 }
 0x417   : > { %v2111_v61 = vadd.f32 %v2110_v41, %v2040_v44 }
 0x418   : > { %v2120_v40 = vrot.slane %v2109_v47, %v2119_v14 }
 0x419   : > { %v2282_v51 = vrot.slane %v2111_v61, %v2119_v14 }
 0x41a   : > { %v2121_v2 = vcombine.high %v2120_v40, %v2120_v40  ;;  %v2128_v9 = vrot.slane %v2120_v40, %v2119_v14 }
 0x41b   : > { %v2283_v59 = vcombine.high %v2282_v51, %v2282_v51  ;;  %v2290_v21 = vrot.slane %v2282_v51, %v2119_v14 }
 0x41c   : > { %v7087_v19 = vrot.slane %v2121_v2, %v2119_v14  ;;  %v7089_v23 = vcombine.high %v2128_v9, %v2128_v9  ;;  %2143 = vst.msk [vmem:[#allocation2] sm:$0x1] %vm2142_vm4, %v2128_v9  ;;  %v2150_v56 = vrot.slane %v2128_v9, %v6755_v58 }
 0x41d   : > { %v7093_v39 = vrot.slane %v2283_v59, %v2119_v14  ;;  %v7095_v24 = vcombine.high %v2290_v21, %v2290_v21  ;;  %2304 = vst.msk [vmem:[#allocation2 + $0x8] sm:$0x1] %vm2142_vm4, %v2290_v21  ;;  %v2311_v22 = vrot.slane %v2290_v21, %v6755_v58 }
 0x41e   : > { %v7100_v31 = vcombine.high %v7087_v19, %v7087_v19  ;;  %2144 = vst.msk [vmem:[#allocation2 + $0x10] sm:$0x1] %vm2142_vm4, %v7087_v19  ;;  %2145 = vst.msk [vmem:[#allocation2 + $0x20] sm:$0x1] %vm2142_vm4, %v7089_v23  ;;  %2179 = vrot.lane.b32.xlu1 %v2150_v56, %s7698_s22  ;;  %s7701_s22 = smov 32   ;;  %v2154_v62 = vrot.slane %v7087_v19, %v6755_v58 }
 0x41f   : > { %v7109_v4 = vcombine.high %v7093_v39, %v7093_v39  ;;  %2305 = vst.msk [vmem:[#allocation2 + $0x18] sm:$0x1] %vm2142_vm4, %v7093_v39  ;;  %2306 = vst.msk [vmem:[#allocation2 + $0x28] sm:$0x1] %vm2142_vm4, %v7095_v24  ;;  %v2315_v53 = vrot.slane %v7093_v39, %v6755_v58 }
 0x420   : > { %2146 = vst.msk [vmem:[#allocation2 + $0x30] sm:$0x1] %vm2142_vm4, %v7100_v31 }
 0x421   : > { %2307 = vst.msk [vmem:[#allocation2 + $0x38] sm:$0x1] %vm2142_vm4, %v7109_v4 }
 0x422   : > { %2211 = vrot.lane.b32.xlu1 %v2150_v56, %s7724_s5 }
 0x426   : > { %2243 = vrot.lane.b32.xlu1 %v2150_v56, %s7701_s22  ;;  %s7775_s22 = smov 96  }
 0x42a   : > { %2324 = vrot.lane.b32.xlu1 %v2311_v22, %s7720_s8 }
 0x42e   : > { %2356 = vrot.lane.b32.xlu1 %v2311_v22, %s7703_s9 }
 0x432   : > { %2388 = vrot.lane.b32.xlu1 %v2311_v22, %s7707_s12 }
 0x436   : > { %2420 = vrot.lane.b32.xlu1 %v2311_v22, %s7705_s13 }
 0x47e   : > { %v5547_v33 = vpop.f32.mrb[4].mxu0 }
 0x47f   : > { %v7127_v11 = vadd.f32 %v5547_v33, %v5293_v55  ;;  %v2590_v52 = vpop.f32.mrb[5].mxu0 }
 0x480   : > { %v7129_v57 = vadd.f32 %v5293_v55, %v2590_v52 }
 0x482   : > { %5552 = vmatprep.mubr.msk.f32.mxu0 %vm2605_vm5, %v7129_v57  ;;  %v7135_v27 = vpack.i.bf16 %v7127_v11, %v7129_v57 }
 0x484   : > { %6067 = vrot.lane.b32.xlu0 %v7135_v27, %s7775_s22 }
 0x488   : > { %2163 = vrot.lane.b32.xlu0 %v2150_v56, %s7720_s8 }
 0x48c   : > { %2195 = vrot.lane.b32.xlu0 %v2150_v56, %s7703_s9  ;;  %s7776_s9 = smov 32  }
 0x490   : > { %v2180_v34 = vpop.permute.xlu1 %2179  ;;  %2227 = vrot.lane.b32.xlu0 %v2150_v56, %s7707_s12  ;;  %s7781_s12 = smov 80  }
 0x491   : > { %2191 = vst.msk [vmem:[#allocation2 + $0x2] sm:$0x1] %vm2142_vm4, %v2180_v34 }
 0x494   : > { %v2212_v0 = vpop.permute.xlu1 %2211  ;;  %2259 = vrot.lane.b32.xlu0 %v2150_v56, %s7705_s13  ;;  %s7710_s13 = smov 120  }
 0x495   : > { %2223 = vst.msk [vmem:[#allocation2 + $0x4] sm:$0x1] %vm2142_vm4, %v2212_v0 }
 0x498   : > { %v2244_v60 = vpop.permute.xlu1 %2243  ;;  %2340 = vrot.lane.b32.xlu0 %v2311_v22, %s7775_s22 }
 0x499   : > { %2255 = vst.msk [vmem:[#allocation2 + $0x6] sm:$0x1] %vm2142_vm4, %v2244_v60 }
 0x49c   : > { %v2325_v42 = vpop.permute.xlu1 %2324  ;;  %2372 = vrot.lane.b32.xlu0 %v2311_v22, %s7724_s5 }
 0x49d   : > { %2336 = vst.msk [vmem:[#allocation2 + $0x9] sm:$0x1] %vm2142_vm4, %v2325_v42 }
 0x4a0   : > { %v2357_v17 = vpop.permute.xlu1 %2356  ;;  %2404 = vrot.lane.b32.xlu0 %v2311_v22, %s7776_s9 }
 0x4a1   : > { %2368 = vst.msk [vmem:[#allocation2 + $0xb] sm:$0x1] %vm2142_vm4, %v2357_v17 }
 0x4a4   : > { %v2389_v15 = vpop.permute.xlu1 %2388 }
 0x4a5   : > { %2400 = vst.msk [vmem:[#allocation2 + $0xd] sm:$0x1] %vm2142_vm4, %v2389_v15 }
 0x4a8   : > { %v2421_v45 = vpop.permute.xlu1 %2420 }
 0x4a9   : > { %2432 = vst.msk [vmem:[#allocation2 + $0xf] sm:$0x1] %vm2142_vm4, %v2421_v45 }
 0x4f6   : > { %v6068_v18 = vpop.permute.xlu0 %6067 }
 0x4f7   : > { %v6070_v49 = vunpack.i.h.bf16 %v6068_v18  ;;  %v6069_v43 = vunpack.i.l.bf16 %v6068_v18 }
 0x4f9   : > { %v5825_v1 = vpack.c.bf16 %v6070_v49, %v6069_v43 }
 0x4fa   : > { %v2164_v63 = vpop.permute.xlu0 %2163 }
 0x4fb   : > { %2175 = vst.msk [vmem:[#allocation2 + $0x1] sm:$0x1] %vm2142_vm4, %v2164_v63  ;;  %5827 = vmatprep.subr.msk.bf16.mxu0 %vm7155_vm6, %v5825_v1 }
 0x4fc   : > { %5830 = vmatpush3.bf16.xpose.msk.msra.mxu0 %vm7155_vm6, %v5825_v1 }
 0x4fe   : > { %v2196_v20 = vpop.permute.xlu0 %2195 }
 0x4ff   : > { %2207 = vst.msk [vmem:[#allocation2 + $0x3] sm:$0x1] %vm2142_vm4, %v2196_v20 }
 0x502   : > { %v2228_v28 = vpop.permute.xlu0 %2227 }
 0x503   : > { %2239 = vst.msk [vmem:[#allocation2 + $0x5] sm:$0x1] %vm2142_vm4, %v2228_v28  ;;  %5553 = vmatmul.mubr.msk.f32.vlgmr.msra.gmra.mrb[6].mxu0 %vm2605_vm5, %v7127_v11 }
 0x506   : > { %v2260_v38 = vpop.permute.xlu0 %2259 }
 0x507   : > { %2271 = vst.msk [vmem:[#allocation2 + $0x7] sm:$0x1] %vm2142_vm4, %v2260_v38 }
 0x50a   : > { %v2341_v48 = vpop.permute.xlu0 %2340 }
 0x50b   : > { %2352 = vst.msk [vmem:[#allocation2 + $0xa] sm:$0x1] %vm2142_vm4, %v2341_v48 }
 0x50e   : > { %v2373_v10 = vpop.permute.xlu0 %2372  ;;  %v2438_v50 = vld [vmem:[#allocation2] sm:$0xff] }
 0x50f   : > { %2384 = vst.msk [vmem:[#allocation2 + $0xc] sm:$0x1] %vm2142_vm4, %v2373_v10  ;;  %v2446_v54 = vsel %vm7174_vm7, -inf, %v2438_v50 }
 0x512   : > { %v2405_v16 = vpop.permute.xlu0 %2404 }
 0x513   : > { %2416 = vst.msk [vmem:[#allocation2 + $0xe] sm:$0x1] %vm2142_vm4, %v2405_v16 }
 0x51a   : > { %v2439_v36 = vld [vmem:[#allocation2 + $0x8] sm:$0xff] }
 0x51b   : > { %v2447_v6 = vsel %vm7174_vm7, -inf, %v2439_v36 }
 0x5d6   : > { %v5554_v25 = vpop.f32.mrb[6].mxu0 }
 0x5d7   : > { %v7180_v26 = vadd.f32 %v5554_v25, %v2447_v6  ;;  %v2680_v5 = vpop.f32.mrb[7].mxu0 }
 0x5d8   : > { %v7184_v37 = vadd.f32 %v2680_v5, %v2446_v54 }
 0x5d9   : > { %v2693_v8 = vsel %vm2689_vm8, %v7180_v26, -inf }
 0x5da   : > { %2694 = vmax.xlane.f32.xlu1 %v2693_v8  ;;  %v2690_v13 = vsel %vm2689_vm8, %v7184_v37, -inf }
 0x5db   : > { %2691 = vmax.xlane.f32.xlu0 %v2690_v13 }
 0x5eb   : > { %6072 = vrot.lane.b32.xlu1 %v7135_v27, %s7724_s5 }
 0x5ef   : > { %2799 = vrot.lane.b32.xlu1 %v7129_v57, %s7710_s13 }
 0x5f3   : > { %2801 = vrot.lane.b32.xlu1 %v7127_v11, %s7710_s13  ;;  %s7712_s13 = smov 88  }
 0x5f7   : > { %2181 = vrot.lane.b32.xlu1 %v2154_v62, %s7775_s22 }
 0x5fb   : > { %2213 = vrot.lane.b32.xlu1 %v2154_v62, %s7724_s5 }
 0x5ff   : > { %2245 = vrot.lane.b32.xlu1 %v2154_v62, %s7776_s9 }
 0x603   : > { %2326 = vrot.lane.b32.xlu1 %v2315_v53, %s7720_s8 }
 0x607   : > { %2358 = vrot.lane.b32.xlu1 %v2315_v53, %s7781_s12 }
 0x60b   : > { %2390 = vrot.lane.b32.xlu1 %v2315_v53, %s7782_s14 }
 0x60f   : > { %2422 = vrot.lane.b32.xlu1 %v2315_v53, %s7783_s17 }
 0x667   : > { %v2695_v12 = vpop.xlane.xlu1 %2694 }
 0x668   : > { %v2697_v46 = vsub.f32 %v7180_v26, %v2695_v12  ;;  %v2692_v14 = vpop.xlane.xlu0 %2691 }
 0x669   : > { %v2696_v44 = vsub.f32 %v7184_v37, %v2692_v14  ;;  %v2158_v14 = vrot.slane %v7089_v23, %v6755_v58 }
 0x66a   : > { %v2700_v29 = vmul.f32 1.442695, %v2697_v46 }
 0x66b   : > { %v2698_v47 = vmul.f32 1.442695, %v2696_v44  ;;  %v6073_v41 = vpop.permute.xlu1 %6072  ;;  %v2319_v44 = vrot.slane %v7095_v24, %v6755_v58 }
 0x66c   : > { %6282 = vpow2.f32 %v2700_v29  ;;  %v6075_v61 = vunpack.i.h.bf16 %v6073_v41  ;;  %v6074_v40 = vunpack.i.l.bf16 %v6073_v41 }
 0x66d   : > { %6284 = vpow2.f32 %v2698_v47 }
 0x66e   : > { %v5831_v51 = vpack.c.bf16 %v6075_v61, %v6074_v40 }
 0x66f   : > { %v2800_v2 = vpop.permute.xlu1 %2799 }
 0x670   : > { %5832 = vmatprep.subr.bf16.mxu0 %v5831_v51 }
 0x671   : > { %5834 = vmatpush3.bf16.msra.mxu0 %v5831_v51 }
 0x673   : > { %v2802_v9 = vpop.permute.xlu1 %2801 }
 0x676   : > { %v6283_v59 = vpop.eup %6282 }
 0x677   : > { %v2182_v21 = vpop.permute.xlu1 %2181  ;;  %v2705_v19 = vsel %vm2689_vm8, %v6283_v59, 0.0  ;;  %v6285_v56 = vpop.eup %6284 }
 0x678   : > { %2192 = vst.msk [vmem:[#allocation2 + $0x12] sm:$0x1] %vm2142_vm4, %v2182_v21  ;;  %2706 = vadd.xlane.f32.xlu0 %v2705_v19  ;;  %v2702_v22 = vsel %vm2689_vm8, %v6285_v56, 0.0 }
 0x67b   : > { %v2214_v39 = vpop.permute.xlu1 %2213 }
 0x67c   : > { %2224 = vst.msk [vmem:[#allocation2 + $0x14] sm:$0x1] %vm2142_vm4, %v2214_v39  ;;  %2703 = vadd.xlane.f32.xlu0 %v2702_v22 }
 0x67f   : > { %v2246_v55 = vpop.permute.xlu1 %2245 }
 0x680   : > { %2256 = vst.msk [vmem:[#allocation2 + $0x16] sm:$0x1] %vm2142_vm4, %v2246_v55 }
 0x683   : > { %v2327_v33 = vpop.permute.xlu1 %2326 }
 0x684   : > { %2337 = vst.msk [vmem:[#allocation2 + $0x19] sm:$0x1] %vm2142_vm4, %v2327_v33 }
 0x687   : > { %v2359_v52 = vpop.permute.xlu1 %2358 }
 0x688   : > { %2369 = vst.msk [vmem:[#allocation2 + $0x1b] sm:$0x1] %vm2142_vm4, %v2359_v52 }
 0x68b   : > { %v2391_v34 = vpop.permute.xlu1 %2390 }
 0x68c   : > { %2401 = vst.msk [vmem:[#allocation2 + $0x1d] sm:$0x1] %vm2142_vm4, %v2391_v34 }
 0x68f   : > { %v2423_v0 = vpop.permute.xlu1 %2422 }
 0x690   : > { %2433 = vst.msk [vmem:[#allocation2 + $0x1f] sm:$0x1] %vm2142_vm4, %v2423_v0 }
 0x692   : > { %6077 = vrot.lane.b32.xlu0 %v7135_v27, %s7712_s13  ;;  %s7713_s13 = smov 56  }
 0x696   : > { %2165 = vrot.lane.b32.xlu0 %v2154_v62, %s7720_s8 }
 0x69a   : > { %2197 = vrot.lane.b32.xlu0 %v2154_v62, %s7781_s12 }
 0x69e   : > { %2229 = vrot.lane.b32.xlu0 %v2154_v62, %s7782_s14 }
 0x6a2   : > { %2261 = vrot.lane.b32.xlu0 %v2154_v62, %s7783_s17 }
 0x6a6   : > { %2342 = vrot.lane.b32.xlu0 %v2315_v53, %s7775_s22 }
 0x6aa   : > { %2374 = vrot.lane.b32.xlu0 %v2315_v53, %s7724_s5 }
 0x6ae   : > { %2406 = vrot.lane.b32.xlu0 %v2315_v53, %s7776_s9 }
 0x705   : > { %v2707_v60 = vpop.xlane.xlu0 %2706 }
 0x706   : > { %6286 = vrcp.f32 %v2707_v60 }
 0x709   : > { %v2704_v42 = vpop.xlane.xlu0 %2703 }
 0x70a   : > { %6288 = vrcp.f32 %v2704_v42 }
 0x70d   : > { %v6078_v17 = vpop.permute.xlu0 %6077 }
 0x70e   : > { %v6080_v15 = vunpack.i.h.bf16 %v6078_v17  ;;  %v6079_v45 = vunpack.i.l.bf16 %v6078_v17 }
 0x710   : > { %v5835_v18 = vpack.c.bf16 %v6080_v15, %v6079_v45  ;;  %v6287_v43 = vpop.eup %6286 }
 0x711   : > { %v2166_v49 = vpop.permute.xlu0 %2165  ;;  %v2711_v28 = vmul.f32 %v6287_v43, %v6283_v59 }
 0x712   : > { %2176 = vst.msk [vmem:[#allocation2 + $0x11] sm:$0x1] %vm2142_vm4, %v2166_v49  ;;  %5837 = vmatprep.subr.msk.bf16.mxu0 %vm7155_vm6, %v5835_v18 }
 0x714   : > { %v6289_v1 = vpop.eup %6288 }
 0x715   : > { %v2198_v63 = vpop.permute.xlu0 %2197  ;;  %v2710_v20 = vmul.f32 %v6289_v1, %v6285_v56 }
 0x716   : > { %2208 = vst.msk [vmem:[#allocation2 + $0x13] sm:$0x1] %vm2142_vm4, %v2198_v63 }
 0x717   : > { %5559 = vmatprep.mubr.msk.f32.mxu0 %vm2689_vm8, %v2710_v20 }
 0x718   : > { %5560 = vmatmul.mubr.msk.f32.vlgmr.msra.gmra.mrb[8].mxu0 %vm2689_vm8, %v2711_v28 }
 0x719   : > { %5840 = vmatpush3.bf16.xpose.msk.msra.mxu0 %vm7155_vm6, %v5835_v18  ;;  %5566 = vmatprep.mubr.msk.f32.mxu0 %vm2605_vm5, %v2800_v2  ;;  %v2230_v38 = vpop.permute.xlu0 %2229 }
 0x71a   : > { %2240 = vst.msk [vmem:[#allocation2 + $0x15] sm:$0x1] %vm2142_vm4, %v2230_v38 }
 0x71d   : > { %v2262_v48 = vpop.permute.xlu0 %2261 }
 0x71e   : > { %2272 = vst.msk [vmem:[#allocation2 + $0x17] sm:$0x1] %vm2142_vm4, %v2262_v48 }
 0x720   : > { %5567 = vmatmul.mubr.msk.f32.vlgmr.msra.gmra.mrb[10].mxu0 %vm2605_vm5, %v2802_v9 }
 0x721   : > { %v2343_v10 = vpop.permute.xlu0 %2342 }
 0x722   : > { %2353 = vst.msk [vmem:[#allocation2 + $0x1a] sm:$0x1] %vm2142_vm4, %v2343_v10 }
 0x725   : > { %v2375_v16 = vpop.permute.xlu0 %2374  ;;  %v2449_v25 = vld [vmem:[#allocation2 + $0x10] sm:$0xff] }
 0x726   : > { %2385 = vst.msk [vmem:[#allocation2 + $0x1c] sm:$0x1] %vm2142_vm4, %v2375_v16  ;;  %v2451_v13 = vsel %vm7174_vm7, -inf, %v2449_v25 }
 0x729   : > { %v2407_v35 = vpop.permute.xlu0 %2406 }
 0x72a   : > { %2417 = vst.msk [vmem:[#allocation2 + $0x1e] sm:$0x1] %vm2142_vm4, %v2407_v35 }
 0x731   : > { %v2450_v6 = vld [vmem:[#allocation2 + $0x18] sm:$0xff] }
 0x732   : > { %v2452_v54 = vsel %vm7174_vm7, -inf, %v2450_v6 }
 0x7eb   : > { %v7242_v36 = vpop.f32.mrb[8].mxu0 }
 0x7ec   : > { %v7244_v50 = vpop.f32.mrb[9].mxu0 }
 0x7f3   : > { %v5568_v5 = vpop.f32.mrb[10].mxu0 }
 0x7f4   : > { %v7248_v8 = vadd.f32 %v5568_v5, %v2452_v54  ;;  %v2881_v62 = vpop.f32.mrb[11].mxu0 }
 0x7f5   : > { %v7252_v53 = vadd.f32 %v2881_v62, %v2451_v13 }
 0x7f6   : > { %v2893_v12 = vsel %vm2689_vm8, %v7248_v8, -inf }
 0x7f7   : > { %2894 = vmax.xlane.f32.xlu1 %v2893_v12  ;;  %v2890_v46 = vsel %vm2689_vm8, %v7252_v53, -inf }
 0x7f8   : > { %2891 = vmax.xlane.f32.xlu0 %v2890_v46 }
 0x808   : > { %6082 = vrot.lane.b32.xlu1 %v7135_v27, %s7713_s13  ;;  %s7714_s13 = smov 104  }
 0x80c   : > { %2999 = vrot.lane.b32.xlu1 %v7129_v57, %s7720_s8 }
 0x810   : > { %3001 = vrot.lane.b32.xlu1 %v7127_v11, %s7720_s8 }
 0x814   : > { %2183 = vrot.lane.b32.xlu1 %v2158_v14, %s7775_s22 }
 0x818   : > { %2215 = vrot.lane.b32.xlu1 %v2158_v14, %s7724_s5 }
 0x81c   : > { %2247 = vrot.lane.b32.xlu1 %v2158_v14, %s7776_s9 }
 0x820   : > { %2328 = vrot.lane.b32.xlu1 %v2319_v44, %s7720_s8 }
 0x824   : > { %2360 = vrot.lane.b32.xlu1 %v2319_v44, %s7781_s12 }
 0x828   : > { %2392 = vrot.lane.b32.xlu1 %v2319_v44, %s7782_s14 }
 0x82c   : > { %2424 = vrot.lane.b32.xlu1 %v2319_v44, %s7783_s17 }
 0x884   : > { %v2895_v29 = vpop.xlane.xlu1 %2894 }
 0x885   : > { %v2897_v23 = vsub.f32 %v7248_v8, %v2895_v29  ;;  %v2892_v47 = vpop.xlane.xlu0 %2891 }
 0x886   : > { %v2896_v41 = vsub.f32 %v7252_v53, %v2892_v47 }
 0x887   : > { %v2900_v61 = vmul.f32 1.442695, %v2897_v23 }
 0x888   : > { %v2898_v40 = vmul.f32 1.442695, %v2896_v41  ;;  %v6083_v51 = vpop.permute.xlu1 %6082 }
 0x889   : > { %6290 = vpow2.f32 %v2900_v61  ;;  %v6085_v2 = vunpack.i.h.bf16 %v6083_v51  ;;  %v6084_v24 = vunpack.i.l.bf16 %v6083_v51  ;;  %v2162_v61 = vrot.slane %v7100_v31, %v6755_v58 }
 0x88a   : > { %6292 = vpow2.f32 %v2898_v40  ;;  %v2323_v40 = vrot.slane %v7109_v4, %v6755_v58 }
 0x88b   : > { %v5841_v9 = vpack.c.bf16 %v6085_v2, %v6084_v24 }
 0x88c   : > { %v3000_v59 = vpop.permute.xlu1 %2999 }
 0x88d   : > { %5842 = vmatprep.subr.bf16.mxu0 %v5841_v9 }
 0x88e   : > { %5844 = vmatpush3.bf16.msra.mxu0 %v5841_v9 }
 0x890   : > { %v3002_v21 = vpop.permute.xlu1 %3001 }
 0x893   : > { %v6291_v19 = vpop.eup %6290 }
 0x894   : > { %v2184_v56 = vpop.permute.xlu1 %2183  ;;  %v2905_v39 = vsel %vm2689_vm8, %v6291_v19, 0.0  ;;  %v6293_v22 = vpop.eup %6292 }
 0x895   : > { %2193 = vst.msk [vmem:[#allocation2 + $0x22] sm:$0x1] %vm2142_vm4, %v2184_v56  ;;  %2906 = vadd.xlane.f32.xlu0 %v2905_v39  ;;  %v2902_v33 = vsel %vm2689_vm8, %v6293_v22, 0.0 }
 0x898   : > { %v2216_v55 = vpop.permute.xlu1 %2215 }
 0x899   : > { %2225 = vst.msk [vmem:[#allocation2 + $0x24] sm:$0x1] %vm2142_vm4, %v2216_v55  ;;  %2903 = vadd.xlane.f32.xlu0 %v2902_v33 }
 0x89c   : > { %v2248_v52 = vpop.permute.xlu1 %2247 }
 0x89d   : > { %2257 = vst.msk [vmem:[#allocation2 + $0x26] sm:$0x1] %vm2142_vm4, %v2248_v52 }
 0x8a0   : > { %v2329_v34 = vpop.permute.xlu1 %2328 }
 0x8a1   : > { %2338 = vst.msk [vmem:[#allocation2 + $0x29] sm:$0x1] %vm2142_vm4, %v2329_v34 }
 0x8a4   : > { %v2361_v0 = vpop.permute.xlu1 %2360 }
 0x8a5   : > { %2370 = vst.msk [vmem:[#allocation2 + $0x2b] sm:$0x1] %vm2142_vm4, %v2361_v0 }
 0x8a8   : > { %v2393_v60 = vpop.permute.xlu1 %2392 }
 0x8a9   : > { %2402 = vst.msk [vmem:[#allocation2 + $0x2d] sm:$0x1] %vm2142_vm4, %v2393_v60 }
 0x8ac   : > { %v2425_v42 = vpop.permute.xlu1 %2424 }
 0x8ad   : > { %2434 = vst.msk [vmem:[#allocation2 + $0x2f] sm:$0x1] %vm2142_vm4, %v2425_v42 }
 0x8af   : > { %6087 = vrot.lane.b32.xlu0 %v7135_v27, %s7781_s12 }
 0x8b3   : > { %2167 = vrot.lane.b32.xlu0 %v2158_v14, %s7720_s8 }
 0x8b7   : > { %2199 = vrot.lane.b32.xlu0 %v2158_v14, %s7781_s12 }
 0x8bb   : > { %2231 = vrot.lane.b32.xlu0 %v2158_v14, %s7782_s14 }
 0x8bf   : > { %2263 = vrot.lane.b32.xlu0 %v2158_v14, %s7783_s17 }
 0x8c3   : > { %2344 = vrot.lane.b32.xlu0 %v2319_v44, %s7775_s22 }
 0x8c7   : > { %2376 = vrot.lane.b32.xlu0 %v2319_v44, %s7724_s5 }
 0x8cb   : > { %2408 = vrot.lane.b32.xlu0 %v2319_v44, %s7776_s9 }
 0x922   : > { %v2907_v17 = vpop.xlane.xlu0 %2906 }
 0x923   : > { %6294 = vrcp.f32 %v2907_v17 }
 0x926   : > { %v2904_v15 = vpop.xlane.xlu0 %2903 }
 0x927   : > { %6296 = vrcp.f32 %v2904_v15 }
 0x92a   : > { %v6088_v45 = vpop.permute.xlu0 %6087 }
 0x92b   : > { %v6090_v18 = vunpack.i.h.bf16 %v6088_v45  ;;  %v6089_v49 = vunpack.i.l.bf16 %v6088_v45 }
 0x92d   : > { %v5845_v43 = vpack.c.bf16 %v6090_v18, %v6089_v49  ;;  %v6295_v63 = vpop.eup %6294 }
 0x92e   : > { %v2168_v1 = vpop.permute.xlu0 %2167  ;;  %v2911_v48 = vmul.f32 %v6295_v63, %v6291_v19 }
 0x92f   : > { %2177 = vst.msk [vmem:[#allocation2 + $0x21] sm:$0x1] %vm2142_vm4, %v2168_v1  ;;  %5847 = vmatprep.subr.msk.bf16.mxu0 %vm7155_vm6, %v5845_v43 }
 0x931   : > { %v6297_v20 = vpop.eup %6296 }
 0x932   : > { %v2200_v28 = vpop.permute.xlu0 %2199  ;;  %v2910_v38 = vmul.f32 %v6297_v20, %v6293_v22 }
 0x933   : > { %2209 = vst.msk [vmem:[#allocation2 + $0x23] sm:$0x1] %vm2142_vm4, %v2200_v28 }
 0x934   : > { %5573 = vmatprep.mubr.msk.f32.mxu0 %vm2689_vm8, %v2910_v38 }
 0x935   : > { %5574 = vmatmul.mubr.msk.f32.vlgmr.msra.gmra.mrb[12].mxu0 %vm2689_vm8, %v2911_v48 }
 0x936   : > { %5850 = vmatpush3.bf16.xpose.msk.msra.mxu0 %vm7155_vm6, %v5845_v43  ;;  %5580 = vmatprep.mubr.msk.f32.mxu0 %vm2605_vm5, %v3000_v59  ;;  %v2232_v10 = vpop.permute.xlu0 %2231 }
 0x937   : > { %2241 = vst.msk [vmem:[#allocation2 + $0x25] sm:$0x1] %vm2142_vm4, %v2232_v10 }
 0x93a   : > { %v2264_v16 = vpop.permute.xlu0 %2263 }
 0x93b   : > { %2273 = vst.msk [vmem:[#allocation2 + $0x27] sm:$0x1] %vm2142_vm4, %v2264_v16 }
 0x93d   : > { %5581 = vmatmul.mubr.msk.f32.vlgmr.msra.gmra.mrb[14].mxu0 %vm2605_vm5, %v3002_v21 }
 0x93e   : > { %v2345_v35 = vpop.permute.xlu0 %2344 }
 0x93f   : > { %2354 = vst.msk [vmem:[#allocation2 + $0x2a] sm:$0x1] %vm2142_vm4, %v2345_v35 }
 0x942   : > { %v2377_v6 = vpop.permute.xlu0 %2376  ;;  %v2454_v62 = vld [vmem:[#allocation2 + $0x20] sm:$0xff] }
 0x943   : > { %2386 = vst.msk [vmem:[#allocation2 + $0x2c] sm:$0x1] %vm2142_vm4, %v2377_v6  ;;  %v2456_v44 = vsel %vm7174_vm7, -inf, %v2454_v62 }
 0x946   : > { %v2409_v25 = vpop.permute.xlu0 %2408 }
 0x947   : > { %2418 = vst.msk [vmem:[#allocation2 + $0x2e] sm:$0x1] %vm2142_vm4, %v2409_v25 }
 0x94e   : > { %v2455_v13 = vld [vmem:[#allocation2 + $0x28] sm:$0xff] }
 0x94f   : > { %v2457_v12 = vsel %vm7174_vm7, -inf, %v2455_v13 }
 0xa08   : > { %v7310_v54 = vpop.f32.mrb[12].mxu0 }
 0xa09   : > { %v7312_v5 = vpop.f32.mrb[13].mxu0 }
 0xa10   : > { %v5582_v46 = vpop.f32.mrb[14].mxu0 }
 0xa11   : > { %v7316_v14 = vadd.f32 %v5582_v46, %v2457_v12  ;;  %v3081_v29 = vpop.f32.mrb[15].mxu0 }
 0xa12   : > { %v7320_v23 = vadd.f32 %v3081_v29, %v2456_v44 }
 0xa13   : > { %v3093_v47 = vsel %vm2689_vm8, %v7316_v14, -inf }
 0xa14   : > { %3094 = vmax.xlane.f32.xlu1 %v3093_v47  ;;  %v3090_v41 = vsel %vm2689_vm8, %v7320_v23, -inf }
 0xa15   : > { %3091 = vmax.xlane.f32.xlu0 %v3090_v41 }
 0xa25   : > { %6092 = vrot.lane.b32.xlu1 %v7135_v27, %s7782_s14 }
 0xa29   : > { %3199 = vrot.lane.b32.xlu1 %v7129_v57, %s7714_s13 }
 0xa2d   : > { %3201 = vrot.lane.b32.xlu1 %v7127_v11, %s7714_s13  ;;  %s7716_s13 = smov 72  }
 0xa31   : > { %2185 = vrot.lane.b32.xlu1 %v2162_v61, %s7775_s22 }
 0xa35   : > { %2217 = vrot.lane.b32.xlu1 %v2162_v61, %s7724_s5 }
 0xa39   : > { %2249 = vrot.lane.b32.xlu1 %v2162_v61, %s7776_s9 }
 0xa3d   : > { %2330 = vrot.lane.b32.xlu1 %v2323_v40, %s7720_s8 }
 0xa41   : > { %2362 = vrot.lane.b32.xlu1 %v2323_v40, %s7781_s12 }
 0xa45   : > { %2394 = vrot.lane.b32.xlu1 %v2323_v40, %s7782_s14 }
 0xa49   : > { %2426 = vrot.lane.b32.xlu1 %v2323_v40, %s7783_s17 }
 0xaa1   : > { %v3095_v11 = vpop.xlane.xlu1 %3094 }
 0xaa2   : > { %v3097_v31 = vsub.f32 %v7316_v14, %v3095_v11  ;;  %v3092_v57 = vpop.xlane.xlu0 %3091 }
 0xaa3   : > { %v3096_v51 = vsub.f32 %v7320_v23, %v3092_v57 }
 0xaa4   : > { %v3100_v2 = vmul.f32 1.442695, %v3097_v31 }
 0xaa5   : > { %v3098_v24 = vmul.f32 1.442695, %v3096_v51  ;;  %v6093_v9 = vpop.permute.xlu1 %6092 }
 0xaa6   : > { %6298 = vpow2.f32 %v3100_v2  ;;  %v6095_v59 = vunpack.i.h.bf16 %v6093_v9  ;;  %v6094_v58 = vunpack.i.l.bf16 %v6093_v9 }
 0xaa7   : > { %6300 = vpow2.f32 %v3098_v24 }
 0xaa8   : > { %v5851_v4 = vpack.c.bf16 %v6095_v59, %v6094_v58 }
 0xaa9   : > { %v3200_v21 = vpop.permute.xlu1 %3199 }
 0xaaa   : > { %5852 = vmatprep.subr.bf16.mxu0 %v5851_v4 }
 0xaab   : > { %5854 = vmatpush3.bf16.msra.mxu0 %v5851_v4 }
 0xaad   : > { %v3202_v19 = vpop.permute.xlu1 %3201 }
 0xab0   : > { %v6299_v56 = vpop.eup %6298 }
 0xab1   : > { %v2186_v39 = vpop.permute.xlu1 %2185  ;;  %v3105_v22 = vsel %vm2689_vm8, %v6299_v56, 0.0  ;;  %v6301_v55 = vpop.eup %6300 }
 0xab2   : > { %2194 = vst.msk [vmem:[#allocation2 + $0x32] sm:$0x1] %vm2142_vm4, %v2186_v39  ;;  %3106 = vadd.xlane.f32.xlu0 %v3105_v22  ;;  %v3102_v52 = vsel %vm2689_vm8, %v6301_v55, 0.0 }
 0xab5   : > { %v2218_v33 = vpop.permute.xlu1 %2217 }
 0xab6   : > { %2226 = vst.msk [vmem:[#allocation2 + $0x34] sm:$0x1] %vm2142_vm4, %v2218_v33  ;;  %3103 = vadd.xlane.f32.xlu0 %v3102_v52 }
 0xab9   : > { %v2250_v34 = vpop.permute.xlu1 %2249 }
 0xaba   : > { %2258 = vst.msk [vmem:[#allocation2 + $0x36] sm:$0x1] %vm2142_vm4, %v2250_v34 }
 0xabd   : > { %v2331_v0 = vpop.permute.xlu1 %2330 }
 0xabe   : > { %2339 = vst.msk [vmem:[#allocation2 + $0x39] sm:$0x1] %vm2142_vm4, %v2331_v0 }
 0xac1   : > { %v2363_v60 = vpop.permute.xlu1 %2362 }
 0xac2   : > { %2371 = vst.msk [vmem:[#allocation2 + $0x3b] sm:$0x1] %vm2142_vm4, %v2363_v60 }
 0xac5   : > { %v2395_v42 = vpop.permute.xlu1 %2394 }
 0xac6   : > { %2403 = vst.msk [vmem:[#allocation2 + $0x3d] sm:$0x1] %vm2142_vm4, %v2395_v42 }
 0xac9   : > { %v2427_v17 = vpop.permute.xlu1 %2426 }
 0xaca   : > { %2435 = vst.msk [vmem:[#allocation2 + $0x3f] sm:$0x1] %vm2142_vm4, %v2427_v17 }
 0xacc   : > { %6097 = vrot.lane.b32.xlu0 %v7135_v27, %s7716_s13  ;;  %s7718_s13 = smov 8  }
 0xad0   : > { %2169 = vrot.lane.b32.xlu0 %v2162_v61, %s7720_s8  ;;  %s7785_s8 = sld [smem:[#allocation23_spill]] }
 0xad4   : > { %2201 = vrot.lane.b32.xlu0 %v2162_v61, %s7781_s12 }
 0xad8   : > { %2233 = vrot.lane.b32.xlu0 %v2162_v61, %s7782_s14 }
 0xadc   : > { %2265 = vrot.lane.b32.xlu0 %v2162_v61, %s7783_s17 }
 0xae0   : > { %2346 = vrot.lane.b32.xlu0 %v2323_v40, %s7775_s22 }
 0xae4   : > { %2378 = vrot.lane.b32.xlu0 %v2323_v40, %s7724_s5  ;;  %s7787_s5 = sld [smem:[#allocation28_spill]] }
 0xae8   : > { %2410 = vrot.lane.b32.xlu0 %v2323_v40, %s7776_s9  ;;  %s7717_s9 = smov 40  }
 0xb3f   : > { %v3107_v15 = vpop.xlane.xlu0 %3106 }
 0xb40   : > { %6302 = vrcp.f32 %v3107_v15 }
 0xb43   : > { %v3104_v45 = vpop.xlane.xlu0 %3103 }
 0xb44   : > { %6304 = vrcp.f32 %v3104_v45 }
 0xb47   : > { %v6098_v18 = vpop.permute.xlu0 %6097 }
 0xb48   : > { %v6100_v49 = vunpack.i.h.bf16 %v6098_v18  ;;  %v6099_v43 = vunpack.i.l.bf16 %v6098_v18 }
 0xb4a   : > { %v5855_v1 = vpack.c.bf16 %v6100_v49, %v6099_v43  ;;  %v6303_v20 = vpop.eup %6302 }
 0xb4b   : > { %v2170_v63 = vpop.permute.xlu0 %2169  ;;  %v3111_v10 = vmul.f32 %v6303_v20, %v6299_v56 }
 0xb4c   : > { %2178 = vst.msk [vmem:[#allocation2 + $0x31] sm:$0x1] %vm2142_vm4, %v2170_v63  ;;  %5857 = vmatprep.subr.msk.bf16.mxu0 %vm7155_vm6, %v5855_v1 }
 0xb4e   : > { %v6305_v28 = vpop.eup %6304 }
 0xb4f   : > { %v2202_v38 = vpop.permute.xlu0 %2201  ;;  %v3110_v48 = vmul.f32 %v6305_v28, %v6301_v55 }
 0xb50   : > { %2210 = vst.msk [vmem:[#allocation2 + $0x33] sm:$0x1] %vm2142_vm4, %v2202_v38 }
 0xb51   : > { %5587 = vmatprep.mubr.msk.f32.mxu0 %vm2689_vm8, %v3110_v48 }
 0xb52   : > { %5588 = vmatmul.mubr.msk.f32.vlgmr.msra.gmra.mrb[16].mxu0 %vm2689_vm8, %v3111_v10 }
 0xb53   : > { %5860 = vmatpush3.bf16.xpose.msk.msra.mxu0 %vm7155_vm6, %v5855_v1  ;;  %5594 = vmatprep.mubr.msk.f32.mxu0 %vm2605_vm5, %v3200_v21  ;;  %v2234_v16 = vpop.permute.xlu0 %2233 }
 0xb54   : > { %2242 = vst.msk [vmem:[#allocation2 + $0x35] sm:$0x1] %vm2142_vm4, %v2234_v16 }
 0xb57   : > { %v2266_v35 = vpop.permute.xlu0 %2265 }
 0xb58   : > { %2274 = vst.msk [vmem:[#allocation2 + $0x37] sm:$0x1] %vm2142_vm4, %v2266_v35 }
 0xb5a   : > { %5595 = vmatmul.mubr.msk.f32.vlgmr.msra.gmra.mrb[18].mxu0 %vm2605_vm5, %v3202_v19 }
 0xb5b   : > { %v2347_v6 = vpop.permute.xlu0 %2346 }
 0xb5c   : > { %2355 = vst.msk [vmem:[#allocation2 + $0x3a] sm:$0x1] %vm2142_vm4, %v2347_v6 }
 0xb5f   : > { %v2379_v25 = vpop.permute.xlu0 %2378  ;;  %v2459_v44 = vld [vmem:[#allocation2 + $0x30] sm:$0xff] }
 0xb60   : > { %2387 = vst.msk [vmem:[#allocation2 + $0x3c] sm:$0x1] %vm2142_vm4, %v2379_v25  ;;  %v2461_v61 = vsel %vm7174_vm7, -inf, %v2459_v44 }
 0xb63   : > { %v2411_v13 = vpop.permute.xlu0 %2410 }
 0xb64   : > { %2419 = vst.msk [vmem:[#allocation2 + $0x3e] sm:$0x1] %vm2142_vm4, %v2411_v13 }
 0xb6b   : > { %v2460_v46 = vld [vmem:[#allocation2 + $0x38] sm:$0xff] }
 0xb6c   : > { %v2462_v29 = vsel %vm7174_vm7, -inf, %v2460_v46 }
 0xc25   : > { %v5589_v62 = vpop.f32.mrb[16].mxu0 }
 0xc26   : > { %v3190_v12 = vpop.f32.mrb[17].mxu0 }
 0xc2d   : > { %v5596_v47 = vpop.f32.mrb[18].mxu0 }
 0xc2e   : > { %v7380_v41 = vadd.f32 %v5596_v47, %v2462_v29  ;;  %v3281_v40 = vpop.f32.mrb[19].mxu0 }
 0xc2f   : > { %v7384_v11 = vadd.f32 %v3281_v40, %v2461_v61 }
 0xc30   : > { %v3293_v31 = vsel %vm2689_vm8, %v7380_v41, -inf }
 0xc31   : > { %3294 = vmax.xlane.f32.xlu1 %v3293_v31  ;;  %v3290_v57 = vsel %vm2689_vm8, %v7384_v11, -inf }
 0xc32   : > { %3291 = vmax.xlane.f32.xlu0 %v3290_v57 }
 0xc42   : > { %6102 = vrot.lane.b32.xlu1 %v7135_v27, %s7717_s9  ;;  %s7784_s9 = sld [smem:[#allocation22_spill]] }
 0xc46   : > { %3403 = vrot.lane.b32.xlu1 %v7310_v54, %s7718_s13 }
 0xc48   : > { %v3430_v60 = vld [vmem:[%s7784_s9] sm:$0xff]  ;;  %v3431_v42 = vld [vmem:[%s7784_s9 + $0x8] sm:$0xff]  ;;  %v3432_v17 = vld [vmem:[%s7784_s9 + $0x10] sm:$0xff] }
 0xc49   : > { %v5865_v15 = vpack.c.bf16 %v3431_v42, %v3430_v60 }
 0xc4a   : > { %3409 = vrot.lane.b32.xlu1 %v3190_v12, %s7783_s17 }
 0xcbe   : > { %v3295_v3 = vpop.xlane.xlu1 %3294 }
 0xcbf   : > { %v3297_v51 = vsub.f32 %v7380_v41, %v3295_v3  ;;  %v3292_v2 = vpop.xlane.xlu0 %3291 }
 0xcc0   : > { %v3296_v24 = vsub.f32 %v7384_v11, %v3292_v2 }
 0xcc1   : > { %v3300_v9 = vmul.f32 1.442695, %v3297_v51 }
 0xcc2   : > { %v3298_v59 = vmul.f32 1.442695, %v3296_v24  ;;  %v6103_v58 = vpop.permute.xlu1 %6102 }
 0xcc3   : > { %v6105_v4 = vunpack.i.h.bf16 %v6103_v58  ;;  %v6104_v21 = vunpack.i.l.bf16 %v6103_v58 }
 0xcc4   : > { %6306 = vpow2.f32 %v3298_v59 }
 0xcc5   : > { %v5861_v19 = vpack.c.bf16 %v6105_v4, %v6104_v21  ;;  %6308 = vpow2.f32 %v3300_v9 }
 0xcc6   : > { %v3404_v1 = vpop.permute.xlu1 %3403 }
 0xcc7   : > { %5862 = vmatprep.subr.bf16.mxu0 %v5861_v19  ;;  %v3424_v48 = vsel %vm2605_vm5, %v7242_v36, %v3404_v1 }
 0xcc8   : > { %5864 = vmatpush3.bf16.msra.mxu0 %v5861_v19 }
 0xcc9   : > { %5866 = vmatprep.subr.bf16.mxu0 %v5865_v15 }
 0xcca   : > { %v3410_v20 = vpop.permute.xlu1 %3409 }
 0xcce   : > { %v6307_v27 = vpop.eup %6306 }
 0xccf   : > { %v3302_v54 = vsel %vm2689_vm8, %v6307_v27, 0.0  ;;  %v6309_v56 = vpop.eup %6308 }
 0xcd0   : > { %3303 = vadd.xlane.f32.xlu0 %v3302_v54  ;;  %v3305_v39 = vsel %vm2689_vm8, %v6309_v56, 0.0  ;;  %v3673_v54 = vld [vmem:[%s7787_s5 + $0x8] sm:$0xff] }
 0xcd4   : > { %3306 = vadd.xlane.f32.xlu0 %v3305_v39 }
 0xcea   : > { %3401 = vrot.lane.b32.xlu0 %v7312_v5, %s7718_s13  ;;  %v3433_v5 = vld [vmem:[%s7784_s9 + $0x18] sm:$0xff]  ;;  %s7722_s13 = smov 24  }
 0xceb   : > { %v5869_v45 = vpack.c.bf16 %v3433_v5, %v3432_v17 }
 0xcee   : > { %3411 = vrot.lane.b32.xlu0 %v5589_v62, %s7783_s17 }
 0xd5d   : > { %v3304_v22 = vpop.xlane.xlu0 %3303 }
 0xd5e   : > { %6310 = vrcp.f32 %v3304_v22  ;;  %v3675_v22 = vld [vmem:[%s7787_s5 + $0x18] sm:$0xff] }
 0xd61   : > { %v3307_v55 = vpop.xlane.xlu0 %3306 }
 0xd62   : > { %6312 = vrcp.f32 %v3307_v55 }
 0xd65   : > { %v3402_v43 = vpop.permute.xlu0 %3401 }
 0xd66   : > { %v3423_v28 = vsel %vm2605_vm5, %v7244_v50, %v3402_v43  ;;  %v5322_v50 = vld [vmem:[%s7785_s8] ss:$0 sm:$0xff] }
 0xd67   : > { %v3425_v16 = vsel %vm2689_vm8, %v3423_v28, %v3410_v20 }
 0xd68   : > { %v6311_v33 = vpop.eup %6310 }
 0xd69   : > { %v3310_v52 = vmul.f32 %v6311_v33, %v6307_v27  ;;  %v3412_v63 = vpop.permute.xlu0 %3411  ;;  %v3672_v27 = vld [vmem:[%s7787_s5] sm:$0xff] }
 0xd6a   : > { %v3426_v35 = vsel %vm2689_vm8, %v3424_v48, %v3412_v63  ;;  %v5881_v39 = vpack.c.bf16 %v3673_v54, %v3672_v27  ;;  %v3676_v33 = vld [vmem:[%s7787_s5 + $0x20] sm:$0xff] }
 0xd6b   : > { %5601 = vmatprep.mubr.msk.f32.mxu0 %vm2689_vm8, %v3310_v52  ;;  %v3677_v52 = vld [vmem:[%s7787_s5 + $0x28] sm:$0xff]  ;;  %v5324_v63 = vld [vmem:[%s7789_s21] ss:$0 sm:$0xff] }
 0xd6c   : > { %v6313_v34 = vpop.eup %6312  ;;  %5882 = vmatprep.subr.bf16.mxu1 %v5881_v39 }
 0xd6d   : > { %v3311_v0 = vmul.f32 %v6313_v34, %v6309_v56  ;;  %v3674_v56 = vld [vmem:[%s7787_s5 + $0x10] sm:$0xff]  ;;  %5884 = vmatpush3.bf16.msra.mxu1 %v5881_v39  ;;  %v5889_v34 = vpack.c.bf16 %v3677_v52, %v3676_v33  ;;  %v5335_v52 = vld [vmem:[%s7770_s2 + $0x20] sm:$0xff] }
 0xd6e   : > { %v5885_v55 = vpack.c.bf16 %v3675_v22, %v3674_v56 }
 0xd6f   : > { %5602 = vmatmul.mubr.msk.f32.vlgmr.msra.gmra.mrb[20].mxu0 %vm2689_vm8, %v3311_v0 }
 0xd70   : > { %5868 = vmatpush3.bf16.msra.mxu0 %v5865_v15  ;;  %5886 = vmatprep.subr.bf16.mxu1 %v5885_v55 }
 0xd71   : > { %5870 = vmatprep.subr.bf16.mxu0 %v5869_v45  ;;  %5888 = vmatpush3.bf16.msra.mxu1 %v5885_v55 }
 0xd72   : > { %5890 = vmatprep.subr.bf16.mxu1 %v5889_v34 }
 0xd74   : > { %5872 = vmatpush3.bf16.msra.mxu0 %v5869_v45 }
 0xd75   : > { %5892 = vmatpush3.bf16.msra.mxu1 %v5889_v34  ;;  %v5336_v34 = vld [vmem:[%s7770_s2 + $0x28] sm:$0xff] }
 0xe42   : > { %v5603_v18 = vpop.f32.mrb[20].mxu0 }
 0xe43   : > { %3419 = vrot.lane.b32.xlu0 %v5603_v18, %s7722_s13  ;;  %v3390_v49 = vpop.f32.mrb[21].mxu0  ;;  %v5323_v18 = vld [vmem:[%s7788_s19] ss:$0 sm:$0xff] }
 0xe44   : > { %3417 = vrot.lane.b32.xlu1 %v3390_v49, %s7722_s13  ;;  %s7786_s13 = sld [smem:[#allocation26_spill]] }
 0xe4a   : > { %v3570_v9 = vld [vmem:[%s7786_s13] sm:$0xff]  ;;  %v3571_v59 = vld [vmem:[%s7786_s13 + $0x8] sm:$0xff]  ;;  %v3572_v58 = vld [vmem:[%s7786_s13 + $0x10] sm:$0xff] }
 0xe4b   : > { %v5873_v4 = vpack.c.bf16 %v3571_v59, %v3570_v9  ;;  %v3573_v21 = vld [vmem:[%s7786_s13 + $0x18] sm:$0xff] }
 0xe4c   : > { %v5877_v19 = vpack.c.bf16 %v3573_v21, %v3572_v58 }
 0xe4d   : > { %5874 = vmatprep.subr.bf16.mxu0 %v5873_v4 }
 0xeb5   : > { %v3420_v38 = vpop.permute.xlu0 %3419 }
 0xeb6   : > { %v3418_v10 = vpop.permute.xlu1 %3417  ;;  %v3429_v25 = vsel %vm3427_vm9, %v3426_v35, %v3420_v38 }
 0xeb7   : > { %v3428_v6 = vsel %vm3427_vm9, %v3425_v16, %v3418_v10  ;;  %v3678_v10 = vld [vmem:[%s7787_s5 + $0x30] sm:$0xff]  ;;  %v3679_v16 = vld [vmem:[%s7787_s5 + $0x38] sm:$0xff] }
 0xeb8   : > { %5612 = vmatprep.mubr.msk.f32.mxu0 %vm1050_vm3, %v3428_v6  ;;  %v5893_v35 = vpack.c.bf16 %v3679_v16, %v3678_v10  ;;  %v5325_v6 = vld [vmem:[%s7790_s24] ss:$0 sm:$0xff] }
 0xeb9   : > { %5613 = vmatmul.mubr.msk.f32.vlgmr.msra.gmra.mrb[22].mxu0 %vm1050_vm3, %v3429_v25 }
 0xeba   : > { %5876 = vmatpush3.bf16.msra.mxu0 %v5873_v4  ;;  %5894 = vmatprep.subr.bf16.mxu1 %v5893_v35 }
 0xebb   : > { %5878 = vmatprep.subr.bf16.mxu0 %v5877_v19  ;;  %5896 = vmatpush3.bf16.msra.mxu1 %v5893_v35 }
 0xebe   : > { %5880 = vmatpush3.bf16.msra.mxu0 %v5877_v19 }
 0xf8c   : > { %v5614_v13 = vpop.f32.mrb[22].mxu0 }
 0xf8d   : > { %v3516_v62 = vadd.f32 %v5614_v13, %v6853_v30  ;;  %v3506_v12 = vpop.f32.mrb[23].mxu0 }
 0xf8e   : > { %v3515_v36 = vadd.f32 %v3506_v12, %v6857_v32 }
 0xf8f   : > { %v7423_v46 = vadd.f32 %v5322_v50, %v3516_v62 }
 0xf90   : > { %v7425_v44 = vadd.f32 %v5322_v50, %v3515_v36 }
 0xf91   : > { %v3531_v29 = vsel %vm1050_vm3, %v7423_v46, 0.0 }
 0xf92   : > { %3532 = vadd.xlane.f32.xlu0 %v3531_v29  ;;  %v3528_v47 = vsel %vm1050_vm3, %v7425_v44, 0.0 }
 0xf93   : > { %3529 = vadd.xlane.f32.xlu1 %v3528_v47 }
0x101f   : > { %v3533_v61 = vpop.xlane.xlu0 %3532 }
0x1020   : > { %v3535_v30 = vmul.f32 0.03125, %v3533_v61  ;;  %v3530_v40 = vpop.xlane.xlu1 %3529 }
0x1021   : > { %v3534_v32 = vmul.f32 0.03125, %v3530_v40 }
0x1022   : > { %v3537_v31 = vsub.f32 %v7423_v46, %v3535_v30 }
0x1023   : > { %v3536_v57 = vsub.f32 %v7425_v44, %v3534_v32 }
0x1024   : > { %v3539_v3 = vmul.f32 %v3537_v31, %v3537_v31 }
0x1025   : > { %v3538_v51 = vmul.f32 %v3536_v57, %v3536_v57 }
0x1026   : > { %v3543_v2 = vsel %vm1050_vm3, %v3539_v3, 0.0 }
0x1027   : > { %3544 = vadd.xlane.f32.xlu1 %v3543_v2  ;;  %v3540_v24 = vsel %vm1050_vm3, %v3538_v51, 0.0  ;;  %v5330_v51 = vld [vmem:[%s7756_s6] ss:$0 sm:$0xff] }
0x1028   : > { %3541 = vadd.xlane.f32.xlu0 %v3540_v24 }
0x10b4   : > { %v3545_v0 = vpop.xlane.xlu1 %3544 }
0x10b5   : > { %v3547_v60 = vmul.f32 0.03125, %v3545_v0  ;;  %v3542_v42 = vpop.xlane.xlu0 %3541  ;;  %v5337_v0 = vld [vmem:[%s7770_s2 + $0x30] sm:$0xff] }
0x10b6   : > { %v3546_v17 = vmul.f32 0.03125, %v3542_v42  ;;  %v5338_v42 = vld [vmem:[%s7770_s2 + $0x38] sm:$0xff]  ;;  %s7791_s2 = smov 88  }
0x10b7   : > { %v3549_v15 = vadd.f32 1e-05, %v3547_v60  ;;  %v5897_v60 = vpack.c.bf16 %v5336_v34, %v5335_v52 }
0x10b8   : > { %v3548_v5 = vadd.f32 1e-05, %v3546_v17  ;;  %v5901_v17 = vpack.c.bf16 %v5338_v42, %v5337_v0 }
0x10b9   : > { %6314 = vrsqrt.f32 %v3549_v15  ;;  %5898 = vmatprep.subr.bf16.mxu0 %v5897_v60 }
0x10ba   : > { %6316 = vrsqrt.f32 %v3548_v5 }
0x10c3   : > { %v6315_v45 = vpop.eup %6314 }
0x10c4   : > { %v6317_v49 = vpop.eup %6316  ;;  %v3553_v43 = vmul.f32 %v6315_v45, %v3537_v31 }
0x10c5   : > { %v3552_v1 = vmul.f32 %v6317_v49, %v3536_v57 }
0x10c6   : > { %v3561_v20 = vmul.f32 %v5323_v18, %v3553_v43 }
0x10c7   : > { %v3560_v28 = vmul.f32 %v5323_v18, %v3552_v1 }
0x10c8   : > { %v3569_v48 = vadd.f32 %v5324_v63, %v3561_v20 }
0x10c9   : > { %v3568_v38 = vadd.f32 %v5324_v63, %v3560_v28  ;;  %v5333_v63 = vld [vmem:[%s7772_s23 + $0x1] ss:$0 sm:$0xff] }
0x10cb   : > { %5623 = vmatprep.mubr.msk.f32.mxu0 %vm1050_vm3, %v3568_v38 }
0x10cc   : > { %5624 = vmatmul.mubr.msk.f32.vlgmr.msra.gmra.mrb[24].mxu0 %vm1050_vm3, %v3569_v48  ;;  %v5334_v48 = vld [vmem:[%s7773_s16 + $0x1] ss:$0 sm:$0xff] }
0x10cd   : > { %5900 = vmatpush3.bf16.msra.mxu0 %v5897_v60 }
0x10ce   : > { %5902 = vmatprep.subr.bf16.mxu0 %v5901_v17 }
0x10d1   : > { %5904 = vmatpush3.bf16.msra.mxu0 %v5901_v17 }
0x119f   : > { %v5625_v25 = vpop.f32.mrb[24].mxu0 }
0x11a0   : > { %v3659_v13 = vadd.f32 %v5625_v25, %v5325_v6  ;;  %v3653_v50 = vpop.f32.mrb[25].mxu0  ;;  %v5340_v25 = vld [vmem:[%s7774_s3 + $0x1] ss:$0 sm:$0xff]  ;;  %s7792_s3 = smov 120  }
0x11a1   : > { %v3654_v62 = vadd.f32 %v5325_v6, %v3653_v50 }
0x11a2   : > { %v3665_v12 = vmul.f32 0.70710677, %v3659_v13  ;;  %v3663_v32 = vmul.f32 0.5, %v3659_v13 }
0x11a3   : > { %v3664_v36 = vmul.f32 0.70710677, %v3654_v62  ;;  %v3662_v30 = vmul.f32 0.5, %v3654_v62 }
0x11a4   : > { %6318 = verf.f32 %v3665_v12 }
0x11a5   : > { %6320 = verf.f32 %v3664_v36 }
0x11ae   : > { %v6319_v29 = vpop.eup %6318 }
0x11af   : > { %v6321_v47 = vpop.eup %6320  ;;  %v3669_v61 = vadd.f32 1.0, %v6319_v29 }
0x11b0   : > { %v3668_v40 = vadd.f32 1.0, %v6321_v47 }
0x11b1   : > { %v3671_v57 = vmul.f32 %v3669_v61, %v3663_v32 }
0x11b2   : > { %v3670_v31 = vmul.f32 %v3668_v40, %v3662_v30 }
0x11b4   : > { %5642 = vmatprep.mubr.msk.f32.mxu1 %vm3680_vm10, %v3670_v31 }
0x11b5   : > { %5643 = vmatmul.mubr.msk.f32.vlgmr.msra.gmra.mrb[32].mxu1 %vm3680_vm10, %v3671_v57 }
0x1288   : > { %v5644_v3 = vpop.f32.mrb[32].mxu1 }
0x1289   : > { %v3763_v2 = vadd.f32 %v5644_v3, %v7423_v46  ;;  %v3753_v24 = vpop.f32.mrb[33].mxu1 }
0x128a   : > { %v3762_v9 = vadd.f32 %v3753_v24, %v7425_v44 }
0x128b   : > { %v7457_v59 = vadd.f32 %v5330_v51, %v3763_v2 }
0x128c   : > { %v7459_v58 = vadd.f32 %v5330_v51, %v3762_v9 }
0x128d   : > { %v3780_v4 = vsel %vm1050_vm3, %v7457_v59, 0.0 }
0x128e   : > { %3781 = vadd.xlane.f32.xlu1 %v3780_v4  ;;  %v3777_v21 = vsel %vm1050_vm3, %v7459_v58, 0.0 }
0x128f   : > { %3778 = vadd.xlane.f32.xlu0 %v3777_v21 }
0x131b   : > { %v3782_v19 = vpop.xlane.xlu1 %3781 }
0x131c   : > { %v3784_v46 = vmul.f32 0.03125, %v3782_v19  ;;  %v3779_v27 = vpop.xlane.xlu0 %3778 }
0x131d   : > { %v3783_v44 = vmul.f32 0.03125, %v3779_v27 }
0x131e   : > { %v3786_v54 = vsub.f32 %v7457_v59, %v3784_v46 }
0x131f   : > { %v3785_v56 = vsub.f32 %v7459_v58, %v3783_v44 }
0x1320   : > { %v3788_v39 = vmul.f32 %v3786_v54, %v3786_v54 }
0x1321   : > { %v3787_v22 = vmul.f32 %v3785_v56, %v3785_v56 }
0x1322   : > { %v3792_v55 = vsel %vm1050_vm3, %v3788_v39, 0.0 }
0x1323   : > { %3793 = vadd.xlane.f32.xlu1 %v3792_v55  ;;  %v3789_v33 = vsel %vm1050_vm3, %v3787_v22, 0.0 }
0x1324   : > { %3790 = vadd.xlane.f32.xlu0 %v3789_v33 }
0x13b0   : > { %v3794_v15 = vpop.xlane.xlu1 %3793 }
0x13b1   : > { %v3796_v5 = vmul.f32 0.03125, %v3794_v15  ;;  %v3791_v45 = vpop.xlane.xlu0 %3790 }
0x13b2   : > { %v3795_v18 = vmul.f32 0.03125, %v3791_v45 }
0x13b3   : > { %v3798_v49 = vadd.f32 1e-05, %v3796_v5 }
0x13b4   : > { %v3797_v43 = vadd.f32 1e-05, %v3795_v18 }
0x13b5   : > { %6322 = vrsqrt.f32 %v3798_v49 }
0x13b6   : > { %6324 = vrsqrt.f32 %v3797_v43 }
0x13bf   : > { %v6323_v1 = vpop.eup %6322 }
0x13c0   : > { %v6325_v20 = vpop.eup %6324  ;;  %v3802_v28 = vmul.f32 %v6323_v1, %v3786_v54 }
0x13c1   : > { %v3801_v38 = vmul.f32 %v6325_v20, %v3785_v56 }
0x13c2   : > { %v3810_v10 = vmul.f32 %v5333_v63, %v3802_v28 }
0x13c3   : > { %v3809_v16 = vmul.f32 %v5333_v63, %v3801_v38 }
0x13c4   : > { %v3818_v6 = vadd.f32 %v5334_v48, %v3810_v10 }
0x13c5   : > { %v3817_v35 = vadd.f32 %v5334_v48, %v3809_v16 }
0x13c7   : > { %5653 = vmatprep.mubr.msk.f32.mxu0 %vm1050_vm3, %v3817_v35 }
0x13c8   : > { %5654 = vmatmul.mubr.msk.f32.vlgmr.msra.gmra.mrb[26].mxu0 %vm1050_vm3, %v3818_v6 }
0x149b   : > { %v5655_v13 = vpop.f32.mrb[26].mxu0 }
0x149c   : > { %v7478_v50 = vadd.f32 %v5655_v13, %v5340_v25  ;;  %v3904_v62 = vpop.f32.mrb[27].mxu0 }
0x149d   : > { %v7480_v12 = vadd.f32 %v5340_v25, %v3904_v62 }
0x149f   : > { %5660 = vmatprep.mubr.msk.f32.mxu0 %vm2605_vm5, %v7480_v12  ;;  %v7486_v36 = vpack.i.bf16 %v7478_v50, %v7480_v12 }
0x14a1   : > { %6112 = vrot.lane.b32.xlu1 %v7486_v36, %s7791_s2  ;;  %6107 = vrot.lane.b32.xlu0 %v7486_v36, %s7775_s22  ;;  %s7794_s2 = smov 64   ;;  %s7796_s22 = smov 72  }
0x14a5   : > { %4111 = vrot.lane.b32.xlu1 %v7480_v12, %s7792_s3  ;;  %4113 = vrot.lane.b32.xlu0 %v7478_v50, %s7792_s3  ;;  %s7793_s3 = smov 56  }
0x1513   : > { %v6113_v29 = vpop.permute.xlu1 %6112  ;;  %v6108_v47 = vpop.permute.xlu0 %6107 }
0x1514   : > { %v6115_v61 = vunpack.i.h.bf16 %v6113_v29  ;;  %v6114_v30 = vunpack.i.l.bf16 %v6113_v29  ;;  %v6110_v40 = vunpack.i.h.bf16 %v6108_v47  ;;  %v6109_v32 = vunpack.i.l.bf16 %v6108_v47 }
0x1516   : > { %v5905_v31 = vpack.c.bf16 %v6110_v40, %v6109_v32  ;;  %v5915_v57 = vpack.c.bf16 %v6115_v61, %v6114_v30 }
0x1517   : > { %v4112_v3 = vpop.permute.xlu1 %4111  ;;  %v4114_v51 = vpop.permute.xlu0 %4113 }
0x1518   : > { %5907 = vmatprep.subr.msk.bf16.mxu0 %vm7155_vm6, %v5905_v31 }
0x1519   : > { %5910 = vmatpush3.bf16.xpose.msk.msra.mxu0 %vm7155_vm6, %v5905_v31 }
0x151a   : > { %5917 = vmatprep.subr.msk.bf16.mxu0 %vm7155_vm6, %v5915_v57 }
0x1520   : > { %5661 = vmatmul.mubr.msk.f32.vlgmr.msra.gmra.mrb[28].mxu0 %vm2605_vm5, %v7478_v50 }
0x1521   : > { %5920 = vmatpush3.bf16.xpose.msk.msra.mxu0 %vm7155_vm6, %v5915_v57  ;;  %5674 = vmatprep.mubr.msk.f32.mxu0 %vm2605_vm5, %v4112_v3 }
0x1528   : > { %5675 = vmatmul.mubr.msk.f32.vlgmr.msra.gmra.mrb[30].mxu0 %vm2605_vm5, %v4114_v51 }
0x15f3   : > { %v5662_v2 = vpop.f32.mrb[28].mxu0 }
0x15f4   : > { %v3999_v24 = vadd.f32 %v5662_v2, %v7180_v26  ;;  %v3993_v9 = vpop.f32.mrb[29].mxu0 }
0x15f5   : > { %v3994_v4 = vadd.f32 %v3993_v9, %v7184_v37 }
0x15f6   : > { %v4005_v21 = vsel %vm2689_vm8, %v3999_v24, -inf }
0x15f7   : > { %4006 = vmax.xlane.f32.xlu0 %v4005_v21  ;;  %v4002_v19 = vsel %vm2689_vm8, %v3994_v4, -inf }
0x15f8   : > { %4003 = vmax.xlane.f32.xlu1 %v4002_v19 }
0x15fb   : > { %v5676_v46 = vpop.f32.mrb[30].mxu0 }
0x15fc   : > { %v4199_v27 = vadd.f32 %v5676_v46, %v7248_v8  ;;  %v4193_v44 = vpop.f32.mrb[31].mxu0 }
0x15fd   : > { %v4194_v54 = vadd.f32 %v4193_v44, %v7252_v53 }
0x15fe   : > { %v4205_v56 = vsel %vm2689_vm8, %v4199_v27, -inf }
0x15ff   : > { %4206 = vmax.xlane.f32.xlu1 %v4205_v56  ;;  %v4202_v26 = vsel %vm2689_vm8, %v4194_v54, -inf }
0x1600   : > { %4203 = vmax.xlane.f32.xlu0 %v4202_v26 }
0x1684   : > { %v4007_v39 = vpop.xlane.xlu0 %4006 }
0x1685   : > { %v4009_v37 = vsub.f32 %v3999_v24, %v4007_v39  ;;  %v4004_v22 = vpop.xlane.xlu1 %4003 }
0x1686   : > { %v4008_v55 = vsub.f32 %v3994_v4, %v4004_v22 }
0x1687   : > { %v4012_v33 = vmul.f32 1.442695, %v4009_v37 }
0x1688   : > { %v4010_v52 = vmul.f32 1.442695, %v4008_v55 }
0x1689   : > { %6326 = vpow2.f32 %v4012_v33 }
0x168a   : > { %6328 = vpow2.f32 %v4010_v52 }
0x168c   : > { %v4207_v42 = vpop.xlane.xlu1 %4206 }
0x168d   : > { %v4204_v60 = vpop.xlane.xlu0 %4203  ;;  %v4209_v15 = vsub.f32 %v4199_v27, %v4207_v42 }
0x168e   : > { %v4208_v17 = vsub.f32 %v4194_v54, %v4204_v60 }
0x168f   : > { %v4212_v45 = vmul.f32 1.442695, %v4209_v15 }
0x1690   : > { %v4210_v5 = vmul.f32 1.442695, %v4208_v17 }
0x1692   : > { %6330 = vpow2.f32 %v4210_v5 }
0x1693   : > { %v6327_v34 = vpop.eup %6326  ;;  %6332 = vpow2.f32 %v4212_v45 }
0x1694   : > { %v6329_v0 = vpop.eup %6328  ;;  %v4017_v8 = vsel %vm2689_vm8, %v6327_v34, 0.0 }
0x1695   : > { %4018 = vadd.xlane.f32.xlu1 %v4017_v8  ;;  %v4014_v53 = vsel %vm2689_vm8, %v6329_v0, 0.0 }
0x1696   : > { %4015 = vadd.xlane.f32.xlu0 %v4014_v53 }
0x169c   : > { %v6331_v18 = vpop.eup %6330 }
0x169d   : > { %v6333_v49 = vpop.eup %6332  ;;  %v4214_v43 = vsel %vm2689_vm8, %v6331_v18, 0.0 }
0x169e   : > { %v4217_v1 = vsel %vm2689_vm8, %v6333_v49, 0.0 }
0x16a6   : > { %6122 = vrot.lane.b32.xlu1 %v7486_v36, %s7793_s3  ;;  %s7797_s3 = smov 104  }
0x16aa   : > { %6127 = vrot.lane.b32.xlu1 %v7486_v36, %s7781_s12  ;;  %s7795_s12 = smov 112  }
0x16ac   : > { %6117 = vrot.lane.b32.xlu0 %v7486_v36, %s7794_s2  ;;  %s7798_s2 = smov 40  }
0x16cb   : > { %4215 = vadd.xlane.f32.xlu0 %v4214_v43 }
0x16ce   : > { %4218 = vadd.xlane.f32.xlu1 %v4217_v1 }
0x16df   : > { %4311 = vrot.lane.b32.xlu1 %v7480_v12, %s7795_s12 }
0x16e1   : > { %6132 = vrot.lane.b32.xlu0 %v7486_v36, %s7796_s22 }
0x16e3   : > { %4511 = vrot.lane.b32.xlu1 %v7480_v12, %s7797_s3 }
0x16e5   : > { %4313 = vrot.lane.b32.xlu0 %v7478_v50, %s7795_s12  ;;  %s7799_s12 = smov 8  }
0x16e9   : > { %4513 = vrot.lane.b32.xlu0 %v7478_v50, %s7797_s3  ;;  %s5408_s3 = sshll.u32 %s6659_s0, 8 }
0x1722   : > { %v4019_v63 = vpop.xlane.xlu1 %4018 }
0x1723   : > { %6334 = vrcp.f32 %v4019_v63  ;;  %v4016_v20 = vpop.xlane.xlu0 %4015 }
0x1724   : > { %6336 = vrcp.f32 %v4016_v20 }
0x1726   : > { %v6123_v28 = vpop.permute.xlu1 %6122 }
0x1727   : > { %v6118_v38 = vpop.permute.xlu0 %6117  ;;  %v6125_v48 = vunpack.i.h.bf16 %v6123_v28  ;;  %v6124_v10 = vunpack.i.l.bf16 %v6123_v28 }
0x1728   : > { %v6120_v16 = vunpack.i.h.bf16 %v6118_v38  ;;  %v6119_v35 = vunpack.i.l.bf16 %v6118_v38 }
0x1729   : > { %v5921_v13 = vpack.c.bf16 %v6125_v48, %v6124_v10 }
0x172a   : > { %v5911_v6 = vpack.c.bf16 %v6120_v16, %v6119_v35  ;;  %v6128_v25 = vpop.permute.xlu1 %6127 }
0x172b   : > { %v6130_v29 = vunpack.i.h.bf16 %v6128_v25  ;;  %v6129_v47 = vunpack.i.l.bf16 %v6128_v25 }
0x172c   : > { %5912 = vmatprep.subr.bf16.mxu1 %v5911_v6 }
0x172d   : > { %v6335_v62 = vpop.eup %6334  ;;  %5914 = vmatpush3.bf16.msra.mxu1 %v5911_v6  ;;  %v5925_v30 = vpack.c.bf16 %v6130_v29, %v6129_v47 }
0x172e   : > { %v6337_v12 = vpop.eup %6336  ;;  %5922 = vmatprep.subr.bf16.mxu1 %v5921_v13  ;;  %v4023_v61 = vmul.f32 %v6335_v62, %v6327_v34 }
0x172f   : > { %v4022_v50 = vmul.f32 %v6337_v12, %v6329_v0 }
0x1731   : > { %5667 = vmatprep.mubr.msk.f32.mxu1 %vm2689_vm8, %v4022_v50 }
0x1732   : > { %5668 = vmatmul.mubr.msk.f32.vlgmr.msra.gmra.mrb[34].mxu1 %vm2689_vm8, %v4023_v61 }
0x1733   : > { %5924 = vmatpush3.bf16.msra.mxu1 %v5921_v13 }
0x1734   : > { %5927 = vmatprep.subr.msk.bf16.mxu1 %vm7155_vm6, %v5925_v30 }
0x1758   : > { %v4216_v40 = vpop.xlane.xlu0 %4215 }
0x1759   : > { %6338 = vrcp.f32 %v4216_v40 }
0x175b   : > { %v4219_v32 = vpop.xlane.xlu1 %4218 }
0x175c   : > { %6340 = vrcp.f32 %v4219_v32  ;;  %v6133_v31 = vpop.permute.xlu0 %6132 }
0x175d   : > { %v6135_v57 = vunpack.i.h.bf16 %v6133_v31  ;;  %v6134_v3 = vunpack.i.l.bf16 %v6133_v31 }
0x175f   : > { %v5935_v51 = vpack.c.bf16 %v6135_v57, %v6134_v3  ;;  %v4312_v2 = vpop.permute.xlu1 %4311 }
0x1760   : > { %v4314_v24 = vpop.permute.xlu0 %4313 }
0x1761   : > { %5937 = vmatprep.subr.msk.bf16.mxu0 %vm7155_vm6, %v5935_v51 }
0x1762   : > { %5940 = vmatpush3.bf16.xpose.msk.msra.mxu0 %vm7155_vm6, %v5935_v51 }
0x1763   : > { %v6339_v9 = vpop.eup %6338  ;;  %v4512_v4 = vpop.permute.xlu1 %4511 }
0x1764   : > { %5702 = vmatprep.mubr.msk.f32.mxu0 %vm2605_vm5, %v4512_v4  ;;  %v4222_v21 = vmul.f32 %v6339_v9, %v6331_v18  ;;  %v4514_v27 = vpop.permute.xlu0 %4513  ;;  %v5367_v9 = vld [vmem:[%s7784_s9 + $0x20] sm:$0xff]  ;;  %v5368_v4 = vld [vmem:[%s7784_s9 + $0x28] sm:$0xff] }
0x1766   : > { %v6341_v19 = vpop.eup %6340  ;;  %5681 = vmatprep.mubr.msk.f32.mxu1 %vm2689_vm8, %v4222_v21  ;;  %v5945_v21 = vpack.c.bf16 %v5368_v4, %v5367_v9  ;;  %v5388_v9 = vld [vmem:[%s7787_s5 + $0x48] sm:$0xff] }
0x1767   : > { %v4223_v46 = vmul.f32 %v6341_v19, %v6333_v49  ;;  %v5369_v19 = vld [vmem:[%s7784_s9 + $0x30] sm:$0xff] }
0x1769   : > { %5682 = vmatmul.mubr.msk.f32.vlgmr.msra.gmra.mrb[36].mxu1 %vm2689_vm8, %v4223_v46  ;;  %5703 = vmatmul.mubr.msk.f32.vlgmr.msra.gmra.mrb[32].mxu0 %vm2605_vm5, %v4514_v27  ;;  %v5370_v46 = vld [vmem:[%s7784_s9 + $0x38] sm:$0xff] }
0x176a   : > { %5930 = vmatpush3.bf16.xpose.msk.msra.mxu1 %vm7155_vm6, %v5925_v30  ;;  %5688 = vmatprep.mubr.msk.f32.mxu1 %vm2605_vm5, %v4312_v2  ;;  %v5949_v27 = vpack.c.bf16 %v5370_v46, %v5369_v19  ;;  %v5390_v19 = vld [vmem:[%s7787_s5 + $0x58] sm:$0xff]  ;;  %v5391_v46 = vld [vmem:[%s7787_s5 + $0x60] sm:$0xff] }
0x1771   : > { %5689 = vmatmul.mubr.msk.f32.vlgmr.msra.gmra.mrb[38].mxu1 %vm2605_vm5, %v4314_v24 }
0x1805   : > { %v7552_v44 = vpop.f32.mrb[34].mxu1 }
0x1806   : > { %v7554_v54 = vpop.f32.mrb[35].mxu1 }
0x183c   : > { %v5683_v56 = vpop.f32.mrb[36].mxu1  ;;  %v5704_v26 = vpop.f32.mrb[32].mxu0 }
0x183d   : > { %v4302_v39 = vpop.f32.mrb[37].mxu1  ;;  %v4593_v37 = vpop.f32.mrb[33].mxu0  ;;  %v4599_v0 = vadd.f32 %v5704_v26, %v7380_v41 }
0x183e   : > { %v4594_v7 = vadd.f32 %v4593_v37, %v7384_v11 }
0x183f   : > { %v4605_v60 = vsel %vm2689_vm8, %v4599_v0, -inf }
0x1840   : > { %v4602_v53 = vsel %vm2689_vm8, %v4594_v7, -inf }
0x1844   : > { %v5690_v22 = vpop.f32.mrb[38].mxu1 }
0x1845   : > { %v4399_v55 = vadd.f32 %v5690_v22, %v7316_v14  ;;  %v4393_v33 = vpop.f32.mrb[39].mxu1 }
0x1846   : > { %v4394_v52 = vadd.f32 %v4393_v33, %v7320_v23 }
0x1847   : > { %v4405_v34 = vsel %vm2689_vm8, %v4399_v55, -inf }
0x1848   : > { %4406 = vmax.xlane.f32.xlu0 %v4405_v34  ;;  %v4402_v8 = vsel %vm2689_vm8, %v4394_v52, -inf }
0x1849   : > { %4403 = vmax.xlane.f32.xlu1 %v4402_v8 }
0x184c   : > { %4603 = vmax.xlane.f32.xlu0 %v4602_v53 }
0x184d   : > { %4606 = vmax.xlane.f32.xlu1 %v4605_v60 }
0x18d5   : > { %v4407_v14 = vpop.xlane.xlu0 %4406 }
0x18d6   : > { %v4404_v42 = vpop.xlane.xlu1 %4403  ;;  %v4409_v23 = vsub.f32 %v4399_v55, %v4407_v14 }
0x18d7   : > { %v4408_v17 = vsub.f32 %v4394_v52, %v4404_v42 }
0x18d8   : > { %v4412_v49 = vmul.f32 1.442695, %v4409_v23  ;;  %v5374_v23 = vld [vmem:[%s7785_s8 + $0x1] ss:$0 sm:$0xff] }
0x18d9   : > { %v4604_v15 = vpop.xlane.xlu0 %4603  ;;  %v4410_v18 = vmul.f32 1.442695, %v4408_v17 }
0x18da   : > { %v4608_v11 = vsub.f32 %v4594_v7, %v4604_v15  ;;  %v4607_v5 = vpop.xlane.xlu1 %4606 }
0x18db   : > { %v4609_v45 = vsub.f32 %v4599_v0, %v4607_v5 }
0x18dc   : > { %v4610_v41 = vmul.f32 1.442695, %v4608_v11 }
0x18dd   : > { %v4612_v43 = vmul.f32 1.442695, %v4609_v45 }
0x18de   : > { %6342 = vpow2.f32 %v4610_v41 }
0x18df   : > { %6344 = vpow2.f32 %v4612_v43 }
0x18e0   : > { %6346 = vpow2.f32 %v4410_v18 }
0x18e1   : > { %6348 = vpow2.f32 %v4412_v49 }
0x18e8   : > { %v6343_v1 = vpop.eup %6342 }
0x18e9   : > { %v6345_v63 = vpop.eup %6344  ;;  %v4614_v20 = vsel %vm2689_vm8, %v6343_v1, 0.0 }
0x18ea   : > { %v6347_v28 = vpop.eup %6346  ;;  %4615 = vadd.xlane.f32.xlu0 %v4614_v20  ;;  %v4617_v38 = vsel %vm2689_vm8, %v6345_v63, 0.0 }
0x18eb   : > { %v6349_v48 = vpop.eup %6348  ;;  %4618 = vadd.xlane.f32.xlu1 %v4617_v38  ;;  %v4414_v10 = vsel %vm2689_vm8, %v6347_v28, 0.0 }
0x18ec   : > { %v4417_v16 = vsel %vm2689_vm8, %v6349_v48, 0.0 }
0x18ee   : > { %4415 = vadd.xlane.f32.xlu0 %v4414_v10  ;;  %v5380_v10 = vld [vmem:[%s7786_s13 + $0x28] sm:$0xff] }
0x18ef   : > { %4418 = vadd.xlane.f32.xlu1 %v4417_v16  ;;  %v5381_v16 = vld [vmem:[%s7786_s13 + $0x30] sm:$0xff] }
0x1900   : > { %6142 = vrot.lane.b32.xlu1 %v7486_v36, %s7798_s2 }
0x1904   : > { %6137 = vrot.lane.b32.xlu0 %v7486_v36, %s7782_s14  ;;  %4713 = vrot.lane.b32.xlu1 %v4302_v39, %s7799_s12  ;;  %s7800_s14 = smov 24  }
0x1908   : > { %4715 = vrot.lane.b32.xlu0 %v5683_v56, %s7799_s12 }
0x1977   : > { %v4616_v35 = vpop.xlane.xlu0 %4615 }
0x1978   : > { %v4619_v6 = vpop.xlane.xlu1 %4618  ;;  %6350 = vrcp.f32 %v4616_v35 }
0x197b   : > { %v4416_v25 = vpop.xlane.xlu0 %4415 }
0x197c   : > { %6352 = vrcp.f32 %v4416_v25  ;;  %v4419_v13 = vpop.xlane.xlu1 %4418 }
0x197d   : > { %6354 = vrcp.f32 %v4419_v13 }
0x197e   : > { %6356 = vrcp.f32 %v4619_v6  ;;  %v5382_v6 = vld [vmem:[%s7786_s13 + $0x38] sm:$0xff] }
0x197f   : > { %v6138_v62 = vpop.permute.xlu0 %6137  ;;  %v5957_v25 = vpack.c.bf16 %v5382_v6, %v5381_v16 }
0x1980   : > { %v6140_v12 = vunpack.i.h.bf16 %v6138_v62  ;;  %v6139_v29 = vunpack.i.l.bf16 %v6138_v62  ;;  %v6143_v47 = vpop.permute.xlu1 %6142 }
0x1981   : > { %v6145_v50 = vunpack.i.h.bf16 %v6143_v47  ;;  %v6144_v61 = vunpack.i.l.bf16 %v6143_v47 }
0x1982   : > { %v5931_v30 = vpack.c.bf16 %v6140_v12, %v6139_v29  ;;  %v6351_v40 = vpop.eup %6350 }
0x1983   : > { %v5941_v36 = vpack.c.bf16 %v6145_v50, %v6144_v61  ;;  %v4622_v2 = vmul.f32 %v6351_v40, %v6343_v1  ;;  %v4716_v22 = vpop.permute.xlu0 %4715 }
0x1984   : > { %5932 = vmatprep.subr.bf16.mxu1 %v5931_v30  ;;  %v4714_v55 = vpop.permute.xlu1 %4713  ;;  %v4736_v0 = vsel %vm2605_vm5, %v7552_v44, %v4716_v22 }
0x1985   : > { %5934 = vmatpush3.bf16.msra.mxu1 %v5931_v30  ;;  %v4735_v7 = vsel %vm2605_vm5, %v7554_v54, %v4714_v55  ;;  %v5377_v30 = vld [vmem:[%s7788_s19 + $0x1] ss:$0 sm:$0xff] }
0x1986   : > { %v6353_v32 = vpop.eup %6352  ;;  %5942 = vmatprep.subr.bf16.mxu1 %v5941_v36  ;;  %v5384_v55 = vld [vmem:[%s7790_s24 + $0x1] ss:$0 sm:$0xff] }
0x1987   : > { %v6355_v31 = vpop.eup %6354  ;;  %v4422_v57 = vmul.f32 %v6353_v32, %v6347_v28 }
0x1988   : > { %v4423_v3 = vmul.f32 %v6355_v31, %v6349_v48  ;;  %v6357_v51 = vpop.eup %6356  ;;  %v5379_v48 = vld [vmem:[%s7786_s13 + $0x20] sm:$0xff] }
0x1989   : > { %5695 = vmatprep.mubr.msk.f32.mxu1 %vm2689_vm8, %v4422_v57  ;;  %v4623_v24 = vmul.f32 %v6357_v51, %v6345_v63  ;;  %v5953_v35 = vpack.c.bf16 %v5380_v10, %v5379_v48  ;;  %v5378_v31 = vld [vmem:[%s7789_s21 + $0x1] ss:$0 sm:$0xff] }
0x198a   : > { %5696 = vmatmul.mubr.msk.f32.vlgmr.msra.gmra.mrb[40].mxu1 %vm2689_vm8, %v4423_v3 }
0x198b   : > { %5944 = vmatpush3.bf16.msra.mxu1 %v5941_v36  ;;  %5709 = vmatprep.mubr.msk.f32.mxu1 %vm2689_vm8, %v4622_v2 }
0x198c   : > { %5946 = vmatprep.subr.bf16.mxu1 %v5945_v21  ;;  %5954 = vmatprep.subr.bf16.mxu0 %v5953_v35 }
0x198d   : > { %5956 = vmatpush3.bf16.msra.mxu0 %v5953_v35 }
0x198e   : > { %5710 = vmatmul.mubr.msk.f32.vlgmr.msra.gmra.mrb[42].mxu1 %vm2689_vm8, %v4623_v24  ;;  %5958 = vmatprep.subr.bf16.mxu0 %v5957_v25  ;;  %v5387_v24 = vld [vmem:[%s7787_s5 + $0x40] sm:$0xff] }
0x198f   : > { %5948 = vmatpush3.bf16.msra.mxu1 %v5945_v21  ;;  %v5961_v4 = vpack.c.bf16 %v5388_v9, %v5387_v24  ;;  %v5389_v21 = vld [vmem:[%s7787_s5 + $0x50] sm:$0xff] }
0x1990   : > { %5950 = vmatprep.subr.bf16.mxu1 %v5949_v27 }
0x1991   : > { %5960 = vmatpush3.bf16.msra.mxu0 %v5957_v25 }
0x1993   : > { %5952 = vmatpush3.bf16.msra.mxu1 %v5949_v27  ;;  %v5965_v27 = vpack.c.bf16 %v5390_v19, %v5389_v21 }
0x1994   : > { %5962 = vmatprep.subr.bf16.mxu1 %v5961_v4 }
0x1a5d   : > { %v5697_v56 = vpop.f32.mrb[40].mxu1 }
0x1a5e   : > { %4723 = vrot.lane.b32.xlu0 %v5697_v56, %s7783_s17  ;;  %v4502_v26 = vpop.f32.mrb[41].mxu1  ;;  %v5392_v56 = vld [vmem:[%s7787_s5 + $0x68] sm:$0xff] }
0x1a5f   : > { %4721 = vrot.lane.b32.xlu1 %v4502_v26, %s7783_s17  ;;  %v5969_v26 = vpack.c.bf16 %v5392_v56, %v5391_v46  ;;  %s932_s17 = sand.u32 1, %s6424_s10  }
0x1a60   : > { %s5279_s22 = sshll.u32 %s932_s17, 4 }
0x1a61   : > { %v5711_v39 = vpop.f32.mrb[42].mxu1  ;;  %s934_s2 = scalar_lea.vmem [#allocation3], %s5279_s22  ;;  %s6481_s22 = smov [#allocation3]  }
0x1a62   : > { %4731 = vrot.lane.b32.xlu0 %v5711_v39, %s7800_s14  ;;  %v4702_v37 = vpop.f32.mrb[43].mxu1  ;;  %v5393_v39 = vld [vmem:[%s7787_s5 + $0x70] sm:$0xff] }
0x1a63   : > { %4729 = vrot.lane.b32.xlu1 %v4702_v37, %s7800_s14  ;;  %v5394_v37 = vld [vmem:[%s7787_s5 + $0x78] sm:$0xff]  ;;  %s5151_s14 = sshll.u32 %s934_s2, 4  ;;  %s7642_s5 = scalar_lea.hbm %s6636_s4, %s5408_s3  ;;  %s7644_s14 = int_to_ptr.vmem [resolvable:$true] %s5151_s14 }
0x1a64   : > { %v5973_v22 = vpack.c.bf16 %v5394_v37, %v5393_v39  ;;  %s6370_s0 = scalar_lea.vmem %s7644_s14, 256  ;;  %s6374_s3 = sshll.u32 %s6481_s22, 4  ;;  %s6375_s3 = int_to_ptr.vmem [resolvable:$false] %s6374_s3 }
0x1a65   : > { %p6371_p11 = scmp.ne.s32.totalorder %s7644_s14, %s6370_s0  ;;  %s6376_s8 = scalar_lea.vmem %s6375_s3, 512 }
0x1a66   : > { %p6377_p0 = scmp.lt.s32.totalorder %s7644_s14, %s6375_s3  ;;  %p6378_p1 = scmp.lt.s32.totalorder %s6376_s8, %s6370_s0 }
0x1a67   : > { %p6372_p12 = pnand %p6371_p11, %p6676_p5 }
0x1a68   : > { %p6379_p2 = por %p6378_p1, %p6377_p0 }
0x1a69   : > { %p6373_p13 = pneg %p6372_p12 }
0x1a6b   : > { %p6380_p3 = pnand %p6379_p2, %p6373_p13 }
0x1ad0   : > { %v4724_v33 = vpop.permute.xlu0 %4723 }
0x1ad1   : > { %v4722_v52 = vpop.permute.xlu1 %4721  ;;  %v4738_v60 = vsel %vm2689_vm8, %v4736_v0, %v4724_v33 }
0x1ad2   : > { %v4737_v8 = vsel %vm2689_vm8, %v4735_v7, %v4722_v52 }
0x1ad4   : > { %v4732_v34 = vpop.permute.xlu0 %4731 }
0x1ad5   : > { %v4730_v53 = vpop.permute.xlu1 %4729  ;;  %v4740_v42 = vsel %vm3427_vm9, %v4738_v60, %v4732_v34 }
0x1ad6   : > { %v4739_v14 = vsel %vm3427_vm9, %v4737_v8, %v4730_v53 }
0x1ad7   : > { %5720 = vmatprep.mubr.msk.f32.mxu1 %vm1050_vm3, %v4739_v14 }
0x1ad8   : > { %5721 = vmatmul.mubr.msk.f32.vlgmr.msra.gmra.mrb[44].mxu1 %vm1050_vm3, %v4740_v42 }
0x1ad9   : > { %5964 = vmatpush3.bf16.msra.mxu1 %v5961_v4 }
0x1ada   : > { %5966 = vmatprep.subr.bf16.mxu1 %v5965_v27 }
0x1add   : > { %5968 = vmatpush3.bf16.msra.mxu1 %v5965_v27 }
0x1ade   : > { %5970 = vmatprep.subr.bf16.mxu1 %v5969_v26 }
0x1ae1   : > { %5972 = vmatpush3.bf16.msra.mxu1 %v5969_v26 }
0x1ae2   : > { %5974 = vmatprep.subr.bf16.mxu1 %v5973_v22 }
0x1ae5   : > { %5976 = vmatpush3.bf16.msra.mxu1 %v5973_v22 }
0x1bab   : > { %v5722_v17 = vpop.f32.mrb[44].mxu1 }
0x1bac   : > { %v4828_v54 = vadd.f32 %v5722_v17, %v7457_v59  ;;  %v4818_v15 = vpop.f32.mrb[45].mxu1 }
0x1bad   : > { %v4827_v44 = vadd.f32 %v4818_v15, %v7459_v58 }
0x1bae   : > { %v7599_v11 = vadd.f32 %v5374_v23, %v4828_v54 }
0x1baf   : > { %v7601_v5 = vadd.f32 %v5374_v23, %v4827_v44 }
0x1bb0   : > { %v4846_v45 = vsel %vm1050_vm3, %v7599_v11, 0.0 }
0x1bb1   : > { %4847 = vadd.xlane.f32.xlu0 %v4846_v45  ;;  %v4843_v18 = vsel %vm1050_vm3, %v7601_v5, 0.0  ;;  %v5398_v45 = vld [vmem:[%s7756_s6 + $0x1] ss:$0 sm:$0xff]  ;;  %s7648_s6 = scalar_lea.sflag [#allocation4], %s932_s17 }
0x1bb2   : > { %4844 = vadd.xlane.f32.xlu1 %v4843_v18 }
0x1c3e   : > { %v4848_v41 = vpop.xlane.xlu0 %4847 }
0x1c3f   : > { %v4850_v59 = vmul.f32 0.03125, %v4848_v41  ;;  %v4845_v49 = vpop.xlane.xlu1 %4844 }
0x1c40   : > { %v4849_v58 = vmul.f32 0.03125, %v4845_v49 }
0x1c41   : > { %v4852_v43 = vsub.f32 %v7599_v11, %v4850_v59 }
0x1c42   : > { %v4851_v1 = vsub.f32 %v7601_v5, %v4849_v58 }
0x1c43   : > { %v4854_v63 = vmul.f32 %v4852_v43, %v4852_v43 }
0x1c44   : > { %v4853_v20 = vmul.f32 %v4851_v1, %v4851_v1 }
0x1c45   : > { %v4858_v28 = vsel %vm1050_vm3, %v4854_v63, 0.0 }
0x1c46   : > { %4859 = vadd.xlane.f32.xlu1 %v4858_v28  ;;  %v4855_v38 = vsel %vm1050_vm3, %v4853_v20, 0.0 }
0x1c47   : > { %4856 = vadd.xlane.f32.xlu0 %v4855_v38 }
0x1cd3   : > { %v4860_v13 = vpop.xlane.xlu1 %4859 }
0x1cd4   : > { %v4862_v62 = vmul.f32 0.03125, %v4860_v13  ;;  %v4857_v12 = vpop.xlane.xlu0 %4856 }
0x1cd5   : > { %v4861_v29 = vmul.f32 0.03125, %v4857_v12 }
0x1cd6   : > { %v4864_v47 = vadd.f32 1e-05, %v4862_v62 }
0x1cd7   : > { %v4863_v50 = vadd.f32 1e-05, %v4861_v29 }
0x1cd8   : > { %6358 = vrsqrt.f32 %v4864_v47 }
0x1cd9   : > { %6360 = vrsqrt.f32 %v4863_v50  ;;  %v5399_v50 = vld [vmem:[%s6626_s20] ss:$0 sm:$0xff] }
0x1ce2   : > { %v6359_v61 = vpop.eup %6358 }
0x1ce3   : > { %v6361_v36 = vpop.eup %6360  ;;  %v4868_v40 = vmul.f32 %v6359_v61, %v4852_v43 }
0x1ce4   : > { %v4867_v32 = vmul.f32 %v6361_v36, %v4851_v1  ;;  %v5400_v36 = vld [vmem:[%s6631_s27] ss:$0 sm:$0xff] }
0x1ce5   : > { %v4876_v57 = vmul.f32 %v5377_v30, %v4868_v40 }
0x1ce6   : > { %v4875_v3 = vmul.f32 %v5377_v30, %v4867_v32 }
0x1ce7   : > { %v4884_v2 = vadd.f32 %v5378_v31, %v4876_v57 }
0x1ce8   : > { %v4883_v51 = vadd.f32 %v5378_v31, %v4875_v3 }
0x1cea   : > { %5731 = vmatprep.mubr.msk.f32.mxu0 %vm1050_vm3, %v4883_v51 }
0x1ceb   : > { %5732 = vmatmul.mubr.msk.f32.vlgmr.msra.gmra.mrb[34].mxu0 %vm1050_vm3, %v4884_v2 }
0x1dbe   : > { %v5733_v33 = vpop.f32.mrb[34].mxu0 }
0x1dbf   : > { %v4976_v52 = vadd.f32 %v5733_v33, %v5384_v55  ;;  %v4970_v7 = vpop.f32.mrb[35].mxu0 }
0x1dc0   : > { %v4971_v34 = vadd.f32 %v5384_v55, %v4970_v7 }
0x1dc1   : > { %v4982_v0 = vmul.f32 0.70710677, %v4976_v52  ;;  %v4980_v23 = vmul.f32 0.5, %v4976_v52 }
0x1dc2   : > { %v4981_v8 = vmul.f32 0.70710677, %v4971_v34  ;;  %v4979_v42 = vmul.f32 0.5, %v4971_v34 }
0x1dc3   : > { %6362 = verf.f32 %v4982_v0 }
0x1dc4   : > { %6364 = verf.f32 %v4981_v8 }
0x1dcd   : > { %v6363_v53 = vpop.eup %6362 }
0x1dce   : > { %v6365_v60 = vpop.eup %6364  ;;  %v4986_v14 = vadd.f32 1.0, %v6363_v53 }
0x1dcf   : > { %v4985_v17 = vadd.f32 1.0, %v6365_v60 }
0x1dd0   : > { %v4988_v15 = vmul.f32 %v4986_v14, %v4980_v23 }
0x1dd1   : > { %v4987_v54 = vmul.f32 %v4985_v17, %v4979_v42 }
0x1dd3   : > { %5750 = vmatprep.mubr.msk.f32.mxu1 %vm3680_vm10, %v4987_v54 }
0x1dd4   : > { %5751 = vmatmul.mubr.msk.f32.vlgmr.msra.gmra.mrb[46].mxu1 %vm3680_vm10, %v4988_v15 }
0x1ea7   : > { %v5752_v44 = vpop.f32.mrb[46].mxu1 }
0x1ea8   : > { %v5080_v18 = vadd.f32 %v5752_v44, %v7599_v11  ;;  %v5070_v41 = vpop.f32.mrb[47].mxu1 }
0x1ea9   : > { %v5079_v59 = vadd.f32 %v5070_v41, %v7601_v5 }
0x1eaa   : > { %v5090_v49 = vadd.f32 %v5398_v45, %v5080_v18 }
0x1eab   : > { %v5089_v58 = vadd.f32 %v5398_v45, %v5079_v59 }
0x1eac   : > { %v5096_v43 = vsel %vm1050_vm3, %v5090_v49, 0.0 }
0x1ead   : > { %5097 = vadd.xlane.f32.xlu1 %v5096_v43  ;;  %v5093_v1 = vsel %vm1050_vm3, %v5089_v58, 0.0 }
0x1eae   : > { %5094 = vadd.xlane.f32.xlu0 %v5093_v1 }
0x1f3a   : > { %v5098_v63 = vpop.xlane.xlu1 %5097 }
0x1f3b   : > { %v5100_v20 = vmul.f32 0.03125, %v5098_v63  ;;  %v5095_v28 = vpop.xlane.xlu0 %5094 }
0x1f3c   : > { %v5099_v38 = vmul.f32 0.03125, %v5095_v28 }
0x1f3d   : > { %v5102_v48 = vsub.f32 %v5090_v49, %v5100_v20 }
0x1f3e   : > { %v5101_v10 = vsub.f32 %v5089_v58, %v5099_v38 }
0x1f3f   : > { %v5104_v16 = vmul.f32 %v5102_v48, %v5102_v48 }
0x1f40   : > { %v5103_v11 = vmul.f32 %v5101_v10, %v5101_v10 }
0x1f41   : > { %v5108_v5 = vsel %vm1050_vm3, %v5104_v16, 0.0 }
0x1f42   : > { %5109 = vadd.xlane.f32.xlu1 %v5108_v5  ;;  %v5105_v35 = vsel %vm1050_vm3, %v5103_v11, 0.0 }
0x1f43   : > { %5106 = vadd.xlane.f32.xlu0 %v5105_v35 }
0x1fcf   : > { %v5110_v6 = vpop.xlane.xlu1 %5109 }
0x1fd0   : > { %v5112_v25 = vmul.f32 0.03125, %v5110_v6  ;;  %v5107_v13 = vpop.xlane.xlu0 %5106 }
0x1fd1   : > { %v5111_v62 = vmul.f32 0.03125, %v5107_v13 }
0x1fd2   : > { %v5114_v12 = vadd.f32 1e-05, %v5112_v25 }
0x1fd3   : > { %v5113_v29 = vadd.f32 1e-05, %v5111_v62 }
0x1fd4   : > { %6366 = vrsqrt.f32 %v5114_v12 }
0x1fd5   : > { %6368 = vrsqrt.f32 %v5113_v29 }
0x1fde   : > { %v6367_v47 = vpop.eup %6366 }
0x1fdf   : > { %v6369_v61 = vpop.eup %6368  ;;  %v5118_v30 = vmul.f32 %v6367_v47, %v5102_v48 }
0x1fe0   : > { %v5117_v40 = vmul.f32 %v6369_v61, %v5101_v10 }
0x1fe1   : > { %v5126_v32 = vmul.f32 %v5399_v50, %v5118_v30 }
0x1fe2   : > { %v5125_v31 = vmul.f32 %v5399_v50, %v5117_v40 }
0x1fe3   : > { %v5134_v57 = vadd.f32 %v5400_v36, %v5126_v32 }
0x1fe4   : > { %v5133_v3 = vadd.f32 %v5400_v36, %v5125_v31 }
0x1fe5   : > { %5136 = vst.msk [vmem:[%s934_s2 + $0x8] sm:$0xff] %vm1050_vm3, %v5134_v57 }
0x1fe6   : > { %5135 = vst.msk [vmem:[%s934_s2] sm:$0xff] %vm1050_vm3, %v5133_v3 }
0x1fe7   : > { %6383 = shalt.err (!%p6380_p3)
}
0x1fe8   : > { %s6384_s17 = scalar_lea.hbm %s7642_s5, 256  ;;  %s6388_s2 = scalar_lea.hbm %s6636_s4, 512 }
0x1fe9   : > { %p6385_p4 = scmp.ne.s32.totalorder %s7642_s5, %s6384_s17  ;;  %p6389_p9 = scmp.lt.u32.totalorder %s7642_s5, %s6636_s4 }
0x1fea   : > { %p6390_p10 = scmp.lt.u32.totalorder %s6388_s2, %s6384_s17  ;;  %p6392_p12 = scmp.lt.u32.totalorder %s6384_s17, %s7642_s5 }
0x1feb   : > { %p6386_p7 = pnand %p6385_p4, %p6676_p5 }
0x1fec   : > { %p6391_p11 = por %p6390_p10, %p6389_p9 }
0x1fed   : > { %p6387_p8 = pneg %p6386_p7 }
0x1fee   : > { %p6393_p0 = por %p6392_p12, %p6391_p11 }
0x1ff0   : > { %p6394_p13 = pnand %p6393_p0, %p6387_p8 }
0x1ff2   : > { %6397 = shalt.err (!%p6394_p13)
}
0x1ff3   : > { %s6482_s8 = smov 128  }
0x1ff4   : > { %5977 = dma.vmem_to_hbm [thread:$0]  (%p6676_p5), %s7644_s14, 256, %s7642_s5, %s7648_s6, %s6482_s8, %s6482_s8, %s7799_s12  }
0x1ff5 PF: > { %p5983_p1 = scmp.ge.s32.totalorder %s6432_s15, 2  ;;  %s5166_s0 = sand.u32 1, %s6420_s7  }
0x1ff6   : > { %s5167_s22 = scalar_lea.sflag [#allocation4], %s5166_s0 }
0x1ff7   : > { %p5980_p2 = pnand %p5983_p1, %p6680_p6 }
0x1ff9   : > { %6415 = dma.done.wait (!%p5980_p2), %s5167_s22, 256  }
0x1ffa   : > { %6417 = vsyncadd (!%p5980_p2), %s5167_s22, 4294967040  ;;  %p69_p3 = scmp.ge.s32.totalorder %s6663_s18, 4   ;;  %s7801_s7 = smov %s6424_s10 }
0x1ffb   : > { %s7802_s10 = smov %s6428_s11  ;;  %s7803_s11 = smov %s6674_s26 }
0x1ffc   : > { %s7804_s15 = smov %s6663_s18  ;;  %71 = sbr.rel (!%p69_p3) target bundleno = 65 (0x41), region = 224 }
0x2003   :  { %5172 = vsyncpa [#allocation4], 1 }
0x2004   :  { %5174 = vsyncpa [#allocation4 + $0x1], 1 }

</bundles_post_ra>
